<compile_context>
chip_gen: v6e
topology: v6e:2x2x1
jax: 0.10.0
libtpu: 0.0.40
codegen_flags: <defaults>
</compile_context>

<pallas_src>
import functools

import jax
import jax.numpy as jnp
from jax import lax
from jax.experimental import pallas as pl
from jax.experimental.pallas import tpu as pltpu


# Left margin (in W columns) inside the bf16 conv1 scratch so that the main
# scratch stores are sublane-aligned (bf16 sublane tile = 16).  conv2 reads at
# statically-known offsets _PAD_L-1 .. _PAD_L+1 (unaligned loads are cheap).
_PAD_L = 16


# ------------------------------ Pallas kernel --------------------------------


def _bottleneck_kernel(x_mid_ref, x_top_ref, x_bot_ref,
                       w1_ref, b1_ref, w2_ref, b2_ref, w3_ref, b3_ref,
                       o_ref, y1p_ref, *, th, W, Cin, Cmid, Cout):
    """Fused Bottleneck forward for one (image, row-block) tile.

    x_mid_ref : (1, th, W, Cin) f32  rows [i*th, (i+1)*th) of image n
    x_top_ref : (1, 1, W, Cin)  f32  row i*th - 1   (clamped; masked at border)
    x_bot_ref : (1, 1, W, Cin)  f32  row (i+1)*th   (clamped; masked at border)
    w1_ref    : (Cin, Cmid)     bf16 (BN1 scale folded in)
    w2_ref    : (9, Cmid, Cmid) bf16 (BN2 scale folded in), tap order kh*3+kw
    w3_ref    : (Cmid, Cout)    bf16 (BN3 scale folded in)
    b*_ref    : (1, C)          f32  folded BN biases
    o_ref     : (1, th, W, Cout) f32
    y1p_ref   : (th+2, W+2*_PAD_L, Cmid) bf16 VMEM scratch (conv1 out + halo)
    """
    i = pl.program_id(1)
    nb = pl.num_programs(1)

    # ---- stage 1: conv1 (1x1) + bn1 + relu -----------------------------------
    # Single matmul over the row block plus both halo rows ((th+2)*W rows).
    x_all = jnp.concatenate(
        [x_top_ref[0], x_mid_ref[0], x_bot_ref[0]], axis=0)       # (th+2, W, Cin)
    x_all = x_all.reshape((th + 2) * W, Cin).astype(jnp.bfloat16)
    y1 = jnp.dot(x_all, w1_ref[...], preferred_element_type=jnp.float32)
    y1 = jnp.maximum(y1 + b1_ref[...], 0.0).astype(jnp.bfloat16)  # single cast
    y1 = y1.reshape(th + 2, W, Cmid)

    # Zero only the two margin columns conv2 reads (per-step; see header note).
    zcol = jnp.zeros((th + 2, 1, Cmid), jnp.bfloat16)
    y1p_ref[pl.ds(0, th + 2), pl.ds(_PAD_L - 1, 1), :] = zcol
    y1p_ref[pl.ds(0, th + 2), pl.ds(_PAD_L + W, 1), :] = zcol

    # Halo rows are zero-masked at the image border; middle rows stored as-is.
    top_ok = (i > 0).astype(jnp.bfloat16)
    bot_ok = (i < nb - 1).astype(jnp.bfloat16)
    y1p_ref[pl.ds(0, 1), pl.ds(_PAD_L, W), :] = y1[0:1] * top_ok
    y1p_ref[pl.ds(1, th), pl.ds(_PAD_L, W), :] = y1[1:th + 1]
    y1p_ref[pl.ds(th + 1, 1), pl.ds(_PAD_L, W), :] = y1[th + 1:th + 2] * bot_ok

    # ---- stage 2: conv2 (3x3, pad=1, stride=1) + bn2 + relu -------------------
    # 3 band loads (one per kw); the 3 kh taps per band are leading-dim value
    # slices (no extra VMEM copies).  Accumulator seeded by the first dot.
    acc = None
    for kw in range(3):
        band = y1p_ref[pl.ds(0, th + 2), pl.ds(_PAD_L - 1 + kw, W), :]
        for kh in range(3):
            tap = band[kh:kh + th].reshape(th * W, Cmid)           # bf16
            part = jnp.dot(tap, w2_ref[kh * 3 + kw],
                           preferred_element_type=jnp.float32)
            acc = part if acc is None else acc + part
    y2 = jnp.maximum(acc + b2_ref[...], 0.0).astype(jnp.bfloat16)

    # ---- stage 3: conv3 (1x1) + bn3 + residual add + relu ---------------------
    y3 = jnp.dot(y2, w3_ref[...], preferred_element_type=jnp.float32)
    resid = x_mid_ref[0].reshape(th * W, Cin)     # reloaded here (frees vregs)
    y3 = y3 + b3_ref[...] + resid                 # identity residual (f32)
    o_ref[...] = jnp.maximum(y3, 0.0).reshape(1, th, W, Cout).astype(o_ref.dtype)


# -------------------------------- Wrapper ------------------------------------


def _fold_bn(gamma, beta, mean, var, eps):
    scale = gamma / jnp.sqrt(var + eps)
    bias = beta - mean * scale
    return scale, bias


def _vmem_estimate(th, W, Cin, Cmid, Cout):
    b = 0
    b += 2 * th * W * Cin * 4                           # x_mid (double buffered)
    b += 2 * 2 * W * Cin * 4                            # halo rows
    b += 2 * th * W * Cout * 4                          # output block
    b += (th + 2) * (W + 2 * _PAD_L) * Cmid * 2         # bf16 scratch
    b += 2 * (Cin * Cmid + 9 * Cmid * Cmid + Cmid * Cout) * 2   # bf16 weights
    b += 2 * (2 * Cmid + Cout) * 4                      # biases
    b += (th + 2) * W * (Cin + 2 * Cmid) * 4            # live intermediates headroom
    return b


def _pick_block_rows(H, W, Cin, Cmid, Cout, budget=8 << 20):
    # Largest divisor of H whose per-step working set stays under a budget that
    # is safe on every chip (v5e 16 MiB scoped default, v7x 64 MiB physical).
    for th in range(H, 0, -1):
        if H % th == 0 and _vmem_estimate(th, W, Cin, Cmid, Cout) <= budget:
            return th
    return 1


def bottleneck_forward_nhwc(x, params, bn_eps=1e-5, block_rows=None):
    """Bottleneck forward (stride=1, downsample=None). Input/output NHWC f32."""
    x = x.astype(jnp.float32)
    N, H, W, Cin = x.shape

    w1, w2, w3 = params["w1"], params["w2"], params["w3"]          # OIHW
    Cmid = w1.shape[0]
    Cout = w3.shape[0]
    assert Cout == Cin, "identity residual requires inplanes == planes * 4"

    s1, b1 = _fold_bn(params["g1"], params["be1"], params["m1"], params["v1"], bn_eps)
    s2, b2 = _fold_bn(params["g2"], params["be2"], params["m2"], params["v2"], bn_eps)
    s3, b3 = _fold_bn(params["g3"], params["be3"], params["m3"], params["v3"], bn_eps)

    # Fold BN scales into the conv weights (one-time host-side transform) and
    # cast weights to bf16 for the MXU; biases stay f32.
    w1m = (w1[:, :, 0, 0].T * s1[None, :]).astype(jnp.bfloat16)             # (Cin, Cmid)
    w2m = (jnp.transpose(w2, (2, 3, 1, 0)).reshape(9, Cmid, Cmid)
           * s2[None, None, :]).astype(jnp.bfloat16)                        # (9, Cmid, Cmid)
    w3m = (w3[:, :, 0, 0].T * s3[None, :]).astype(jnp.bfloat16)             # (Cmid, Cout)
    b1 = b1.reshape(1, Cmid).astype(jnp.float32)
    b2 = b2.reshape(1, Cmid).astype(jnp.float32)
    b3 = b3.reshape(1, Cout).astype(jnp.float32)

    th = _pick_block_rows(H, W, Cin, Cmid, Cout) if block_rows is None else block_rows
    assert H % th == 0, "block_rows must divide H"
    nb = H // th

    kernel = functools.partial(_bottleneck_kernel, th=th, W=W,
                               Cin=Cin, Cmid=Cmid, Cout=Cout)

    # NOTE: the halo BlockSpecs have block_shape == 1 along H on purpose, so
    # the block index returned by their index_map equals the *row* index.
    out = pl.pallas_call(
        kernel,
        out_shape=jax.ShapeDtypeStruct((N, H, W, Cout), jnp.float32),
        grid_spec=pltpu.PrefetchScalarGridSpec(
            num_scalar_prefetch=0,
            grid=(N, nb),
            in_specs=[
                # current row block (also re-read as the residual)
                pl.BlockSpec((1, th, W, Cin), lambda n, i: (n, i, 0, 0)),
                # 1-row halo above / below (clamped; zero-masked in-kernel)
                pl.BlockSpec((1, 1, W, Cin),
                             lambda n, i: (n, jnp.maximum(i * th - 1, 0), 0, 0)),
                pl.BlockSpec((1, 1, W, Cin),
                             lambda n, i: (n, jnp.minimum((i + 1) * th, H - 1), 0, 0)),
                # folded weights / biases (constant blocks)
                pl.BlockSpec((Cin, Cmid), lambda n, i: (0, 0)),
                pl.BlockSpec((1, Cmid), lambda n, i: (0, 0)),
                pl.BlockSpec((9, Cmid, Cmid), lambda n, i: (0, 0, 0)),
                pl.BlockSpec((1, Cmid), lambda n, i: (0, 0)),
                pl.BlockSpec((Cmid, Cout), lambda n, i: (0, 0)),
                pl.BlockSpec((1, Cout), lambda n, i: (0, 0)),
            ],
            out_specs=pl.BlockSpec((1, th, W, Cout), lambda n, i: (n, i, 0, 0)),
            scratch_shapes=[
                pltpu.VMEM((th + 2, W + 2 * _PAD_L, Cmid), jnp.bfloat16)],
        ),
        compiler_params=pltpu.CompilerParams(
            dimension_semantics=("parallel", "parallel")),
    )(x, x, x, w1m, b1, w2m, b2, w3m, b3)

    return out


def bottleneck_forward(x_nchw, params, bn_eps=1e-5, block_rows=None):
    """NCHW adapter matching the PyTorch module interface."""
    x = jnp.transpose(x_nchw, (0, 2, 3, 1))                        # -> NHWC
    out = bottleneck_forward_nhwc(x, params, bn_eps=bn_eps, block_rows=block_rows)
    return jnp.transpose(out, (0, 3, 1, 2))                        # -> NCHW


# ------------------------------- Reference ------------------------------------


def _ref_bottleneck(x_nchw, params, bn_eps=1e-5):
    x = jnp.transpose(x_nchw, (0, 2, 3, 1)).astype(jnp.float32)
    dn = ("NHWC", "OIHW", "NHWC")

    def conv(h, w, pad):
        return lax.conv_general_dilated(h, w, (1, 1), pad, dimension_numbers=dn,
                                        precision=lax.Precision.HIGHEST)

    def bn(h, g, be, m, v):
        return (h - m) / jnp.sqrt(v + bn_eps) * g + be

    out = jnp.maximum(bn(conv(x, params["w1"], "VALID"),
                         params["g1"], params["be1"], params["m1"], params["v1"]), 0.0)
    out = jnp.maximum(bn(conv(out, params["w2"], [(1, 1), (1, 1)]),
                         params["g2"], params["be2"], params["m2"], params["v2"]), 0.0)
    out = bn(conv(out, params["w3"], "VALID"),
             params["g3"], params["be3"], params["m3"], params["v3"])
    out = jnp.maximum(out + x, 0.0)
    return jnp.transpose(out, (0, 3, 1, 2))


# ---------------------------------- Main --------------------------------------


if __name__ == "__main__":
    # inplanes=128, planes=32, expansion=4 -> out channels = 128 (== inplanes,
    # so the identity residual is valid). stride=1, downsample=None.
    # Out channels kept at 128 so the output lane dim is dense.
    N, inplanes, H, W = 2, 128, 16, 16
    planes = 32
    outplanes = planes * 4

    key = jax.random.PRNGKey(0)
    keys = jax.random.split(key, 8)

    def bn_params(k, c):
        k0, k1, k2, k3 = jax.random.split(k, 4)
        return dict(
            gamma=1.0 + 0.1 * jax.random.normal(k0, (c,), jnp.float32),
            beta=0.1 * jax.random.normal(k1, (c,), jnp.float32),
            mean=0.1 * jax.random.normal(k2, (c,), jnp.float32),
            var=jax.random.uniform(k3, (c,), jnp.float32, 0.5, 1.5),
        )

    bn1 = bn_params(keys[3], planes)
    bn2 = bn_params(keys[4], planes)
    bn3 = bn_params(keys[5], outplanes)

    params = {
        # conv weights in PyTorch OIHW layout (bias=False)
        "w1": 0.1 * jax.random.normal(keys[0], (planes, inplanes, 1, 1), jnp.float32),
        "w2": 0.1 * jax.random.normal(keys[1], (planes, planes, 3, 3), jnp.float32),
        "w3": 0.1 * jax.random.normal(keys[2], (outplanes, planes, 1, 1), jnp.float32),
        "g1": bn1["gamma"], "be1": bn1["beta"], "m1": bn1["mean"], "v1": bn1["var"],
        "g2": bn2["gamma"], "be2": bn2["beta"], "m2": bn2["mean"], "v2": bn2["var"],
        "g3": bn3["gamma"], "be3": bn3["beta"], "m3": bn3["mean"], "v3": bn3["var"],
    }

    x = jax.random.normal(keys[6], (N, inplanes, H, W), jnp.float32)  # NCHW
    ref = jax.block_until_ready(_ref_bottleneck(x, params))
    scale = float(jnp.max(jnp.abs(ref))) + 1e-6

    # Default config (whole-image row block, nb=1).
    out = jax.block_until_ready(bottleneck_forward(x, params))
    assert out.shape == (N, outplanes, H, W), out.shape
    rel_err = float(jnp.max(jnp.abs(out - ref))) / scale
    assert rel_err < 2e-2, f"relative error vs reference: {rel_err}"

    # Also exercise the interior-halo path (nb > 1) with the same kernel.
    out2 = jax.block_until_ready(bottleneck_forward(x, params, block_rows=4))
    rel_err2 = float(jnp.max(jnp.abs(out2 - ref))) / scale
    assert rel_err2 < 2e-2, f"relative error (block_rows=4) vs reference: {rel_err2}"

    print("KERNEL_OK")
</pallas_src>

<mosaic_0001>
module attributes {stable_mosaic.version = 11 : i64} {
  func.func @_bottleneck_kernel(%arg0: i32, %arg1: i32, %arg2: memref<1x16x16x128xf32, #tpu.memory_space<vmem>>, %arg3: memref<1x1x16x128xf32, #tpu.memory_space<vmem>>, %arg4: memref<1x1x16x128xf32, #tpu.memory_space<vmem>>, %arg5: memref<128x32xbf16, #tpu.memory_space<vmem>>, %arg6: memref<1x32xf32, #tpu.memory_space<vmem>>, %arg7: memref<9x32x32xbf16, #tpu.memory_space<vmem>>, %arg8: memref<1x32xf32, #tpu.memory_space<vmem>>, %arg9: memref<32x128xbf16, #tpu.memory_space<vmem>>, %arg10: memref<1x128xf32, #tpu.memory_space<vmem>>, %arg11: memref<1x16x16x128xf32, #tpu.memory_space<vmem>>, %arg12: memref<18x48x32xbf16, #tpu.memory_space<vmem>>) attributes {dimension_semantics = [#tpu.dimension_semantics<parallel>, #tpu.dimension_semantics<parallel>], iteration_bounds = array<i64: 2, 1>, scalar_prefetch = 0 : i64, scratch_operands = 1 : i64, tpu.core_type = #tpu.core_type<tc>, window_params = [{transform_indices = @transform_0, window_bounds = array<i64: 1, 16, 16, 128>}, {transform_indices = @transform_1, window_bounds = array<i64: 1, 1, 16, 128>}, {transform_indices = @transform_2, window_bounds = array<i64: 1, 1, 16, 128>}, {pipeline_mode = #tpu.pipeline_mode<synchronous>, transform_indices = @transform_3, window_bounds = array<i64: 128, 32>}, {pipeline_mode = #tpu.pipeline_mode<synchronous>, transform_indices = @transform_4, window_bounds = array<i64: 1, 32>}, {pipeline_mode = #tpu.pipeline_mode<synchronous>, transform_indices = @transform_5, window_bounds = array<i64: 9, 32, 32>}, {pipeline_mode = #tpu.pipeline_mode<synchronous>, transform_indices = @transform_6, window_bounds = array<i64: 1, 32>}, {pipeline_mode = #tpu.pipeline_mode<synchronous>, transform_indices = @transform_7, window_bounds = array<i64: 32, 128>}, {pipeline_mode = #tpu.pipeline_mode<synchronous>, transform_indices = @transform_8, window_bounds = array<i64: 1, 128>}, {transform_indices = @transform_9, window_bounds = array<i64: 1, 16, 16, 128>}]} {
    %c0 = arith.constant 0 : index
    %c0_0 = arith.constant 0 : index
    %c0_1 = arith.constant 0 : index
    %c0_2 = arith.constant 0 : index
    %0 = vector.load %arg3[%c0, %c0_0, %c0_1, %c0_2] : memref<1x1x16x128xf32, #tpu.memory_space<vmem>>, vector<1x1x16x128xf32>
    %1 = vector.shape_cast %0 : vector<1x1x16x128xf32> to vector<1x16x128xf32>
    %c0_3 = arith.constant 0 : index
    %c0_4 = arith.constant 0 : index
    %c0_5 = arith.constant 0 : index
    %c0_6 = arith.constant 0 : index
    %2 = vector.load %arg2[%c0_3, %c0_4, %c0_5, %c0_6] : memref<1x16x16x128xf32, #tpu.memory_space<vmem>>, vector<1x16x16x128xf32>
    %3 = vector.shape_cast %2 : vector<1x16x16x128xf32> to vector<16x16x128xf32>
    %c0_7 = arith.constant 0 : index
    %c0_8 = arith.constant 0 : index
    %c0_9 = arith.constant 0 : index
    %c0_10 = arith.constant 0 : index
    %4 = vector.load %arg4[%c0_7, %c0_8, %c0_9, %c0_10] : memref<1x1x16x128xf32, #tpu.memory_space<vmem>>, vector<1x1x16x128xf32>
    %5 = vector.shape_cast %4 : vector<1x1x16x128xf32> to vector<1x16x128xf32>
    %6 = tpu.concatenate %1, %3, %5 in 0 : vector<1x16x128xf32>, vector<16x16x128xf32>, vector<1x16x128xf32> -> vector<18x16x128xf32>
    %7 = vector.shape_cast %6 : vector<18x16x128xf32> to vector<288x128xf32>
    %8 = arith.truncf %7 : vector<288x128xf32> to vector<288x128xbf16>
    %c0_11 = arith.constant 0 : index
    %c0_12 = arith.constant 0 : index
    %9 = vector.load %arg5[%c0_11, %c0_12] : memref<128x32xbf16, #tpu.memory_space<vmem>>, vector<128x32xbf16>
    %cst = arith.constant dense<0.000000e+00> : vector<288x32xf32>
    %10 = tpu.matmul %8, %9, %cst {dimension_numbers = #tpu.dot_dimension_numbers<[1], [0], [0], [1], [0, 0, 1, 1], [], []>} : vector<288x128xbf16>, vector<128x32xbf16>, vector<288x32xf32> -> vector<288x32xf32>
    %c0_13 = arith.constant 0 : index
    %c0_14 = arith.constant 0 : index
    %11 = vector.load %arg6[%c0_13, %c0_14] : memref<1x32xf32, #tpu.memory_space<vmem>>, vector<1x32xf32>
    %12 = vector.broadcast %11 : vector<1x32xf32> to vector<288x32xf32>
    %13 = arith.addf %10, %12 : vector<288x32xf32>
    %cst_15 = arith.constant 0.000000e+00 : f32
    %14 = vector.broadcast %cst_15 : f32 to vector<288x32xf32>
    %15 = arith.maximumf %13, %14 : vector<288x32xf32>
    %16 = arith.truncf %15 : vector<288x32xf32> to vector<288x32xbf16>
    %17 = vector.shape_cast %16 : vector<288x32xbf16> to vector<18x16x32xbf16>
    %cst_16 = arith.constant 0.000000e+00 : bf16
    %18 = vector.broadcast %cst_16 : bf16 to vector<18x1x32xbf16>
    %c0_17 = arith.constant 0 : index
    %c15 = arith.constant 15 : index
    %c0_18 = arith.constant 0 : index
    %19 = vector.load %arg12[%c0_17, %c15, %c0_18] : memref<18x48x32xbf16, #tpu.memory_space<vmem>>, vector<18x1x32xbf16>
    tpu.vector_store %arg12[%c0_17, %c15, %c0_18], %18 {strides = array<i32>} : memref<18x48x32xbf16, #tpu.memory_space<vmem>>, vector<18x1x32xbf16>,
    %c0_19 = arith.constant 0 : index
    %c32 = arith.constant 32 : index
    %c0_20 = arith.constant 0 : index
    %20 = vector.load %arg12[%c0_19, %c32, %c0_20] : memref<18x48x32xbf16, #tpu.memory_space<vmem>>, vector<18x1x32xbf16>
    tpu.vector_store %arg12[%c0_19, %c32, %c0_20], %18 {strides = array<i32>} : memref<18x48x32xbf16, #tpu.memory_space<vmem>>, vector<18x1x32xbf16>,
    %c0_i32 = arith.constant 0 : i32
    %21 = arith.cmpi sgt, %arg1, %c0_i32 : i32
    %22 = arith.extui %21 : i1 to i32
    %23 = arith.sitofp %22 : i32 to f32
    %24 = arith.truncf %23 : f32 to bf16
    %c0_i32_21 = arith.constant 0 : i32
    %25 = arith.cmpi slt, %arg1, %c0_i32_21 : i32
    %26 = arith.extui %25 : i1 to i32
    %27 = arith.sitofp %26 : i32 to f32
    %28 = arith.truncf %27 : f32 to bf16
    %29 = vector.extract_strided_slice %17 {offsets = [0, 0, 0], sizes = [1, 16, 32], strides = [1, 1, 1]} : vector<18x16x32xbf16> to vector<1x16x32xbf16>
    %30 = vector.broadcast %24 : bf16 to vector<1x16x32xbf16>
    %31 = arith.mulf %29, %30 : vector<1x16x32xbf16>
    %c0_22 = arith.constant 0 : index
    %c16 = arith.constant 16 : index
    %c0_23 = arith.constant 0 : index
    %32 = vector.load %arg12[%c0_22, %c16, %c0_23] : memref<18x48x32xbf16, #tpu.memory_space<vmem>>, vector<1x16x32xbf16>
    tpu.vector_store %arg12[%c0_22, %c16, %c0_23], %31 {strides = array<i32>} : memref<18x48x32xbf16, #tpu.memory_space<vmem>>, vector<1x16x32xbf16>,
    %33 = vector.extract_strided_slice %17 {offsets = [1, 0, 0], sizes = [16, 16, 32], strides = [1, 1, 1]} : vector<18x16x32xbf16> to vector<16x16x32xbf16>
    %c1 = arith.constant 1 : index
    %c16_24 = arith.constant 16 : index
    %c0_25 = arith.constant 0 : index
    %34 = vector.load %arg12[%c1, %c16_24, %c0_25] : memref<18x48x32xbf16, #tpu.memory_space<vmem>>, vector<16x16x32xbf16>
    tpu.vector_store %arg12[%c1, %c16_24, %c0_25], %33 {strides = array<i32>} : memref<18x48x32xbf16, #tpu.memory_space<vmem>>, vector<16x16x32xbf16>,
    %35 = vector.extract_strided_slice %17 {offsets = [17, 0, 0], sizes = [1, 16, 32], strides = [1, 1, 1]} : vector<18x16x32xbf16> to vector<1x16x32xbf16>
    %36 = vector.broadcast %28 : bf16 to vector<1x16x32xbf16>
    %37 = arith.mulf %35, %36 : vector<1x16x32xbf16>
    %c17 = arith.constant 17 : index
    %c16_26 = arith.constant 16 : index
    %c0_27 = arith.constant 0 : index
    %38 = vector.load %arg12[%c17, %c16_26, %c0_27] : memref<18x48x32xbf16, #tpu.memory_space<vmem>>, vector<1x16x32xbf16>
    tpu.vector_store %arg12[%c17, %c16_26, %c0_27], %37 {strides = array<i32>} : memref<18x48x32xbf16, #tpu.memory_space<vmem>>, vector<1x16x32xbf16>,
    %c0_28 = arith.constant 0 : index
    %c15_29 = arith.constant 15 : index
    %c0_30 = arith.constant 0 : index
    %39 = vector.load %arg12[%c0_28, %c15_29, %c0_30] : memref<18x48x32xbf16, #tpu.memory_space<vmem>>, vector<18x16x32xbf16>
    %40 = vector.extract_strided_slice %39 {offsets = [0, 0, 0], sizes = [16, 16, 32], strides = [1, 1, 1]} : vector<18x16x32xbf16> to vector<16x16x32xbf16>
    %41 = vector.shape_cast %40 : vector<16x16x32xbf16> to vector<256x32xbf16>
    %c0_31 = arith.constant 0 : index
    %c0_32 = arith.constant 0 : index
    %c0_33 = arith.constant 0 : index
    %42 = vector.load %arg7[%c0_31, %c0_32, %c0_33] : memref<9x32x32xbf16, #tpu.memory_space<vmem>>, vector<1x32x32xbf16>
    %43 = vector.shape_cast %42 : vector<1x32x32xbf16> to vector<32x32xbf16>
    %cst_34 = arith.constant dense<0.000000e+00> : vector<256x32xf32>
    %44 = tpu.matmul %41, %43, %cst_34 {dimension_numbers = #tpu.dot_dimension_numbers<[1], [0], [0], [1], [0, 0, 1, 1], [], []>} : vector<256x32xbf16>, vector<32x32xbf16>, vector<256x32xf32> -> vector<256x32xf32>
    %45 = vector.extract_strided_slice %39 {offsets = [1, 0, 0], sizes = [16, 16, 32], strides = [1, 1, 1]} : vector<18x16x32xbf16> to vector<16x16x32xbf16>
    %46 = vector.shape_cast %45 : vector<16x16x32xbf16> to vector<256x32xbf16>
    %c3 = arith.constant 3 : index
    %c0_35 = arith.constant 0 : index
    %c0_36 = arith.constant 0 : index
    %47 = vector.load %arg7[%c3, %c0_35, %c0_36] : memref<9x32x32xbf16, #tpu.memory_space<vmem>>, vector<1x32x32xbf16>
    %48 = vector.shape_cast %47 : vector<1x32x32xbf16> to vector<32x32xbf16>
    %cst_37 = arith.constant dense<0.000000e+00> : vector<256x32xf32>
    %49 = tpu.matmul %46, %48, %cst_37 {dimension_numbers = #tpu.dot_dimension_numbers<[1], [0], [0], [1], [0, 0, 1, 1], [], []>} : vector<256x32xbf16>, vector<32x32xbf16>, vector<256x32xf32> -> vector<256x32xf32>
    %50 = arith.addf %44, %49 : vector<256x32xf32>
    %51 = vector.extract_strided_slice %39 {offsets = [2, 0, 0], sizes = [16, 16, 32], strides = [1, 1, 1]} : vector<18x16x32xbf16> to vector<16x16x32xbf16>
    %52 = vector.shape_cast %51 : vector<16x16x32xbf16> to vector<256x32xbf16>
    %c6 = arith.constant 6 : index
    %c0_38 = arith.constant 0 : index
    %c0_39 = arith.constant 0 : index
    %53 = vector.load %arg7[%c6, %c0_38, %c0_39] : memref<9x32x32xbf16, #tpu.memory_space<vmem>>, vector<1x32x32xbf16>
    %54 = vector.shape_cast %53 : vector<1x32x32xbf16> to vector<32x32xbf16>
    %cst_40 = arith.constant dense<0.000000e+00> : vector<256x32xf32>
    %55 = tpu.matmul %52, %54, %cst_40 {dimension_numbers = #tpu.dot_dimension_numbers<[1], [0], [0], [1], [0, 0, 1, 1], [], []>} : vector<256x32xbf16>, vector<32x32xbf16>, vector<256x32xf32> -> vector<256x32xf32>
    %56 = arith.addf %50, %55 : vector<256x32xf32>
    %c0_41 = arith.constant 0 : index
    %c16_42 = arith.constant 16 : index
    %c0_43 = arith.constant 0 : index
    %57 = vector.load %arg12[%c0_41, %c16_42, %c0_43] : memref<18x48x32xbf16, #tpu.memory_space<vmem>>, vector<18x16x32xbf16>
    %58 = vector.extract_strided_slice %57 {offsets = [0, 0, 0], sizes = [16, 16, 32], strides = [1, 1, 1]} : vector<18x16x32xbf16> to vector<16x16x32xbf16>
    %59 = vector.shape_cast %58 : vector<16x16x32xbf16> to vector<256x32xbf16>
    %c1_44 = arith.constant 1 : index
    %c0_45 = arith.constant 0 : index
    %c0_46 = arith.constant 0 : index
    %60 = vector.load %arg7[%c1_44, %c0_45, %c0_46] : memref<9x32x32xbf16, #tpu.memory_space<vmem>>, vector<1x32x32xbf16>
    %61 = vector.shape_cast %60 : vector<1x32x32xbf16> to vector<32x32xbf16>
    %cst_47 = arith.constant dense<0.000000e+00> : vector<256x32xf32>
    %62 = tpu.matmul %59, %61, %cst_47 {dimension_numbers = #tpu.dot_dimension_numbers<[1], [0], [0], [1], [0, 0, 1, 1], [], []>} : vector<256x32xbf16>, vector<32x32xbf16>, vector<256x32xf32> -> vector<256x32xf32>
    %63 = arith.addf %56, %62 : vector<256x32xf32>
    %64 = vector.extract_strided_slice %57 {offsets = [1, 0, 0], sizes = [16, 16, 32], strides = [1, 1, 1]} : vector<18x16x32xbf16> to vector<16x16x32xbf16>
    %65 = vector.shape_cast %64 : vector<16x16x32xbf16> to vector<256x32xbf16>
    %c4 = arith.constant 4 : index
    %c0_48 = arith.constant 0 : index
    %c0_49 = arith.constant 0 : index
    %66 = vector.load %arg7[%c4, %c0_48, %c0_49] : memref<9x32x32xbf16, #tpu.memory_space<vmem>>, vector<1x32x32xbf16>
    %67 = vector.shape_cast %66 : vector<1x32x32xbf16> to vector<32x32xbf16>
    %cst_50 = arith.constant dense<0.000000e+00> : vector<256x32xf32>
    %68 = tpu.matmul %65, %67, %cst_50 {dimension_numbers = #tpu.dot_dimension_numbers<[1], [0], [0], [1], [0, 0, 1, 1], [], []>} : vector<256x32xbf16>, vector<32x32xbf16>, vector<256x32xf32> -> vector<256x32xf32>
    %69 = arith.addf %63, %68 : vector<256x32xf32>
    %70 = vector.extract_strided_slice %57 {offsets = [2, 0, 0], sizes = [16, 16, 32], strides = [1, 1, 1]} : vector<18x16x32xbf16> to vector<16x16x32xbf16>
    %71 = vector.shape_cast %70 : vector<16x16x32xbf16> to vector<256x32xbf16>
    %c7 = arith.constant 7 : index
    %c0_51 = arith.constant 0 : index
    %c0_52 = arith.constant 0 : index
    %72 = vector.load %arg7[%c7, %c0_51, %c0_52] : memref<9x32x32xbf16, #tpu.memory_space<vmem>>, vector<1x32x32xbf16>
    %73 = vector.shape_cast %72 : vector<1x32x32xbf16> to vector<32x32xbf16>
    %cst_53 = arith.constant dense<0.000000e+00> : vector<256x32xf32>
    %74 = tpu.matmul %71, %73, %cst_53 {dimension_numbers = #tpu.dot_dimension_numbers<[1], [0], [0], [1], [0, 0, 1, 1], [], []>} : vector<256x32xbf16>, vector<32x32xbf16>, vector<256x32xf32> -> vector<256x32xf32>
    %75 = arith.addf %69, %74 : vector<256x32xf32>
    %c0_54 = arith.constant 0 : index
    %c17_55 = arith.constant 17 : index
    %c0_56 = arith.constant 0 : index
    %76 = vector.load %arg12[%c0_54, %c17_55, %c0_56] : memref<18x48x32xbf16, #tpu.memory_space<vmem>>, vector<18x16x32xbf16>
    %77 = vector.extract_strided_slice %76 {offsets = [0, 0, 0], sizes = [16, 16, 32], strides = [1, 1, 1]} : vector<18x16x32xbf16> to vector<16x16x32xbf16>
    %78 = vector.shape_cast %77 : vector<16x16x32xbf16> to vector<256x32xbf16>
    %c2 = arith.constant 2 : index
    %c0_57 = arith.constant 0 : index
    %c0_58 = arith.constant 0 : index
    %79 = vector.load %arg7[%c2, %c0_57, %c0_58] : memref<9x32x32xbf16, #tpu.memory_space<vmem>>, vector<1x32x32xbf16>
    %80 = vector.shape_cast %79 : vector<1x32x32xbf16> to vector<32x32xbf16>
    %cst_59 = arith.constant dense<0.000000e+00> : vector<256x32xf32>
    %81 = tpu.matmul %78, %80, %cst_59 {dimension_numbers = #tpu.dot_dimension_numbers<[1], [0], [0], [1], [0, 0, 1, 1], [], []>} : vector<256x32xbf16>, vector<32x32xbf16>, vector<256x32xf32> -> vector<256x32xf32>
    %82 = arith.addf %75, %81 : vector<256x32xf32>
    %83 = vector.extract_strided_slice %76 {offsets = [1, 0, 0], sizes = [16, 16, 32], strides = [1, 1, 1]} : vector<18x16x32xbf16> to vector<16x16x32xbf16>
    %84 = vector.shape_cast %83 : vector<16x16x32xbf16> to vector<256x32xbf16>
    %c5 = arith.constant 5 : index
    %c0_60 = arith.constant 0 : index
    %c0_61 = arith.constant 0 : index
    %85 = vector.load %arg7[%c5, %c0_60, %c0_61] : memref<9x32x32xbf16, #tpu.memory_space<vmem>>, vector<1x32x32xbf16>
    %86 = vector.shape_cast %85 : vector<1x32x32xbf16> to vector<32x32xbf16>
    %cst_62 = arith.constant dense<0.000000e+00> : vector<256x32xf32>
    %87 = tpu.matmul %84, %86, %cst_62 {dimension_numbers = #tpu.dot_dimension_numbers<[1], [0], [0], [1], [0, 0, 1, 1], [], []>} : vector<256x32xbf16>, vector<32x32xbf16>, vector<256x32xf32> -> vector<256x32xf32>
    %88 = arith.addf %82, %87 : vector<256x32xf32>
    %89 = vector.extract_strided_slice %76 {offsets = [2, 0, 0], sizes = [16, 16, 32], strides = [1, 1, 1]} : vector<18x16x32xbf16> to vector<16x16x32xbf16>
    %90 = vector.shape_cast %89 : vector<16x16x32xbf16> to vector<256x32xbf16>
    %c8 = arith.constant 8 : index
    %c0_63 = arith.constant 0 : index
    %c0_64 = arith.constant 0 : index
    %91 = vector.load %arg7[%c8, %c0_63, %c0_64] : memref<9x32x32xbf16, #tpu.memory_space<vmem>>, vector<1x32x32xbf16>
    %92 = vector.shape_cast %91 : vector<1x32x32xbf16> to vector<32x32xbf16>
    %cst_65 = arith.constant dense<0.000000e+00> : vector<256x32xf32>
    %93 = tpu.matmul %90, %92, %cst_65 {dimension_numbers = #tpu.dot_dimension_numbers<[1], [0], [0], [1], [0, 0, 1, 1], [], []>} : vector<256x32xbf16>, vector<32x32xbf16>, vector<256x32xf32> -> vector<256x32xf32>
    %94 = arith.addf %88, %93 : vector<256x32xf32>
    %c0_66 = arith.constant 0 : index
    %c0_67 = arith.constant 0 : index
    %95 = vector.load %arg8[%c0_66, %c0_67] : memref<1x32xf32, #tpu.memory_space<vmem>>, vector<1x32xf32>
    %96 = vector.broadcast %95 : vector<1x32xf32> to vector<256x32xf32>
    %97 = arith.addf %94, %96 : vector<256x32xf32>
    %cst_68 = arith.constant 0.000000e+00 : f32
    %98 = vector.broadcast %cst_68 : f32 to vector<256x32xf32>
    %99 = arith.maximumf %97, %98 : vector<256x32xf32>
    %100 = arith.truncf %99 : vector<256x32xf32> to vector<256x32xbf16>
    %c0_69 = arith.constant 0 : index
    %c0_70 = arith.constant 0 : index
    %101 = vector.load %arg9[%c0_69, %c0_70] : memref<32x128xbf16, #tpu.memory_space<vmem>>, vector<32x128xbf16>
    %cst_71 = arith.constant dense<0.000000e+00> : vector<256x128xf32>
    %102 = tpu.matmul %100, %101, %cst_71 {dimension_numbers = #tpu.dot_dimension_numbers<[1], [0], [0], [1], [0, 0, 1, 1], [], []>} : vector<256x32xbf16>, vector<32x128xbf16>, vector<256x128xf32> -> vector<256x128xf32>
    %c0_72 = arith.constant 0 : index
    %c0_73 = arith.constant 0 : index
    %c0_74 = arith.constant 0 : index
    %c0_75 = arith.constant 0 : index
    %103 = vector.load %arg2[%c0_72, %c0_73, %c0_74, %c0_75] : memref<1x16x16x128xf32, #tpu.memory_space<vmem>>, vector<1x16x16x128xf32>
    %104 = vector.shape_cast %103 : vector<1x16x16x128xf32> to vector<16x16x128xf32>
    %105 = vector.shape_cast %104 : vector<16x16x128xf32> to vector<256x128xf32>
    %c0_76 = arith.constant 0 : index
    %c0_77 = arith.constant 0 : index
    %106 = vector.load %arg10[%c0_76, %c0_77] : memref<1x128xf32, #tpu.memory_space<vmem>>, vector<1x128xf32>
    %107 = vector.broadcast %106 : vector<1x128xf32> to vector<256x128xf32>
    %108 = arith.addf %102, %107 : vector<256x128xf32>
    %109 = arith.addf %108, %105 : vector<256x128xf32>
    %cst_78 = arith.constant 0.000000e+00 : f32
    %110 = vector.broadcast %cst_78 : f32 to vector<256x128xf32>
    %111 = arith.maximumf %109, %110 : vector<256x128xf32>
    %112 = vector.shape_cast %111 : vector<256x128xf32> to vector<1x16x16x128xf32>
    %c0_79 = arith.constant 0 : index
    %c0_80 = arith.constant 0 : index
    %c0_81 = arith.constant 0 : index
    %c0_82 = arith.constant 0 : index
    %113 = vector.load %arg11[%c0_79, %c0_80, %c0_81, %c0_82] : memref<1x16x16x128xf32, #tpu.memory_space<vmem>>, vector<1x16x16x128xf32>
    tpu.vector_store %arg11[%c0_79, %c0_80, %c0_81, %c0_82], %112 {strides = array<i32>} : memref<1x16x16x128xf32, #tpu.memory_space<vmem>>, vector<1x16x16x128xf32>,
    return
  }
  func.func @transform_0(%arg0: i32, %arg1: i32) -> (i32, i32, i32, i32) {
    %c0_i32 = arith.constant 0 : i32
    %c0_i32_0 = arith.constant 0 : i32
    %c0_i32_1 = arith.constant 0 : i32
    return %arg0, %arg1, %c0_i32, %c0_i32_0 : i32, i32, i32, i32
  }
  func.func @transform_1(%arg0: i32, %arg1: i32) -> (i32, i32, i32, i32) {
    %c16_i32 = arith.constant 16 : i32
    %0 = arith.muli %arg1, %c16_i32 : i32
    %c1_i32 = arith.constant 1 : i32
    %1 = arith.subi %0, %c1_i32 : i32
    %c0_i32 = arith.constant 0 : i32
    %2 = arith.maxsi %1, %c0_i32 : i32
    %c0_i32_0 = arith.constant 0 : i32
    %c0_i32_1 = arith.constant 0 : i32
    %c0_i32_2 = arith.constant 0 : i32
    return %arg0, %2, %c0_i32_0, %c0_i32_1 : i32, i32, i32, i32
  }
  func.func @transform_2(%arg0: i32, %arg1: i32) -> (i32, i32, i32, i32) {
    %c1_i32 = arith.constant 1 : i32
    %0 = arith.addi %arg1, %c1_i32 : i32
    %c16_i32 = arith.constant 16 : i32
    %1 = arith.muli %0, %c16_i32 : i32
    %c15_i32 = arith.constant 15 : i32
    %2 = arith.minsi %1, %c15_i32 : i32
    %c0_i32 = arith.constant 0 : i32
    %c0_i32_0 = arith.constant 0 : i32
    %c0_i32_1 = arith.constant 0 : i32
    return %arg0, %2, %c0_i32, %c0_i32_0 : i32, i32, i32, i32
  }
  func.func @transform_3(%arg0: i32, %arg1: i32) -> (i32, i32) {
    %c0_i32 = arith.constant 0 : i32
    %c0_i32_0 = arith.constant 0 : i32
    %c0_i32_1 = arith.constant 0 : i32
    return %c0_i32, %c0_i32_0 : i32, i32
  }
  func.func @transform_4(%arg0: i32, %arg1: i32) -> (i32, i32) {
    %c0_i32 = arith.constant 0 : i32
    %c0_i32_0 = arith.constant 0 : i32
    %c0_i32_1 = arith.constant 0 : i32
    return %c0_i32, %c0_i32_0 : i32, i32
  }
  func.func @transform_5(%arg0: i32, %arg1: i32) -> (i32, i32, i32) {
    %c0_i32 = arith.constant 0 : i32
    %c0_i32_0 = arith.constant 0 : i32
    %c0_i32_1 = arith.constant 0 : i32
    %c0_i32_2 = arith.constant 0 : i32
    return %c0_i32, %c0_i32_0, %c0_i32_1 : i32, i32, i32
  }
  func.func @transform_6(%arg0: i32, %arg1: i32) -> (i32, i32) {
    %c0_i32 = arith.constant 0 : i32
    %c0_i32_0 = arith.constant 0 : i32
    %c0_i32_1 = arith.constant 0 : i32
    return %c0_i32, %c0_i32_0 : i32, i32
  }
  func.func @transform_7(%arg0: i32, %arg1: i32) -> (i32, i32) {
    %c0_i32 = arith.constant 0 : i32
    %c0_i32_0 = arith.constant 0 : i32
    %c0_i32_1 = arith.constant 0 : i32
    return %c0_i32, %c0_i32_0 : i32, i32
  }
  func.func @transform_8(%arg0: i32, %arg1: i32) -> (i32, i32) {
    %c0_i32 = arith.constant 0 : i32
    %c0_i32_0 = arith.constant 0 : i32
    %c0_i32_1 = arith.constant 0 : i32
    return %c0_i32, %c0_i32_0 : i32, i32
  }
  func.func @transform_9(%arg0: i32, %arg1: i32) -> (i32, i32, i32, i32) {
    %c0_i32 = arith.constant 0 : i32
    %c0_i32_0 = arith.constant 0 : i32
    %c0_i32_1 = arith.constant 0 : i32
    return %arg0, %arg1, %c0_i32, %c0_i32_0 : i32, i32, i32, i32
  }
}

</mosaic_0001>

<bundles_post_ra>
// kernel: tpu_custom_call.1
= control target key start
LH: loop header
LB: loop body
LE: loop exit
PB: predicated region body
PF: predicated region fallthrough
CT: control target
= control target key end

     0   :  { %s8515_s0 = inlined_call_operand.hbm [shape: f32[2,16,16,128], index: 0, kind: input, shape index: {}]   ;;  %s8516_s1 = inlined_call_operand.hbm [shape: f32[2,16,16,128], index: 1, kind: input, shape index: {}]   ;;  %s8517_s2 = inlined_call_operand.hbm [shape: f32[2,16,16,128], index: 2, kind: input, shape index: {}]   ;;  %s8518_s3 = inlined_call_operand.vmem [shape: bf16[128,32], index: 3, kind: input, shape index: {}]   ;;  %s8519_s4 = inlined_call_operand.vmem [shape: f32[1,32], index: 4, kind: input, shape index: {}]   ;;  %s8520_s5 = inlined_call_operand.hbm [shape: bf16[9,32,32], index: 5, kind: input, shape index: {}]   ;;  %s8521_s6 = inlined_call_operand.vmem [shape: f32[1,32], index: 6, kind: input, shape index: {}]   ;;  %s8522_s7 = inlined_call_operand.vmem [shape: bf16[32,128], index: 7, kind: input, shape index: {}]   ;;  %s8523_s8 = inlined_call_operand.vmem [shape: f32[1,128], index: 8, kind: input, shape index: {}]   ;;  %s8524_s9 = inlined_call_operand.hbm [shape: f32[2,16,16,128], index: 9, kind: output, shape index: {}]  }
   0x1   :  { %8553 = sst [smem:[#allocation46_spill]] %s8516_s1 }
   0x2   :  { %8554 = sst [smem:[#allocation47_spill]] %s8524_s9 }
   0x3   :  { %14 = vsyncpa [#allocation4], 0 }
   0x4   :  { %16 = vsyncpa [#allocation4 + $0x1], 0 }
   0x5   :  { %17 = vsyncpa [#allocation7], 0 }
   0x6   :  { %19 = vsyncpa [#allocation7 + $0x1], 0 }
   0x7   :  { %20 = vsyncpa [#allocation10], 0 }
   0x8   :  { %21 = vsyncpa [#allocation5], 0 }
   0x9   :  { %23 = vsyncpa [#allocation5 + $0x1], 0  ;;  %s6286_s30 = smov 0   ;;  %s6288_s10 = smov 0  }
   0xa   :  { %s6290_s11 = smov 0   ;;  %s6292_s12 = smov 0  }
   0xb   :  { %s6294_s13 = smov 0   ;;  %s6296_s14 = smov 0  }
   0xc LB: > { %8555 = sst [smem:[#allocation16_spill]] %s6203_s30  ;;  %s41_s15 = sadd.s32 1, %s6219_s13  ;;  %s6223_s14 = sphi %s6296_s14, %s29_s14   ;;  %s6219_s13 = sphi %s6294_s13, %s8700_s13   ;;  %s6215_s12 = sphi %s6292_s12, %s8703_s12   ;;  %s6211_s11 = sphi %s6290_s11, %s8698_s11   ;;  %s6207_s10 = sphi %s6288_s10, %s8702_s10   ;;  %s6203_s30 = sphi %s6286_s30, %s8701_s30  }
   0xd   : > { %8556 = sst [smem:[#allocation17_spill]] %s6211_s11  ;;  %s50_s16 = sadd.s32 1, %s6211_s11 }
   0xe   : > { %8557 = sst [smem:[#allocation18_spill]] %s6219_s13  ;;  %p43_p0 = scmp.ge.s32.totalorder %s41_s15, 2 }
   0xf   : > { %8558 = sst [smem:[#allocation19_spill]] %s6223_s14  ;;  %p57_p1 = scmp.ne.s32.totalorder %s6211_s11, %s6207_s10 }
  0x10   : > { %p58_p2 = scmp.eq.s32.totalorder %s6223_s14, 0  ;;  %s8705_s15 = smov (%p43_p0, %s41_s15), 0 }
  0x11   : > { %8559 = sst [smem:[#allocation20_spill]] %s8705_s15  ;;  %p5928_p5 = scmp.lt.s32.totalorder %s6223_s14, 2 }
  0x12   : > { %p59_p4 = por %p58_p2, %p57_p1  ;;  %s45_s17 = ssub.s32 %s6219_s13, %s8705_s15 }
  0x13   : > { %s6331_s18 = sand.u32 1, %s6211_s11   ;;  %p48_p6 = scmp.eq.s32.totalorder %s45_s17, 0 }
  0x14   : > { %s6334_s19 = sshll.u32 %s6219_s13, 12  ;;  %p6336_p7 = pnand %p5928_p5, %p59_p4 }
  0x15   : > { %s6341_s21 = scalar_select %p48_p6, %s6211_s11, %s50_s16  }
  0x16   : > { %s365_s22 = sand.u32 1, %s6223_s14   ;;  %s4921_s23 = sshll.u32 %s6331_s18, 4 }
  0x17   : > { %8561 = sst [smem:[#allocation21_spill]] %s6341_s21  ;;  %s369_s27 = scalar_lea.vmem [#allocation6], %s4921_s23 }
  0x18   : > { %s8562_s1 = sld [smem:[#allocation46_spill]]  ;;  %s382_s28 = sshll.u32 %s369_s27, 4  ;;  %s383_s28 = int_to_ptr.vmem [resolvable:$true] %s382_s28 }
  0x19   : > { %s6349_s29 = scalar_lea.sflag [#allocation7], %s365_s22  ;;  %p8535_p8 = pneg %p6336_p7 }
  0x1a   : > { %s6038_s17 = scalar_lea.vmem %s383_s28, 256  ;;  %s6225_s16 = smov [#allocation6]  }
  0x1b   : > { %p6039_p9 = scmp.ne.s32.totalorder %s383_s28, %s6038_s17  ;;  %s6043_s15 = sshll.u32 %s6225_s16, 4  ;;  %s6044_s15 = int_to_ptr.vmem [resolvable:$false] %s6043_s15 }
  0x1c   : > { %s6045_s13 = scalar_lea.vmem %s6044_s15, 512  ;;  %p6046_p12 = scmp.lt.s32.totalorder %s383_s28, %s6044_s15 }
  0x1d   : > { %p6041_p10 = pnand %p6039_p9, %p8535_p8  ;;  %p6047_p13 = scmp.lt.s32.totalorder %s6045_s13, %s6038_s17 }
  0x1e   : > { %s381_s26 = scalar_lea.hbm %s8562_s1, %s6334_s19 }
  0x1f   : > { %p6042_p11 = pneg %p6041_p10  ;;  %p6048_p0 = por %p6047_p13, %p6046_p12 }
  0x21   : > { %p6049_p2 = pnand %p6048_p0, %p6042_p11 }
  0x23   : > { %6052 = shalt.err (!%p6049_p2)
}
  0x24   : > { %s8527_s24 = smov 128   ;;  %s8529_s22 = smov 8  }
  0x25   : > { %5919 = dma.hbm_to_vmem [thread:$0]  (!%p6336_p7), %s381_s26, 256, %s383_s28, %s6349_s29, %s8527_s24, %s8527_s24, %s8529_s22  }
  0x26   : > { %s396_s13 = scalar_lea.vmem [#allocation8], %s4921_s23  ;;  %s6365_s25 = sadd.s32 4294967295, %s6223_s14  }
  0x27   : > { %s409_s15 = sshll.u32 %s396_s13, 4  ;;  %s4914_s27 = sadd.s32 4294967294, %s6223_s14   ;;  %s6362_s15 = int_to_ptr.vmem [resolvable:$true] %s409_s15 }
  0x28   : > { %p63_p4 = scmp.ne.s32.totalorder %s6207_s10, %s6203_s30  ;;  %p64_p5 = scmp.eq.s32.totalorder %s6365_s25, 0 }
  0x29   : > { %p287_p6 = scmp.eq.s32.totalorder %s6365_s25, 1  ;;  %p293_p9 = scmp.eq.s32.totalorder %s4914_s27, 1 }
  0x2a   : > { %p6374_p10 = por %p64_p5, %p63_p4  ;;  %p4915_p11 = scmp.ge.s32.totalorder %s6223_s14, 1 }
  0x2b   : > { %p6382_p12 = por %p287_p6, %p57_p1  ;;  %p6386_p13 = por %p293_p9, %p63_p4 }
  0x2c   : > { %p300_p0 = scmp.lt.s32.totalorder %s6223_s14, 3  ;;  %s6228_s16 = smov [#allocation9]  }
  0x2d   : > { %s8564_s26 = scalar_select %p6382_p12, 1, 0 }
  0x2e   : > { %s8565_s28 = scalar_select %p6386_p13, 1, 0 }
  0x2f   : > { %p6391_p2 = pnand %p4915_p11, %p300_p0  ;;  %s318_s13 = sshll.u32 %s6228_s16, 4  ;;  %s319_s13 = int_to_ptr.vmem [resolvable:$true] %s318_s13 }
  0x30   : > { %8566 = sst [smem:[#allocation22_spill]] %s8565_s28  ;;  %s4918_s27 = sshll.u32 %s6331_s18, 8 }
  0x31   : > { %p5909_p3 = pneg %p6391_p2  ;;  %s345_s11 = scalar_lea.vmem [#allocation3], %s4918_s27 }
  0x32   : > { %s355_s14 = sshll.u32 %s345_s11, 4  ;;  %s6064_s16 = scalar_lea.vmem %s319_s13, 2304  ;;  %s6409_s14 = int_to_ptr.vmem [resolvable:$true] %s355_s14 }
  0x33   : > { %p6404_p1 = pnand %p5909_p3, %p64_p5  ;;  %p6065_p6 = scmp.ne.s32.totalorder %s319_s13, %s6064_s16 }
  0x34   : > { %p6072_p0 = scmp.lt.s32.totalorder %s319_s13, %s319_s13  ;;  %p6073_p8 = scmp.lt.s32.totalorder %s6064_s16, %s6064_s16 }
  0x35   : > { %p6055_p4 = pneg %p6404_p1 }
  0x36   : > { %p6074_p13 = por %p6073_p8, %p6072_p0 }
  0x37   : > { %p6067_p9 = pnand %p6065_p6, %p6055_p4 }
  0x39   : > { %p6068_p11 = pneg %p6067_p9 }
  0x3b   : > { %p6075_p12 = pnand %p6074_p13, %p6068_p11 }
  0x3d   : > { %6078 = shalt.err (!%p6075_p12)
}
  0x3e   : > { %s6229_s24 = smov 64   ;;  %s6230_s11 = smov 4  }
  0x3f   : > { %5912 = dma.hbm_to_vmem [thread:$0]  (!%p6404_p1), %s8520_s5, 2304, %s319_s13, [#allocation10], %s6229_s24, %s6229_s24, %s6230_s11  }
  0x40   : > { %s342_s28 = scalar_lea.sflag [#allocation4], %s6331_s18  ;;  %s6092_s1 = scalar_lea.vmem %s6409_s14, 4096 }
  0x41   : > { %p6093_p3 = scmp.ne.s32.totalorder %s6409_s14, %s6092_s1  ;;  %p8569_p8 = pneg %p6336_p7 }
  0x42   : > { %s6231_s16 = smov [#allocation3]  }
  0x43   : > { %p6095_p13 = pnand %p6093_p3, %p8569_p8  ;;  %s6097_s30 = sshll.u32 %s6231_s16, 4  ;;  %s6098_s30 = int_to_ptr.vmem [resolvable:$false] %s6097_s30 }
  0x44   : > { %s6099_s9 = scalar_lea.vmem %s6098_s30, 8192  ;;  %p6100_p4 = scmp.lt.s32.totalorder %s6409_s14, %s6098_s30 }
  0x45   : > { %p6096_p12 = pneg %p6095_p13  ;;  %p6101_p6 = scmp.lt.s32.totalorder %s6099_s9, %s6092_s1 }
  0x47   : > { %p6102_p9 = por %p6101_p6, %p6100_p4 }
  0x49   : > { %p6103_p11 = pnand %p6102_p9, %p6096_p12 }
  0x4b   : > { %6106 = shalt.err (!%p6103_p11)
}
  0x4c   : > { %s8570_s21 = smov 8   ;;  %s8571_s13 = smov 128  }
  0x4d   : > { %s8572_s11 = scalar_lea.hbm %s8515_s0, %s6334_s19  ;;  %s8573_s1 = sadd.s32 3840, %s6334_s19 }
  0x4e   : > { %5916 = dma.hbm_to_vmem [thread:$0]  (!%p6336_p7), %s8572_s11, 4096, %s6409_s14, %s342_s28, %s8571_s13, %s8571_s13, %s8570_s21  }
  0x4f   : > { %s408_s22 = scalar_lea.hbm %s8517_s2, %s8573_s1  ;;  %s6120_s27 = scalar_lea.vmem %s6362_s15, 256 }
  0x50   : > { %p6121_p1 = scmp.ne.s32.totalorder %s6362_s15, %s6120_s27  ;;  %p8574_p0 = pmov %p8569_p8 }
  0x51   : > { %s6232_s16 = smov [#allocation8]  }
  0x52   : > { %p6123_p3 = pnand %p6121_p1, %p8574_p0  ;;  %s6125_s18 = sshll.u32 %s6232_s16, 4  ;;  %s6126_s18 = int_to_ptr.vmem [resolvable:$false] %s6125_s18 }
  0x53   : > { %s6127_s24 = scalar_lea.vmem %s6126_s18, 512  ;;  %p6128_p13 = scmp.lt.s32.totalorder %s6362_s15, %s6126_s18 }
  0x54   : > { %p6124_p8 = pneg %p6123_p3  ;;  %p6129_p12 = scmp.lt.s32.totalorder %s6127_s24, %s6120_s27 }
  0x56   : > { %p6130_p4 = por %p6129_p12, %p6128_p13 }
  0x58   : > { %p6131_p6 = pnand %p6130_p4, %p6124_p8 }
  0x5a   : > { %6134 = shalt.err (!%p6131_p6)
}
  0x5b   : > { %5922 = dma.hbm_to_vmem [thread:$0]  (!%p6336_p7), %s408_s22, 256, %s6362_s15, %s6349_s29, %s8571_s13, %s8571_s13, %s8570_s21  }
  0x5c   : > { %421 = sbr.rel (%p6391_p2) target bundleno = 1114 (0x45a), region = 56 }
  0x61   : > { %s6457_s14 = sand.u32 1, %s6207_s10  }
  0x62   : > { %s4928_s19 = sshll.u32 %s6457_s14, 8  ;;  %s424_s28 = scalar_lea.sflag [#allocation4], %s6457_s14 }
  0x63   : > { %s6463_s20 = scalar_lea.vmem [#allocation3], %s4928_s19 }
  0x64   : > { %6186 = dma.done.wait (%p6374_p10), %s424_s28, 4096  }
  0x65   : > { %6188 = vsyncadd (%p6374_p10), %s424_s28, 4294963200  ;;  %s432_s29 = sand.u32 1, %s6365_s25   ;;  %s4929_s15 = sshll.u32 %s6457_s14, 4 }
  0x66   : > { %s433_s17 = scalar_lea.sflag [#allocation7], %s432_s29  ;;  %s436_s21 = scalar_lea.vmem [#allocation6], %s4929_s15 }
  0x67   : > { %6190 = dma.done.wait (%p6374_p10), %s433_s17, 512  }
  0x68   : > { %6192 = vsyncadd (%p6374_p10), %s433_s17, 4294966784  ;;  %s6475_s13 = scalar_lea.vmem [#allocation8], %s4929_s15 }
  0x69   : > { %6194 = dma.done.wait (%p64_p5), [#allocation10], 2304  }
  0x6a   : > { %6196 = vsyncadd (%p64_p5), [#allocation10], 4294964992  ;;  %v5986_v0 = vld [vmem:[%s8518_s3 + $0x38] sm:$0xff]   ;;  %v5987_v1 = vld [vmem:[%s8518_s3 + $0x30] sm:$0xff]   ;;  %vm861_vm0 = vcmask 257027   ;;  %vm918_vm4 = vcmask 253952  }
  0x6b   : > { %5481 = vmatprep.subr.bf16.mxu0 %v5986_v0  ;;  %v5988_v2 = vld [vmem:[%s8518_s3 + $0x28] sm:$0xff]   ;;  %v5989_v3 = vld [vmem:[%s8518_s3 + $0x20] sm:$0xff]   ;;  %v5990_v7 = vld [vmem:[%s8518_s3 + $0x18] sm:$0xff]   ;;  %vm862_vm1 = vsmask.f32 7950  ;;  %vm1013_vm6 = vcmask 257024  }
  0x6c   : > { %5482 = vmatpush3.bf16.msra.mxu0 %v5986_v0  ;;  %v505_v4 = vld [vmem:[%s436_s21] sm:$0xff]  ;;  %v506_v5 = vld [vmem:[%s436_s21 + $0x8] sm:$0xff]  ;;  %vm6539_vm2 = vmand %vm861_vm0, %vm862_vm1  ;;  %vm919_vm3 = vsmask.f32 256  ;;  %vm1230_vm7 = vsmask.f32 4368 }
  0x6d   : > { %5483 = vmatprep.subr.bf16.mxu0 %v5987_v1  ;;  %v541_v6 = vpack.c.bf16 %v506_v5, %v505_v4  ;;  %v5991_v8 = vld [vmem:[%s8518_s3 + $0x10] sm:$0xff]   ;;  %v5992_v9 = vld [vmem:[%s8518_s3 + $0x8] sm:$0xff]   ;;  %v5993_v10 = vld [vmem:[%s8518_s3] sm:$0xff]   ;;  %vm1675_vm8 = vcmask 261120   ;;  %vm3130_vm10 = vsmask.f32 3328 }
  0x6e   : > { %v507_v11 = vld [vmem:[%s6463_s20] sm:$0xff]  ;;  %v508_v12 = vld [vmem:[%s6463_s20 + $0x8] sm:$0xff]  ;;  %v509_v13 = vld [vmem:[%s6463_s20 + $0x10] sm:$0xff]  ;;  %vm3131_vm11 = vsmask.f32 7440  ;;  %s8369_s18 = scalar_lea.vmem [#allocation11], %s4928_s19 }
  0x6f   : > { %5497 = vmatprep.mubr.bf16.mxu0 %v541_v6  ;;  %v510_v14 = vld [vmem:[%s6463_s20 + $0x18] sm:$0xff]  ;;  %v542_v15 = vpack.c.bf16 %v508_v12, %v507_v11  ;;  %v511_v17 = vld [vmem:[%s6463_s20 + $0x20] sm:$0xff]  ;;  %v512_v18 = vld [vmem:[%s6463_s20 + $0x28] sm:$0xff]  ;;  %s5273_s19 = sshll.u32 %s6215_s12, 12  ;;  %s4767_s24 = sshll.u32 %s8369_s18, 4  ;;  %s8465_s24 = int_to_ptr.vmem [resolvable:$true] %s4767_s24 }
  0x70   : > { %5484 = vmatpush3.bf16.msra.mxu0 %v5987_v1  ;;  %v543_v16 = vpack.c.bf16 %v510_v14, %v509_v13  ;;  %v513_v19 = vld [vmem:[%s6463_s20 + $0x30] sm:$0xff]  ;;  %v514_v20 = vld [vmem:[%s6463_s20 + $0x38] sm:$0xff]  ;;  %v544_v21 = vpack.c.bf16 %v512_v18, %v511_v17  ;;  %v515_v23 = vld [vmem:[%s6463_s20 + $0x40] sm:$0xff]  ;;  %s8690_s15 = sld [smem:[#allocation47_spill]]  ;;  %s6135_s21 = scalar_lea.vmem %s8465_s24, 4096 }
  0x71   : > { %5485 = vmatprep.subr.bf16.mxu0 %v5988_v2  ;;  %v545_v22 = vpack.c.bf16 %v514_v20, %v513_v19  ;;  %v516_v24 = vld [vmem:[%s6463_s20 + $0x48] sm:$0xff]  ;;  %v517_v25 = vld [vmem:[%s6463_s20 + $0x50] sm:$0xff]  ;;  %v518_v26 = vld [vmem:[%s6463_s20 + $0x58] sm:$0xff]  ;;  %p6136_p7 = scmp.ne.s32.totalorder %s8465_s24, %s6135_s21  ;;  %p8691_p5 = scmp.ne.s32.totalorder %s8564_s26, 0 }
  0x72   : > { %v546_v27 = vpack.c.bf16 %v516_v24, %v515_v23  ;;  %v547_v28 = vpack.c.bf16 %v518_v26, %v517_v25  ;;  %v519_v29 = vld [vmem:[%s6463_s20 + $0x60] sm:$0xff]  ;;  %v520_v30 = vld [vmem:[%s6463_s20 + $0x68] sm:$0xff]  ;;  %v521_v31 = vld [vmem:[%s6463_s20 + $0x70] sm:$0xff]  ;;  %s6233_s12 = smov [#allocation11]  }
  0x73   : > { %v522_v32 = vld [vmem:[%s6463_s20 + $0x78] sm:$0xff]  ;;  %v548_v33 = vpack.c.bf16 %v520_v30, %v519_v29  ;;  %v523_v35 = vld [vmem:[%s6463_s20 + $0x80] sm:$0xff]  ;;  %v524_v36 = vld [vmem:[%s6463_s20 + $0x88] sm:$0xff]  ;;  %p6137_p10 = pnand %p6136_p7, %p8691_p5 }
  0x74   : > { %5486 = vmatpush3.bf16.msra.mxu0 %v5988_v2  ;;  %v549_v34 = vpack.c.bf16 %v522_v32, %v521_v31  ;;  %v525_v37 = vld [vmem:[%s6463_s20 + $0x90] sm:$0xff]  ;;  %v526_v38 = vld [vmem:[%s6463_s20 + $0x98] sm:$0xff]  ;;  %v550_v39 = vpack.c.bf16 %v524_v36, %v523_v35  ;;  %v527_v41 = vld [vmem:[%s6463_s20 + $0xa0] sm:$0xff]  ;;  %v8577_v36 = vmov 0 }
  0x75   : > { %5487 = vmatprep.subr.bf16.mxu0 %v5989_v3  ;;  %v551_v40 = vpack.c.bf16 %v526_v38, %v525_v37  ;;  %v528_v42 = vld [vmem:[%s6463_s20 + $0xa8] sm:$0xff]  ;;  %v529_v43 = vld [vmem:[%s6463_s20 + $0xb0] sm:$0xff]  ;;  %v530_v44 = vld [vmem:[%s6463_s20 + $0xb8] sm:$0xff]  ;;  %p6138_p2 = pneg %p6137_p10 }
  0x76   : > { %v552_v45 = vpack.c.bf16 %v528_v42, %v527_v41  ;;  %v553_v46 = vpack.c.bf16 %v530_v44, %v529_v43  ;;  %v531_v47 = vld [vmem:[%s6463_s20 + $0xc0] sm:$0xff]  ;;  %v532_v48 = vld [vmem:[%s6463_s20 + $0xc8] sm:$0xff]  ;;  %v533_v49 = vld [vmem:[%s6463_s20 + $0xd0] sm:$0xff]  ;;  %s8463_s17 = scalar_lea.hbm %s8690_s15, %s5273_s19 }
  0x77   : > { %v534_v50 = vld [vmem:[%s6463_s20 + $0xd8] sm:$0xff]  ;;  %v554_v51 = vpack.c.bf16 %v532_v48, %v531_v47  ;;  %v535_v53 = vld [vmem:[%s6463_s20 + $0xe0] sm:$0xff]  ;;  %v536_v54 = vld [vmem:[%s6463_s20 + $0xe8] sm:$0xff] }
  0x78   : > { %5488 = vmatpush3.bf16.msra.mxu0 %v5989_v3  ;;  %v555_v52 = vpack.c.bf16 %v534_v50, %v533_v49  ;;  %v537_v55 = vld [vmem:[%s6463_s20 + $0xf0] sm:$0xff]  ;;  %v538_v56 = vld [vmem:[%s6463_s20 + $0xf8] sm:$0xff]  ;;  %v556_v57 = vpack.c.bf16 %v536_v54, %v535_v53  ;;  %v867_v63 = vld [vmem:[#allocation2 + $0x1c] sm:$0x8] }
  0x79   : > { %5489 = vmatprep.subr.bf16.mxu0 %v5990_v7  ;;  %v557_v58 = vpack.c.bf16 %v538_v56, %v537_v55  ;;  %v539_v59 = vld [vmem:[%s6475_s13] sm:$0xff]  ;;  %v540_v60 = vld [vmem:[%s6475_s13 + $0x8] sm:$0xff]  ;;  %v868_v0 = vsel %vm6539_vm2, 0, %v867_v63  ;;  %vm6582_vm5 = vmand %vm918_vm4, %vm919_vm3  ;;  %s6139_s13 = sshll.u32 %s6233_s12, 4  ;;  %s6140_s13 = int_to_ptr.vmem [resolvable:$false] %s6139_s13 }
  0x7a   : > { %v558_v61 = vpack.c.bf16 %v540_v60, %v539_v59  ;;  %869 = vst [vmem:[#allocation2 + $0x1c] sm:$0x8] %v868_v0  ;;  %v873_v1 = vld [vmem:[#allocation2 + $0x4c] sm:$0x8]  ;;  %v870_v3 = vld [vmem:[#allocation2 + $0x34] sm:$0x8]  ;;  %vm6671_vm9 = vmor %vm919_vm3, %vm1230_vm7  ;;  %p6142_p9 = scmp.lt.s32.totalorder %s8465_s24, %s6140_s13 }
  0x7b   : > { %v874_v2 = vsel %vm6539_vm2, 0, %v873_v1  ;;  %v871_v4 = vsel %vm6539_vm2, 0, %v870_v3  ;;  %v5994_v5 = vld [vmem:[#allocation9 + $0x38] sm:$0xff]   ;;  %v879_v6 = vld [vmem:[#allocation2 + $0x7c] sm:$0x8]  ;;  %v5995_v12 = vld [vmem:[#allocation9 + $0x30] sm:$0xff]  }
  0x7c   : > { %5490 = vmatpush3.bf16.msra.mxu0 %v5990_v7  ;;  %875 = vst [vmem:[#allocation2 + $0x4c] sm:$0x8] %v874_v2  ;;  %872 = vst [vmem:[#allocation2 + $0x34] sm:$0x8] %v871_v4  ;;  %5893 = vmatprep.subr.bf16.mxu1 %v5994_v5  ;;  %v880_v7 = vsel %vm6539_vm2, 0, %v879_v6  ;;  %v6561_v19 = vld [vmem:[#allocation9 + $0x68] sm:$0xff]  }
  0x7d   : > { %5491 = vmatprep.subr.bf16.mxu0 %v5991_v8  ;;  %5895 = vmatpush3.bf16.msra.mxu1 %v5994_v5  ;;  %881 = vst [vmem:[#allocation2 + $0x7c] sm:$0x8] %v880_v7  ;;  %v885_v13 = vld [vmem:[#allocation2 + $0xac] sm:$0x8]  ;;  %v891_v17 = vld [vmem:[#allocation2 + $0xdc] sm:$0x8]  ;;  %vm7224_vm12 = vmor %vm3130_vm10, %vm3131_vm11 }
  0x7e   : > { %5894 = vmatprep.subr.bf16.mxu1 %v5995_v12  ;;  %v886_v14 = vsel %vm6539_vm2, 0, %v885_v13  ;;  %v892_v18 = vsel %vm6539_vm2, 0, %v891_v17  ;;  %v888_v20 = vld [vmem:[#allocation2 + $0xc4] sm:$0x8]  ;;  %v6566_v23 = vld [vmem:[#allocation9 + $0x8] sm:$0xff]   ;;  %v8578_v36 = vsel %vm6582_vm5, 4294967295, %v8577_v36 }
  0x7f   : > { %887 = vst [vmem:[#allocation2 + $0xac] sm:$0x8] %v886_v14  ;;  %893 = vst [vmem:[#allocation2 + $0xdc] sm:$0x8] %v892_v18  ;;  %v894_v25 = vld [vmem:[#allocation2 + $0xf4] sm:$0x8] }
  0x80   : > { %5492 = vmatpush3.bf16.msra.mxu0 %v5991_v8  ;;  %v876_v8 = vld [vmem:[#allocation2 + $0x64] sm:$0x8]  ;;  %v895_v26 = vsel %vm6539_vm2, 0, %v894_v25  ;;  %v909_v31 = vld [vmem:[#allocation2 + $0x16c] sm:$0x8]  ;;  %8579 = vst [vmem:[#allocation23_spill] sm:$0xff] %v8578_v36 }
  0x81   : > { %5493 = vmatprep.subr.bf16.mxu0 %v5992_v9  ;;  %5896 = vmatpush3.bf16.msra.mxu1 %v5995_v12  ;;  %896 = vst [vmem:[#allocation2 + $0xf4] sm:$0x8] %v895_v26  ;;  %v900_v29 = vld [vmem:[#allocation2 + $0x124] sm:$0x8]  ;;  %v910_v32 = vsel %vm6539_vm2, 0, %v909_v31  ;;  %s6141_s11 = scalar_lea.vmem %s6140_s13, 8192 }
  0x82   : > { %5569 = vmatprep.subr.bf16.mxu1 %v6566_v23  ;;  %v901_v30 = vsel %vm6539_vm2, 0, %v900_v29  ;;  %911 = vst [vmem:[#allocation2 + $0x16c] sm:$0x8] %v910_v32  ;;  %v912_v35 = vld [vmem:[#allocation2 + $0x184] sm:$0x8]  ;;  %p6143_p11 = scmp.lt.s32.totalorder %s6141_s11, %s6135_s21 }
  0x83   : > { %902 = vst [vmem:[#allocation2 + $0x124] sm:$0x8] %v901_v30  ;;  %v913_v37 = vsel %vm6539_vm2, 0, %v912_v35  ;;  %v924_v38 = vld [vmem:[#allocation2 + $0x28] sm:$0x1] }
  0x84   : > { %5494 = vmatpush3.bf16.msra.mxu0 %v5992_v9  ;;  %v877_v9 = vsel %vm6539_vm2, 0, %v876_v8  ;;  %914 = vst [vmem:[#allocation2 + $0x184] sm:$0x8] %v913_v37  ;;  %v930_v42 = vld [vmem:[#allocation2 + $0x58] sm:$0x1]  ;;  %p6144_p1 = por %p6143_p11, %p6142_p9 }
  0x85   : > { %5495 = vmatprep.subr.bf16.mxu0 %v5993_v10  ;;  %878 = vst [vmem:[#allocation2 + $0x64] sm:$0x8] %v877_v9  ;;  %v931_v43 = vsel %vm6582_vm5, 0, %v930_v42  ;;  %v927_v44 = vld [vmem:[#allocation2 + $0x40] sm:$0x1] }
  0x86   : > { %932 = vst [vmem:[#allocation2 + $0x58] sm:$0x1] %v931_v43  ;;  %v915_v48 = vld [vmem:[#allocation2 + $0x19c] sm:$0x8]  ;;  %v933_v49 = vld [vmem:[#allocation2 + $0x70] sm:$0x1]  ;;  %p6145_p0 = pnand %p6144_p1, %p6138_p2 }
  0x87   : > { %v916_v50 = vsel %vm6539_vm2, 0, %v915_v48  ;;  %v939_v54 = vld [vmem:[#allocation2 + $0xa0] sm:$0x1]  ;;  %v1179_v56 = vld [vmem:[#allocation2 + $0x1c] sm:$0x8] }
  0x88   : > { %5496 = vmatpush3.bf16.msra.mxu0 %v5993_v10  ;;  %v864_v10 = vld [vmem:[#allocation2 + $0x4] sm:$0x8]  ;;  %917 = vst [vmem:[#allocation2 + $0x19c] sm:$0x8] %v916_v50  ;;  %v940_v55 = vsel %vm6582_vm5, 0, %v939_v54  ;;  %v1255_v62 = vshrl.u32 %v1179_v56, 16 }
  0x89   : > { %5533 = vmatprep.subr.bf16.mxu0 %v5994_v5  ;;  %v865_v11 = vsel %vm6539_vm2, 0, %v864_v10  ;;  %941 = vst [vmem:[#allocation2 + $0xa0] sm:$0x1] %v940_v55  ;;  %v1182_v59 = vld [vmem:[#allocation2 + $0x34] sm:$0x8] }
  0x8a   : > { %866 = vst [vmem:[#allocation2 + $0x4] sm:$0x8] %v865_v11  ;;  %v1191_v60 = vld [vmem:[#allocation2 + $0x7c] sm:$0x8]  ;;  %v948_v0 = vld [vmem:[#allocation2 + $0xe8] sm:$0x1] }
  0x8b   : > { %5498 = vmatmul.mubr.bf16.vlgmr.msra.gmra.mxu0 %v542_v15  ;;  %v882_v15 = vld [vmem:[#allocation2 + $0x94] sm:$0x8]  ;;  %v949_v2 = vsel %vm6582_vm5, 0, %v948_v0  ;;  %v1277_v4 = vshrl.u32 %v1182_v59, 16  ;;  %v945_v6 = vld [vmem:[#allocation2 + $0xd0] sm:$0x1] }
  0x8c   : > { %5501 = vmatprep.mubr.bf16.mxu0 %v543_v16  ;;  %5534 = vmatpush3.bf16.msra.mxu0 %v5994_v5  ;;  %v883_v16 = vsel %vm6539_vm2, 0, %v882_v15  ;;  %v1343_v5 = vshrl.u32 %v1191_v60, 16  ;;  %950 = vst [vmem:[#allocation2 + $0xe8] sm:$0x1] %v949_v2  ;;  %v1188_v8 = vld [vmem:[#allocation2 + $0x64] sm:$0x8] }
  0x8d   : > { %5535 = vmatprep.subr.bf16.mxu0 %v5995_v12  ;;  %884 = vst [vmem:[#allocation2 + $0x94] sm:$0x8] %v883_v16  ;;  %v1197_v9 = vld [vmem:[#allocation2 + $0xac] sm:$0x8]  ;;  %v946_v10 = vsel %vm6582_vm5, 0, %v945_v6  ;;  %v6617_v13 = vrot.slane %v1255_v62, 11 }
  0x8e   : > { %947 = vst [vmem:[#allocation2 + $0xd0] sm:$0x1] %v946_v10  ;;  %v6624_v25 = vrot.slane %v1343_v5, 11  ;;  %v1321_v26 = vshrl.u32 %v1188_v8, 16  ;;  %v1206_v31 = vld [vmem:[#allocation2 + $0xf4] sm:$0x8] }
  0x8f   : > { %v1221_v6 = vld [vmem:[#allocation2 + $0x16c] sm:$0x8] }
  0x90   : > { %5536 = vmatpush3.bf16.msra.mxu0 %v5995_v12 }
  0x91   : > { %5605 = vmatprep.subr.bf16.mxu0 %v6561_v19  ;;  %v6628_v32 = vld [vmem:[#allocation2 + $0x4] sm:$0x8] }
  0x93   : > { %5502 = vmatmul.mubr.bf16.gmra.mxu0 %v544_v21  ;;  %v889_v21 = vsel %vm6539_vm2, 0, %v888_v20  ;;  %v1203_v20 = vld [vmem:[#allocation2 + $0xdc] sm:$0x8] }
  0x94   : > { %5505 = vmatprep.mubr.bf16.mxu0 %v545_v22  ;;  %890 = vst [vmem:[#allocation2 + $0xc4] sm:$0x8] %v889_v21  ;;  %v897_v22 = vld [vmem:[#allocation2 + $0x10c] sm:$0x8]  ;;  %v1194_v15 = vld [vmem:[#allocation2 + $0x94] sm:$0x8] }
  0x95   : > { %v898_v24 = vsel %vm6539_vm2, 0, %v897_v22  ;;  %v1365_v30 = vshrl.u32 %v1194_v15, 16  ;;  %v1431_v37 = vshrl.u32 %v1203_v20, 16  ;;  %v960_v20 = vld [vmem:[#allocation2 + $0x148] sm:$0x1] }
  0x96   : > { %899 = vst [vmem:[#allocation2 + $0x10c] sm:$0x8] %v898_v24  ;;  %v6622_v24 = vrot.slane %v1277_v4, 11 }
  0x97   : > { %v6644_v56 = vrot.slane %v1365_v30, 11  ;;  %v6648_v59 = vrot.slane %v1431_v37, 11 }
  0x9b   : > { %5506 = vmatmul.mubr.bf16.gmra.mxu0 %v546_v27  ;;  %v903_v27 = vld [vmem:[#allocation2 + $0x13c] sm:$0x8]  ;;  %v1200_v18 = vld [vmem:[#allocation2 + $0xc4] sm:$0x8] }
  0x9c   : > { %5509 = vmatprep.mubr.bf16.mxu0 %v547_v28  ;;  %v904_v28 = vsel %vm6539_vm2, 0, %v903_v27  ;;  %v1387_v27 = vshrl.u32 %v1197_v9, 16  ;;  %v1409_v35 = vshrl.u32 %v1200_v18, 16  ;;  %v1224_v18 = vld [vmem:[#allocation2 + $0x184] sm:$0x8] }
  0x9d   : > { %905 = vst [vmem:[#allocation2 + $0x13c] sm:$0x8] %v904_v28  ;;  %v1209_v21 = vld [vmem:[#allocation2 + $0x10c] sm:$0x8] }
  0xa3   : > { %5510 = vmatmul.mubr.bf16.gmra.mxu0 %v548_v33  ;;  %v906_v33 = vld [vmem:[#allocation2 + $0x154] sm:$0x8] }
  0xa4   : > { %5513 = vmatprep.mubr.bf16.mxu0 %v549_v34  ;;  %v907_v34 = vsel %vm6539_vm2, 0, %v906_v33 }
  0xa5   : > { %908 = vst [vmem:[#allocation2 + $0x154] sm:$0x8] %v907_v34 }
  0xab   : > { %5514 = vmatmul.mubr.bf16.gmra.mxu0 %v550_v39  ;;  %v925_v39 = vsel %vm6582_vm5, 0, %v924_v38  ;;  %v1475_v38 = vshrl.u32 %v1209_v21, 16 }
  0xac   : > { %5517 = vmatprep.mubr.bf16.mxu0 %v551_v40  ;;  %926 = vst [vmem:[#allocation2 + $0x28] sm:$0x1] %v925_v39  ;;  %v921_v40 = vld [vmem:[#allocation2 + $0x10] sm:$0x1]  ;;  %v954_v39 = vld [vmem:[#allocation2 + $0x118] sm:$0x1] }
  0xad   : > { %v922_v41 = vsel %vm6582_vm5, 0, %v921_v40  ;;  %v955_v43 = vsel %vm6582_vm5, 0, %v954_v39  ;;  %v6650_v60 = vrot.slane %v1475_v38, 11  ;;  %v1589_v39 = vshrl.u32 %v1224_v18, 16 }
  0xae   : > { %923 = vst [vmem:[#allocation2 + $0x10] sm:$0x1] %v922_v41  ;;  %956 = vst [vmem:[#allocation2 + $0x118] sm:$0x1] %v955_v43 }
  0xb3   : > { %5518 = vmatmul.mubr.bf16.gmra.mxu0 %v552_v45  ;;  %v928_v45 = vsel %vm6582_vm5, 0, %v927_v44 }
  0xb4   : > { %5521 = vmatprep.mubr.bf16.mxu0 %v553_v46  ;;  %929 = vst [vmem:[#allocation2 + $0x40] sm:$0x1] %v928_v45  ;;  %v936_v46 = vld [vmem:[#allocation2 + $0x88] sm:$0x1]  ;;  %v6633_v45 = vrot.slane %v1321_v26, 11  ;;  %v1563_v26 = vshrl.u32 %v1221_v6, 16 }
  0xb5   : > { %v937_v47 = vsel %vm6582_vm5, 0, %v936_v46  ;;  %v6635_v46 = vrot.slane %v1387_v27, 11  ;;  %v961_v27 = vsel %vm6582_vm5, 0, %v960_v20 }
  0xb6   : > { %938 = vst [vmem:[#allocation2 + $0x88] sm:$0x1] %v937_v47  ;;  %v1453_v47 = vshrl.u32 %v1206_v31, 16  ;;  %962 = vst [vmem:[#allocation2 + $0x148] sm:$0x1] %v961_v27 }
  0xb8   : > { %v6653_v4 = vrot.slane %v1453_v47, 11 }
  0xbb   : > { %5522 = vmatmul.mubr.bf16.gmra.mxu0 %v554_v51  ;;  %v934_v51 = vsel %vm6582_vm5, 0, %v933_v49  ;;  %v951_v49 = vld [vmem:[#allocation2 + $0x100] sm:$0x1] }
  0xbc   : > { %5525 = vmatprep.mubr.bf16.mxu0 %v555_v52  ;;  %935 = vst [vmem:[#allocation2 + $0x70] sm:$0x1] %v934_v51  ;;  %v942_v52 = vld [vmem:[#allocation2 + $0xb8] sm:$0x1]  ;;  %v952_v54 = vsel %vm6582_vm5, 0, %v951_v49 }
  0xbd   : > { %v943_v53 = vsel %vm6582_vm5, 0, %v942_v52  ;;  %953 = vst [vmem:[#allocation2 + $0x100] sm:$0x1] %v952_v54 }
  0xbe   : > { %944 = vst [vmem:[#allocation2 + $0xb8] sm:$0x1] %v943_v53  ;;  %v6640_v53 = vld [vmem:[#allocation2 + $0x13c] sm:$0x8] }
  0xbf   : > { %v1519_v5 = vshrl.u32 %v6640_v53, 16 }
  0xc3   : > { %5526 = vmatmul.mubr.bf16.gmra.mxu0 %v556_v57  ;;  %v1185_v57 = vld [vmem:[#allocation2 + $0x4c] sm:$0x8] }
  0xc4   : > { %5529 = vmatprep.mubr.bf16.mxu0 %v557_v58  ;;  %v6609_v58 = vld [vmem:[%s8519_s4] ss:$0 sm:$0xff]  ;;  %v1299_v63 = vshrl.u32 %v1185_v57, 16  ;;  %v6646_v57 = vrot.slane %v1409_v35, 11 }
  0xc6   : > { %v6619_v14 = vrot.slane %v1299_v63, 11 }
  0xcb   : > { %5530 = vmatmul.mubr.bf16.gmra.mxu0 %v558_v61 }
 0x14b   : > { %v5499_v61 = vpop.f32.mrf.mxu0 }
 0x14c   : > { %v673_v1 = vadd.f32 %v5499_v61, %v6609_v58 }
 0x14d   : > { %v664_v3 = vpop.f32.mrf.mxu0 }
 0x14e   : > { %v809_v7 = vmax.f32 %v673_v1, 0.0  ;;  %v665_v11 = vadd.f32 %v6609_v58, %v664_v3  ;;  %v1212_v1 = vld [vmem:[#allocation2 + $0x124] sm:$0x8] }
 0x14f   : > { %v5500_v12 = vpop.f32.mrf.mxu0 }
 0x150   : > { %v5241_v16 = vpack.c.bf16 %v809_v7, %v809_v7  ;;  %v676_v17 = vadd.f32 %v5500_v12, %v6609_v58  ;;  %v807_v33 = vmax.f32 %v665_v11, 0.0  ;;  %v1218_v11 = vld [vmem:[#allocation2 + $0x154] sm:$0x8] }
 0x151   : > { %v667_v22 = vpop.f32.mrf.mxu0 }
 0x152   : > { %1129 = vst.msk [vmem:[#allocation2 + $0x20] sm:$0xf] %vm1013_vm6, %v5241_v16  ;;  %v810_v28 = vmax.f32 %v676_v17, 0.0  ;;  %v668_v29 = vadd.f32 %v6609_v58, %v667_v22  ;;  %v1497_v17 = vshrl.u32 %v1212_v1, 16 }
 0x153   : > { %v5503_v34 = vpop.f32.mrf.mxu0 }
 0x154   : > { %v5242_v40 = vpack.c.bf16 %v810_v28, %v810_v28  ;;  %v808_v41 = vmax.f32 %v668_v29, 0.0  ;;  %v689_v42 = vadd.f32 %v5503_v34, %v6609_v58  ;;  %v1541_v34 = vshrl.u32 %v1218_v11, 16 }
 0x155   : > { %v680_v44 = vpop.f32.mrf.mxu0 }
 0x156   : > { %1130 = vst.msk [vmem:[#allocation2 + $0x24] sm:$0xf] %vm1013_vm6, %v5242_v40  ;;  %v843_v50 = vpack.c.bf16 %v808_v41, %v807_v33  ;;  %v813_v51 = vmax.f32 %v689_v42, 0.0  ;;  %v681_v52 = vadd.f32 %v6609_v58, %v680_v44 }
 0x157   : > { %v5504_v55 = vpop.f32.mrf.mxu0 }
 0x158   : > { %v1005_v61 = vmul.bf16 0.0, %v843_v50  ;;  %v5245_v62 = vpack.c.bf16 %v813_v51, %v813_v51  ;;  %v811_v63 = vmax.f32 %v681_v52, 0.0  ;;  %v692_v0 = vadd.f32 %v5504_v55, %v6609_v58 }
 0x159   : > { %v683_v2 = vpop.f32.mrf.mxu0  ;;  %v1180_v3 = vld [vmem:[#allocation2 + $0x20] sm:$0xf] }
 0x15a   : > { %v4942_v7 = vcombine.low %v1005_v61, %v1005_v61  ;;  %v4943_v8 = vcombine.high %v1005_v61, %v1005_v61  ;;  %1133 = vst.msk [vmem:[#allocation2 + $0x50] sm:$0xf] %vm1013_vm6, %v5245_v62  ;;  %v5243_v9 = vpack.c.bf16 %v811_v63, %v811_v63  ;;  %v814_v10 = vmax.f32 %v692_v0, 0.0 }
 0x15b   : > { %v684_v12 = vadd.f32 %v6609_v58, %v683_v2  ;;  %v5507_v15 = vpop.f32.mrf.mxu0  ;;  %v1260_v16 = vshrl.u32 %v1180_v3, 16  ;;  %v1263_v33 = vshll.u32 %v1180_v3, 16  ;;  %v6678_v61 = vrot.slane %v1497_v17, 11 }
 0x15c   : > { %1014 = vst.msk [vmem:[#allocation2 + $0x8] sm:$0xf] %vm1013_vm6, %v4942_v7  ;;  %1015 = vst.msk [vmem:[#allocation2 + $0xc] sm:$0xf] %vm1013_vm6, %v4943_v8  ;;  %v5246_v21 = vpack.c.bf16 %v814_v10, %v814_v10  ;;  %v705_v22 = vadd.f32 %v5507_v15, %v6609_v58  ;;  %v6680_v62 = vrot.slane %v1519_v5, 11  ;;  %v6682_v63 = vrot.slane %v1563_v26, 11 }
 0x15d   : > { %1131 = vst.msk [vmem:[#allocation2 + $0x38] sm:$0xf] %vm1013_vm6, %v5243_v9  ;;  %v812_v28 = vmax.f32 %v684_v12, 0.0  ;;  %v696_v29 = vpop.f32.mrf.mxu0  ;;  %v1181_v30 = vld [vmem:[#allocation2 + $0x24] sm:$0xf]  ;;  %v1262_v31 = vrot.slane %v1260_v16, 7 }
 0x15e   : > { %1134 = vst.msk [vmem:[#allocation2 + $0x54] sm:$0xf] %vm1013_vm6, %v5246_v21  ;;  %v817_v35 = vmax.f32 %v705_v22, 0.0  ;;  %v697_v37 = vadd.f32 %v6609_v58, %v696_v29  ;;  %v1269_v38 = vshrl.u32 %v1181_v30, 16  ;;  %v1272_v43 = vshll.u32 %v1181_v30, 16 }
 0x15f   : > { %v5244_v40 = vpack.c.bf16 %v812_v28, %v812_v28  ;;  %v5508_v41 = vpop.f32.mrf.mxu0  ;;  %v1265_v42 = vor.u32 %v1263_v33, %v1262_v31  ;;  %v6666_v44 = vcombine.low %v1180_v3, %v1181_v30  ;;  %v1267_v54 = vrot.slane %v1262_v31, 4 }
 0x160   : > { %v5249_v47 = vpack.c.bf16 %v817_v35, %v817_v35  ;;  %v815_v49 = vmax.f32 %v697_v37, 0.0  ;;  %v708_v50 = vadd.f32 %v5508_v41, %v6609_v58  ;;  %v1271_v52 = vrot.slane %v1269_v38, 7 }
 0x161   : > { %1132 = vst.msk [vmem:[#allocation2 + $0x3c] sm:$0xf] %vm1013_vm6, %v5244_v40  ;;  %v699_v53 = vpop.f32.mrf.mxu0  ;;  %v6676_v55 = vld [vmem:[#allocation2 + $0x50] sm:$0xf]  ;;  %v1266_v7 = vsel %vm6671_vm9, %v6617_v13, %v1265_v42  ;;  %v6692_v5 = vrot.slane %v1541_v34, 11  ;;  %v6694_v10 = vrot.slane %v1589_v39, 11 }
 0x162   : > { %8582 = vst [vmem:[#allocation24_spill] sm:$0xff] %v6676_v55  ;;  %1137 = vst.msk [vmem:[#allocation2 + $0x80] sm:$0xf] %vm1013_vm6, %v5249_v47  ;;  %v5247_v0 = vpack.c.bf16 %v815_v49, %v815_v49  ;;  %v818_v1 = vmax.f32 %v708_v50, 0.0  ;;  %v700_v2 = vadd.f32 %v6609_v58, %v699_v53  ;;  %v1274_v3 = vor.u32 %v1272_v43, %v1271_v52 }
 0x163   : > { %v5511_v6 = vpop.f32.mrf.mxu0  ;;  %v1304_v9 = vshrl.u32 %v6676_v55, 16  ;;  %v1307_v22 = vshll.u32 %v6676_v55, 16 }
 0x164   : > { %v6689_v8 = vld [vmem:[#allocation2 + $0x38] sm:$0xf]  ;;  %1135 = vst.msk [vmem:[#allocation2 + $0x68] sm:$0xf] %vm1013_vm6, %v5247_v0  ;;  %v5250_v11 = vpack.c.bf16 %v818_v1, %v818_v1  ;;  %v816_v12 = vmax.f32 %v700_v2, 0.0  ;;  %v721_v15 = vadd.f32 %v5511_v6, %v6609_v58  ;;  %v1275_v16 = vsel %vm6671_vm9, %v1267_v54, %v1274_v3 }
 0x165   : > { %v712_v17 = vpop.f32.mrf.mxu0  ;;  %v6700_v18 = vcombine.low %v1266_v7, %v1275_v16  ;;  %v1282_v13 = vshrl.u32 %v6689_v8, 16  ;;  %v6703_v20 = vld [vmem:[#allocation2 + $0x54] sm:$0xf]  ;;  %v1306_v21 = vrot.slane %v1304_v9, 7  ;;  %v1285_v33 = vshll.u32 %v6689_v8, 16 }
 0x166   : > { %8583 = vst [vmem:[#allocation25_spill] sm:$0xff] %v6703_v20  ;;  %1138 = vst.msk [vmem:[#allocation2 + $0x84] sm:$0xf] %vm1013_vm6, %v5250_v11  ;;  %v5248_v26 = vpack.c.bf16 %v816_v12, %v816_v12  ;;  %v821_v27 = vmax.f32 %v721_v15, 0.0  ;;  %v713_v28 = vadd.f32 %v6609_v58, %v712_v17  ;;  %v1313_v29 = vshrl.u32 %v6703_v20, 16 }
 0x167   : > { %v5512_v30 = vpop.f32.mrf.mxu0  ;;  %5537 = vmatprep.mubr.msk.bf16.mxu0 %vm1675_vm8, %v6700_v18  ;;  %v1284_v31 = vrot.slane %v1282_v13, 7  ;;  %v1309_v34 = vor.u32 %v1307_v22, %v1306_v21  ;;  %v1311_v35 = vrot.slane %v1306_v21, 4  ;;  %v1316_v50 = vshll.u32 %v6703_v20, 16 }
 0x168   : > { %1136 = vst.msk [vmem:[#allocation2 + $0x6c] sm:$0xf] %vm1013_vm6, %v5248_v26  ;;  %v5253_v37 = vpack.c.bf16 %v821_v27, %v821_v27  ;;  %v819_v38 = vmax.f32 %v713_v28, 0.0  ;;  %v724_v39 = vadd.f32 %v5512_v30, %v6609_v58  ;;  %v6714_v40 = vld [vmem:[#allocation2 + $0x3c] sm:$0xf]  ;;  %v1315_v41 = vrot.slane %v1313_v29, 7 }
 0x169   : > { %v715_v42 = vpop.f32.mrf.mxu0  ;;  %v1287_v43 = vor.u32 %v1285_v33, %v1284_v31  ;;  %v1289_v47 = vrot.slane %v1284_v31, 4  ;;  %v1291_v49 = vshrl.u32 %v6714_v40, 16  ;;  %v6718_v52 = vld [vmem:[#allocation2 + $0x80] sm:$0xf]  ;;  %v1294_v1 = vshll.u32 %v6714_v40, 16 }
 0x16a   : > { %1141 = vst.msk [vmem:[#allocation2 + $0xb0] sm:$0xf] %vm1013_vm6, %v5253_v37  ;;  %v5251_v53 = vpack.c.bf16 %v819_v38, %v819_v38  ;;  %v822_v54 = vmax.f32 %v724_v39, 0.0  ;;  %v716_v0 = vadd.f32 %v6609_v58, %v715_v42  ;;  %v1310_v6 = vsel %vm6671_vm9, %v6619_v14, %v1309_v34 }
 0x16b   : > { %v5515_v2 = vpop.f32.mrf.mxu0  ;;  %v1293_v3 = vrot.slane %v1291_v49, 7  ;;  %v1318_v7 = vor.u32 %v1316_v50, %v1315_v41  ;;  %v1348_v9 = vshrl.u32 %v6718_v52, 16  ;;  %v6727_v11 = vld [vmem:[#allocation2 + $0x68] sm:$0xf]  ;;  %v1351_v17 = vshll.u32 %v6718_v52, 16 }
 0x16c   : > { %1139 = vst.msk [vmem:[#allocation2 + $0x98] sm:$0xf] %vm1013_vm6, %v5251_v53  ;;  %v5254_v12 = vpack.c.bf16 %v822_v54, %v822_v54  ;;  %v820_v15 = vmax.f32 %v716_v0, 0.0  ;;  %v737_v16 = vadd.f32 %v5515_v2, %v6609_v58  ;;  %v1326_v27 = vshrl.u32 %v6727_v11, 16 }
 0x16d   : > { %v728_v13 = vpop.f32.mrf.mxu0  ;;  %v1296_v21 = vor.u32 %v1294_v1, %v1293_v3  ;;  %v1319_v22 = vsel %vm6671_vm9, %v1311_v35, %v1318_v7  ;;  %v6734_v26 = vld [vmem:[#allocation2 + $0x84] sm:$0xf]  ;;  %v1350_v14 = vrot.slane %v1348_v9, 7  ;;  %v1288_v31 = vsel %vm6671_vm9, %v6622_v24, %v1287_v43  ;;  %v5997_v24 = vld [vmem:[#allocation9 + $0x60] sm:$0xff]  }
 0x16e   : > { %1142 = vst.msk [vmem:[#allocation2 + $0xb4] sm:$0xf] %vm1013_vm6, %v5254_v12  ;;  %v5252_v28 = vpack.c.bf16 %v820_v15, %v820_v15  ;;  %v825_v29 = vmax.f32 %v737_v16, 0.0  ;;  %v729_v30 = vadd.f32 %v6609_v58, %v728_v13  ;;  %v6744_v35 = vcombine.low %v1310_v6, %v1319_v22  ;;  %v8592_v51 = vld [vmem:[#allocation25_spill] sm:$0xff] }
 0x16f   : > { %v5516_v33 = vpop.f32.mrf.mxu0  ;;  %v1297_v34 = vsel %vm6671_vm9, %v1289_v47, %v1296_v21  ;;  %v1353_v37 = vor.u32 %v1351_v17, %v1350_v14  ;;  %v1357_v38 = vshrl.u32 %v6734_v26, 16  ;;  %v6751_v50 = vld [vmem:[#allocation2 + $0x6c] sm:$0xf]  ;;  %v1355_v53 = vrot.slane %v1350_v14, 4 }
 0x170   : > { %1140 = vst.msk [vmem:[#allocation2 + $0x9c] sm:$0xf] %vm1013_vm6, %v5252_v28  ;;  %v5257_v39 = vpack.c.bf16 %v825_v29, %v825_v29  ;;  %v823_v41 = vmax.f32 %v729_v30, 0.0  ;;  %v740_v42 = vadd.f32 %v5516_v33, %v6609_v58  ;;  %v6749_v49 = vcombine.low %v1288_v31, %v1297_v34 }
 0x171   : > { %v731_v43 = vpop.f32.mrf.mxu0  ;;  %v1359_v54 = vrot.slane %v1357_v38, 7  ;;  %v1360_v47 = vshll.u32 %v6734_v26, 16  ;;  %v1328_v0 = vrot.slane %v1326_v27, 7  ;;  %v1354_v6 = vsel %vm6671_vm9, %v6624_v25, %v1353_v37  ;;  %v6771_v14 = vld [vmem:[#allocation2 + $0xb0] sm:$0xf]  ;;  %v6773_v27 = vld [vmem:[#allocation9 + $0x48] sm:$0xff]  }
 0x172   : > { %1145 = vst.msk [vmem:[#allocation2 + $0xe0] sm:$0xf] %vm1013_vm6, %v5257_v39  ;;  %v5255_v1 = vpack.c.bf16 %v823_v41, %v823_v41  ;;  %v826_v2 = vmax.f32 %v740_v42, 0.0  ;;  %v732_v3 = vadd.f32 %v6609_v58, %v731_v43  ;;  %5538 = vmatmul.mubr.msk.bf16.vlgmr.msra.gmra.mxu0 %vm1675_vm8, %v6749_v49  ;;  %v1329_v12 = vshll.u32 %v6727_v11, 16 }
 0x173   : > { %5541 = vmatprep.mubr.msk.bf16.mxu0 %vm1675_vm8, %v6744_v35  ;;  %v5519_v7 = vpop.f32.mrf.mxu0  ;;  %v1362_v9 = vor.u32 %v1360_v47, %v1359_v54  ;;  %v1333_v15 = vrot.slane %v1328_v0, 4  ;;  %v1335_v16 = vshrl.u32 %v6751_v50, 16  ;;  %5606 = vmatpush3.bf16.msra.mxu0 %v6561_v19  ;;  %v6766_v17 = vld [vmem:[#allocation2 + $0x98] sm:$0xf]  ;;  %v1338_v22 = vshll.u32 %v6751_v50, 16 }
 0x174   : > { %1143 = vst.msk [vmem:[#allocation2 + $0xc8] sm:$0xf] %vm1013_vm6, %v5255_v1  ;;  %v5258_v13 = vpack.c.bf16 %v826_v2, %v826_v2  ;;  %v824_v21 = vmax.f32 %v732_v3, 0.0  ;;  %v753_v25 = vadd.f32 %v5519_v7, %v6609_v58  ;;  %5607 = vmatprep.subr.bf16.mxu0 %v5997_v24  ;;  %v1331_v19 = vor.u32 %v1329_v12, %v1328_v0 }
 0x175   : > { %v744_v28 = vpop.f32.mrf.mxu0  ;;  %v1363_v29 = vsel %vm6671_vm9, %v1355_v53, %v1362_v9  ;;  %v1337_v30 = vrot.slane %v1335_v16, 7  ;;  %v1370_v31 = vshrl.u32 %v6766_v17, 16  ;;  %v1373_v53 = vshll.u32 %v6766_v17, 16  ;;  %v6797_v12 = vld [vmem:[#allocation2 + $0xb4] sm:$0xf] }
 0x176   : > { %1146 = vst.msk [vmem:[#allocation2 + $0xe4] sm:$0xf] %vm1013_vm6, %v5258_v13  ;;  %v5256_v33 = vpack.c.bf16 %v824_v21, %v824_v21  ;;  %v829_v34 = vmax.f32 %v753_v25, 0.0  ;;  %v745_v37 = vadd.f32 %v6609_v58, %v744_v28  ;;  %v6780_v38 = vcombine.low %v1354_v6, %v1363_v29 }
 0x177   : > { %v5520_v39 = vpop.f32.mrf.mxu0  ;;  %v1340_v41 = vor.u32 %v1338_v22, %v1337_v30  ;;  %5608 = vmatpush3.bf16.msra.mxu0 %v5997_v24  ;;  %v6782_v42 = vld [vmem:[#allocation2 + $0x9c] sm:$0xf]  ;;  %v1372_v43 = vrot.slane %v1370_v31, 7  ;;  %v1392_v54 = vshrl.u32 %v6771_v14, 16  ;;  %v1332_v3 = vsel %vm6671_vm9, %v6633_v45, %v1331_v19 }
 0x178   : > { %8584 = vst [vmem:[#allocation26_spill] sm:$0xff] %v6780_v38  ;;  %1144 = vst.msk [vmem:[#allocation2 + $0xcc] sm:$0xf] %vm1013_vm6, %v5256_v33  ;;  %v5261_v47 = vpack.c.bf16 %v829_v34, %v829_v34  ;;  %v827_v0 = vmax.f32 %v745_v37, 0.0  ;;  %v756_v1 = vadd.f32 %v5520_v39, %v6609_v58  ;;  %5545 = vmatprep.mubr.msk.bf16.mxu1 %vm1675_vm8, %v6780_v38  ;;  %v1379_v2 = vshrl.u32 %v6782_v42, 16 }
 0x179   : > { %5677 = vmatprep.subr.bf16.mxu0 %v6773_v27  ;;  %v747_v24 = vpop.f32.mrf.mxu0  ;;  %v1341_v6 = vsel %vm6671_vm9, %v1333_v15, %v1340_v41  ;;  %v1375_v7 = vor.u32 %v1373_v53, %v1372_v43  ;;  %v1377_v9 = vrot.slane %v1372_v43, 4  ;;  %v1382_v29 = vshll.u32 %v6782_v42, 16 }
 0x17a   : > { %1149 = vst.msk [vmem:[#allocation2 + $0x110] sm:$0xf] %vm1013_vm6, %v5261_v47  ;;  %v5259_v16 = vpack.c.bf16 %v827_v0, %v827_v0  ;;  %v830_v13 = vmax.f32 %v756_v1, 0.0  ;;  %v748_v21 = vadd.f32 %v6609_v58, %v747_v24  ;;  %v6801_v25 = vcombine.low %v1332_v3, %v1341_v6 }
 0x17b   : > { %v5523_v22 = vpop.f32.mrf.mxu0  ;;  %v1381_v28 = vrot.slane %v1379_v2, 7  ;;  %v1394_v45 = vrot.slane %v1392_v54, 7  ;;  %v1395_v19 = vshll.u32 %v6771_v14, 16  ;;  %v1401_v33 = vshrl.u32 %v6797_v12, 16  ;;  %v6810_v34 = vld [vmem:[#allocation2 + $0xc8] sm:$0xf] }
 0x17c   : > { %1147 = vst.msk [vmem:[#allocation2 + $0xf8] sm:$0xf] %vm1013_vm6, %v5259_v16  ;;  %v5262_v15 = vpack.c.bf16 %v830_v13, %v830_v13  ;;  %v828_v30 = vmax.f32 %v748_v21, 0.0  ;;  %5542 = vmatmul.mubr.msk.bf16.gmra.mxu0 %vm1675_vm8, %v6801_v25  ;;  %v769_v31 = vadd.f32 %v5523_v22, %v6609_v58  ;;  %v1376_v39 = vsel %vm6671_vm9, %v6644_v56, %v1375_v7  ;;  %v6828_v16 = vld [vmem:[#allocation2 + $0xe0] sm:$0xf] }
 0x17d   : > { %5609 = vmatprep.mubr.msk.bf16.mxu0 %vm1675_vm8, %v6749_v49  ;;  %v760_v37 = vpop.f32.mrf.mxu0  ;;  %v1384_v41 = vor.u32 %v1382_v29, %v1381_v28  ;;  %v1397_v43 = vor.u32 %v1395_v19, %v1394_v45  ;;  %v1399_v53 = vrot.slane %v1394_v45, 4  ;;  %v1403_v1 = vrot.slane %v1401_v33, 7 }
 0x17e   : > { %1150 = vst.msk [vmem:[#allocation2 + $0x114] sm:$0xf] %vm1013_vm6, %v5262_v15  ;;  %v5260_v54 = vpack.c.bf16 %v828_v30, %v828_v30  ;;  %v833_v47 = vmax.f32 %v769_v31, 0.0  ;;  %v761_v0 = vadd.f32 %v6609_v58, %v760_v37  ;;  %v1404_v56 = vshll.u32 %v6797_v12, 16 }
 0x17f   : > { %v5524_v2 = vpop.f32.mrf.mxu0  ;;  %v1385_v24 = vsel %vm6671_vm9, %v1377_v9, %v1384_v41  ;;  %v1398_v3 = vsel %vm6671_vm9, %v6635_v46, %v1397_v43  ;;  %v6825_v6 = vld [vmem:[#allocation2 + $0xcc] sm:$0xf]  ;;  %v1414_v7 = vshrl.u32 %v6810_v34, 16  ;;  %v5999_v9 = vld [vmem:[#allocation9] sm:$0xff]   ;;  %v1417_v19 = vshll.u32 %v6810_v34, 16 }
 0x180   : > { %1148 = vst.msk [vmem:[#allocation2 + $0xfc] sm:$0xf] %vm1013_vm6, %v5260_v54  ;;  %v5265_v13 = vpack.c.bf16 %v833_v47, %v833_v47  ;;  %v831_v21 = vmax.f32 %v761_v0, 0.0  ;;  %v772_v22 = vadd.f32 %v5524_v2, %v6609_v58  ;;  %v6832_v28 = vcombine.low %v1376_v39, %v1385_v24  ;;  %v6002_v39 = vld [vmem:[#allocation9 + $0x40] sm:$0xff]  }
 0x181   : > { %v763_v29 = vpop.f32.mrf.mxu0  ;;  %v1406_v45 = vor.u32 %v1404_v56, %v1403_v1  ;;  %v1416_v46 = vrot.slane %v1414_v7, 7  ;;  %v1423_v15 = vshrl.u32 %v6825_v6, 16  ;;  %v1436_v37 = vshrl.u32 %v6828_v16, 16  ;;  %v6845_v1 = vld [vmem:[#allocation2 + $0xe4] sm:$0xf] }
 0x182   : > { %8585 = vst [vmem:[#allocation27_spill] sm:$0xff] %v6832_v28  ;;  %1153 = vst.msk [vmem:[#allocation2 + $0x140] sm:$0xf] %vm1013_vm6, %v5265_v13  ;;  %v5263_v30 = vpack.c.bf16 %v831_v21, %v831_v21  ;;  %v834_v31 = vmax.f32 %v772_v22, 0.0  ;;  %v764_v33 = vadd.f32 %v6609_v58, %v763_v29  ;;  %5546 = vmatmul.mubr.msk.bf16.vlgmr.msra.gmra.mxu1 %vm1675_vm8, %v6832_v28  ;;  %v1426_v0 = vshll.u32 %v6825_v6, 16 }
 0x183   : > { %5570 = vmatpush3.bf16.msra.mxu1 %v6566_v23  ;;  %v1407_v41 = vsel %vm6671_vm9, %v1399_v53, %v1406_v45  ;;  %v5527_v43 = vpop.f32.mrf.mxu0  ;;  %v1419_v54 = vor.u32 %v1417_v19, %v1416_v46  ;;  %v1425_v47 = vrot.slane %v1423_v15, 7  ;;  %v6853_v53 = vld [vmem:[#allocation9 + $0x18] sm:$0xff]   ;;  %v1421_v13 = vrot.slane %v1416_v46, 4  ;;  %v6866_v46 = vld [vmem:[#allocation9 + $0x28] sm:$0xff]  }
 0x184   : > { %1151 = vst.msk [vmem:[#allocation2 + $0x128] sm:$0xf] %vm1013_vm6, %v5263_v30  ;;  %v5266_v2 = vpack.c.bf16 %v834_v31, %v834_v31  ;;  %v832_v24 = vmax.f32 %v764_v33, 0.0  ;;  %5610 = vmatmul.mubr.msk.bf16.vlgmr.msra.gmra.mxu0 %vm1675_vm8, %v6744_v35  ;;  %v6850_v56 = vcombine.low %v1398_v3, %v1407_v41  ;;  %v785_v23 = vadd.f32 %v5527_v43, %v6609_v58  ;;  %v6864_v30 = vld [vmem:[#allocation2 + $0xf8] sm:$0xf] }
 0x185   : > { %5571 = vmatprep.subr.bf16.mxu1 %v5999_v9  ;;  %5613 = vmatprep.mubr.msk.bf16.mxu0 %vm1675_vm8, %v6801_v25  ;;  %v776_v7 = vpop.f32.mrf.mxu0  ;;  %v1428_v21 = vor.u32 %v1426_v0, %v1425_v47  ;;  %v1438_v22 = vrot.slane %v1436_v37, 7  ;;  %v1439_v29 = vshll.u32 %v6828_v16, 16  ;;  %v1445_v15 = vshrl.u32 %v6845_v1, 16  ;;  %8587 = vst [vmem:[#allocation29_spill] sm:$0xff] %v6866_v46 }
 0x186   : > { %8586 = vst [vmem:[#allocation28_spill] sm:$0xff] %v6850_v56  ;;  %5678 = vmatpush3.bf16.msra.mxu0 %v6773_v27  ;;  %1154 = vst.msk [vmem:[#allocation2 + $0x144] sm:$0xf] %vm1013_vm6, %v5266_v2  ;;  %v5264_v3 = vpack.c.bf16 %v832_v24, %v832_v24  ;;  %5549 = vmatprep.mubr.msk.bf16.mxu1 %vm1675_vm8, %v6850_v56  ;;  %v837_v45 = vmax.f32 %v785_v23, 0.0  ;;  %v777_v19 = vadd.f32 %v6609_v58, %v776_v7  ;;  %v6879_v23 = vld [vmem:[#allocation2 + $0x110] sm:$0xf] }
 0x187   : > { %5679 = vmatprep.subr.bf16.mxu0 %v6002_v39  ;;  %v5528_v31 = vpop.f32.mrf.mxu0  ;;  %v1420_v27 = vsel %vm6671_vm9, %v6646_v57, %v1419_v54  ;;  %v1429_v33 = vsel %vm6671_vm9, %v1421_v13, %v1428_v21  ;;  %v1441_v37 = vor.u32 %v1439_v29, %v1438_v22  ;;  %v1443_v41 = vrot.slane %v1438_v22, 4  ;;  %v6873_v43 = vld [vmem:[#allocation2 + $0xfc] sm:$0xf]  ;;  %5572 = vmatpush3.bf16.msra.mxu1 %v5999_v9 }
 0x188   : > { %1152 = vst.msk [vmem:[#allocation2 + $0x12c] sm:$0xf] %vm1013_vm6, %v5264_v3  ;;  %v5269_v47 = vpack.c.bf16 %v837_v45, %v837_v45  ;;  %v835_v0 = vmax.f32 %v777_v19, 0.0  ;;  %v788_v2 = vadd.f32 %v5528_v31, %v6609_v58  ;;  %v6877_v24 = vcombine.low %v1420_v27, %v1429_v33  ;;  %5641 = vmatprep.subr.bf16.mxu1 %v6853_v53 }
 0x189   : > { %v779_v57 = vpop.f32.mrf.mxu0  ;;  %v1442_v54 = vsel %vm6671_vm9, %v6648_v59, %v1441_v37  ;;  %v1447_v7 = vrot.slane %v1445_v15, 7  ;;  %v1448_v9 = vshll.u32 %v6845_v1, 16  ;;  %v1458_v13 = vshrl.u32 %v6864_v30, 16 }
 0x18a   : > { %8588 = vst [vmem:[#allocation30_spill] sm:$0xff] %v6877_v24  ;;  %5680 = vmatpush3.bf16.msra.mxu0 %v6002_v39  ;;  %1157 = vst.msk [vmem:[#allocation2 + $0x170] sm:$0xf] %vm1013_vm6, %v5269_v47  ;;  %v5267_v21 = vpack.c.bf16 %v835_v0, %v835_v0  ;;  %v838_v22 = vmax.f32 %v788_v2, 0.0  ;;  %v780_v29 = vadd.f32 %v6609_v58, %v779_v57  ;;  %5550 = vmatmul.mubr.msk.bf16.gmra.mxu1 %vm1675_vm8, %v6877_v24 }
 0x18b   : > { %v1467_v3 = vshrl.u32 %v6873_v43, 16  ;;  %5749 = vmatprep.subr.bf16.mxu0 %v6866_v46  ;;  %v1450_v59 = vor.u32 %v1448_v9, %v1447_v7  ;;  %v5531_v45 = vpop.f32.mrf.mxu0  ;;  %v1460_v19 = vrot.slane %v1458_v13, 7  ;;  %v1461_v15 = vshll.u32 %v6864_v30, 16  ;;  %v6904_v7 = vld [vmem:[#allocation2 + $0x114] sm:$0xf] }
 0x18c   : > { %v1480_v39 = vshrl.u32 %v6879_v23, 16  ;;  %1155 = vst.msk [vmem:[#allocation2 + $0x158] sm:$0xf] %vm1013_vm6, %v5267_v21  ;;  %v5270_v31 = vpack.c.bf16 %v838_v22, %v838_v22  ;;  %v836_v27 = vmax.f32 %v780_v29, 0.0  ;;  %5614 = vmatmul.mubr.msk.bf16.gmra.mxu0 %vm1675_vm8, %v6780_v38  ;;  %v801_v33 = vadd.f32 %v5531_v45, %v6609_v58 }
 0x18d   : > { %v1469_v37 = vrot.slane %v1467_v3, 7  ;;  %v1451_v47 = vsel %vm6671_vm9, %v1443_v41, %v1450_v59  ;;  %5617 = vmatprep.mubr.msk.bf16.mxu0 %vm1675_vm8, %v6832_v28  ;;  %v792_v0 = vpop.f32.mrf.mxu0  ;;  %v1463_v2 = vor.u32 %v1461_v15, %v1460_v19  ;;  %v1470_v57 = vshll.u32 %v6873_v43, 16  ;;  %v6910_v3 = vld [vmem:[#allocation2 + $0x128] sm:$0xf] }
 0x18e   : > { %v1482_v9 = vrot.slane %v1480_v39, 7  ;;  %1158 = vst.msk [vmem:[#allocation2 + $0x174] sm:$0xf] %vm1013_vm6, %v5270_v31  ;;  %v5268_v13 = vpack.c.bf16 %v836_v27, %v836_v27  ;;  %v6907_v21 = vcombine.low %v1442_v54, %v1451_v47  ;;  %v793_v22 = vadd.f32 %v6609_v58, %v792_v0 }
 0x18f   : > { %v1465_v29 = vrot.slane %v1460_v19, 4  ;;  %v841_v41 = vmax.f32 %v801_v33, 0.0  ;;  %v5532_v59 = vpop.f32.mrf.mxu0  ;;  %v1464_v45 = vsel %vm6671_vm9, %v6653_v4, %v1463_v2  ;;  %v1472_v15 = vor.u32 %v1470_v57, %v1469_v37  ;;  %v6921_v27 = vld [vmem:[#allocation2 + $0x12c] sm:$0xf]  ;;  %v6927_v2 = vld [vmem:[#allocation2 + $0x140] sm:$0xf] }
 0x190   : > { %8589 = vst [vmem:[#allocation31_spill] sm:$0xff] %v6907_v21  ;;  %v1483_v48 = vshll.u32 %v6879_v23, 16  ;;  %1156 = vst.msk [vmem:[#allocation2 + $0x15c] sm:$0xf] %vm1013_vm6, %v5268_v13  ;;  %5553 = vmatprep.mubr.msk.bf16.mxu1 %vm1675_vm8, %v6907_v21  ;;  %v839_v54 = vmax.f32 %v793_v22, 0.0  ;;  %v804_v39 = vadd.f32 %v5532_v59, %v6609_v58  ;;  %v1487_v19 = vrot.slane %v1482_v9, 4 }
 0x191   : > { %v1489_v31 = vshrl.u32 %v6904_v7, 16  ;;  %v795_v33 = vpop.f32.mrf.mxu0  ;;  %v1473_v4 = vsel %vm6671_vm9, %v1465_v29, %v1472_v15  ;;  %v1492_v47 = vshll.u32 %v6904_v7, 16  ;;  %v1502_v0 = vshrl.u32 %v6910_v3, 16  ;;  %v6942_v29 = vld [vmem:[#allocation2 + $0x144] sm:$0xf] }
 0x192   : > { %v1485_v37 = vor.u32 %v1483_v48, %v1482_v9  ;;  %v5271_v57 = vpack.c.bf16 %v839_v54, %v839_v54  ;;  %v842_v13 = vmax.f32 %v804_v39, 0.0  ;;  %v796_v22 = vadd.f32 %v6609_v58, %v795_v33 }
 0x193   : > { %v6930_v59 = vcombine.low %v1464_v45, %v1473_v4  ;;  %v1491_v36 = vrot.slane %v1489_v31, 7  ;;  %v1504_v46 = vrot.slane %v1502_v0, 7  ;;  %v1505_v28 = vshll.u32 %v6910_v3, 16 }
 0x194   : > { %v1511_v38 = vshrl.u32 %v6921_v27, 16  ;;  %1159 = vst.msk [vmem:[#allocation2 + $0x188] sm:$0xf] %vm1013_vm6, %v5271_v57  ;;  %v860_v48 = vpack.c.bf16 %v842_v13, %v841_v41  ;;  %v840_v9 = vmax.f32 %v796_v22, 0.0  ;;  %5618 = vmatmul.mubr.msk.bf16.gmra.mxu0 %vm1675_vm8, %v6850_v56  ;;  %v1486_v58 = vsel %vm6671_vm9, %v6650_v60, %v1485_v37 }
 0x195   : > { %8590 = vst [vmem:[#allocation32_spill] sm:$0xff] %v6930_v59  ;;  %5554 = vmatmul.mubr.msk.bf16.gmra.mxu1 %vm1675_vm8, %v6930_v59  ;;  %v1524_v45 = vshrl.u32 %v6927_v2, 16  ;;  %v1494_v15 = vor.u32 %v1492_v47, %v1491_v36  ;;  %5621 = vmatprep.mubr.msk.bf16.mxu0 %vm1675_vm8, %v6877_v24  ;;  %v1507_v41 = vor.u32 %v1505_v28, %v1504_v46  ;;  %v1514_v39 = vshll.u32 %v6921_v27, 16  ;;  %v6952_v36 = vld [vmem:[#allocation2 + $0x158] sm:$0xf] }
 0x196   : > { %v1513_v54 = vrot.slane %v1511_v38, 7  ;;  %v1165_v31 = vmul.bf16 0.0, %v860_v48  ;;  %v5272_v33 = vpack.c.bf16 %v840_v9, %v840_v9  ;;  %v1527_v0 = vshll.u32 %v6927_v2, 16  ;;  %v6959_v9 = vld [vmem:[#allocation2 + $0x170] sm:$0xf] }
 0x197   : > { %v1526_v4 = vrot.slane %v1524_v45, 7  ;;  %v1495_v60 = vsel %vm6671_vm9, %v1487_v19, %v1494_v15  ;;  %v1509_v37 = vrot.slane %v1504_v46, 4  ;;  %v1533_v13 = vshrl.u32 %v6942_v29, 16  ;;  %v6957_v48 = vld [vmem:[#allocation2 + $0x15c] sm:$0xf] }
 0x198   : > { %v1516_v57 = vor.u32 %v1514_v39, %v1513_v54  ;;  %v4976_v47 = vcombine.low %v1165_v31, %v1165_v31  ;;  %v4977_v22 = vcombine.high %v1165_v31, %v1165_v31  ;;  %1160 = vst.msk [vmem:[#allocation2 + $0x18c] sm:$0xf] %vm1013_vm6, %v5272_v33  ;;  %v6955_v38 = vcombine.low %v1486_v58, %v1495_v60  ;;  %v6967_v54 = vld [vmem:[#allocation2 + $0x174] sm:$0xf] }
 0x199   : > { %v1529_v28 = vor.u32 %v1527_v0, %v1526_v4  ;;  %v1508_v46 = vsel %vm6671_vm9, %v6678_v61, %v1507_v41  ;;  %v1535_v45 = vrot.slane %v1533_v13, 7  ;;  %v1536_v15 = vshll.u32 %v6942_v29, 16 }
 0x19a   : > { %v1517_v19 = vsel %vm6671_vm9, %v1509_v37, %v1516_v57  ;;  %1174 = vst.msk [vmem:[#allocation2 + $0x1a0] sm:$0xf] %vm1013_vm6, %v4976_v47  ;;  %1175 = vst.msk [vmem:[#allocation2 + $0x1a4] sm:$0xf] %vm1013_vm6, %v4977_v22  ;;  %5557 = vmatprep.mubr.msk.bf16.mxu1 %vm1675_vm8, %v6955_v38  ;;  %v1531_v41 = vrot.slane %v1526_v4, 4  ;;  %v1546_v39 = vshrl.u32 %v6952_v36, 16 }
 0x19b   : > { %v6973_v58 = vcombine.low %v1508_v46, %v1517_v19  ;;  %v1530_v61 = vsel %vm6671_vm9, %v6680_v62, %v1529_v28  ;;  %v1538_v31 = vor.u32 %v1536_v15, %v1535_v45  ;;  %v1549_v33 = vshll.u32 %v6952_v36, 16  ;;  %v6982_v37 = vld [vmem:[#allocation2 + $0x188] sm:$0xf] }
 0x19c   : > { %v1555_v0 = vshrl.u32 %v6957_v48, 16  ;;  %v1568_v60 = vshrl.u32 %v6959_v9, 16  ;;  %5622 = vmatmul.mubr.msk.bf16.gmra.mxu0 %vm1675_vm8, %v6907_v21  ;;  %v1548_v57 = vrot.slane %v1546_v39, 7  ;;  %v1558_v62 = vshll.u32 %v6957_v48, 16 }
 0x19d   : > { %5558 = vmatmul.mubr.msk.bf16.gmra.mxu1 %vm1675_vm8, %v6973_v58  ;;  %v1571_v4 = vshll.u32 %v6959_v9, 16  ;;  %v1577_v13 = vshrl.u32 %v6967_v54, 16  ;;  %v1539_v47 = vsel %vm6671_vm9, %v1531_v41, %v1538_v31  ;;  %5625 = vmatprep.mubr.msk.bf16.mxu0 %vm1675_vm8, %v6930_v59  ;;  %v1594_v46 = vshrl.u32 %v6982_v37, 16  ;;  %v7003_v59 = vld [vmem:[#allocation2 + $0xc] sm:$0xf] }
 0x19e   : > { %v1557_v22 = vrot.slane %v1555_v0, 7  ;;  %v1570_v28 = vrot.slane %v1568_v60, 7  ;;  %v6996_v19 = vcombine.low %v1530_v61, %v1539_v47  ;;  %v1551_v45 = vor.u32 %v1549_v33, %v1548_v57  ;;  %v7001_v60 = vld [vmem:[#allocation2 + $0x8] sm:$0xf] }
 0x19f   : > { %v1579_v15 = vrot.slane %v1577_v13, 7  ;;  %v1580_v39 = vshll.u32 %v6967_v54, 16  ;;  %v1553_v21 = vrot.slane %v1548_v57, 4  ;;  %v1226_v55 = vld [vmem:[#allocation2 + $0x18c] sm:$0xf]  ;;  %v1596_v20 = vrot.slane %v1594_v46, 7 }
 0x1a0   : > { %v1560_v24 = vor.u32 %v1558_v62, %v1557_v22  ;;  %v1573_v56 = vor.u32 %v1571_v4, %v1570_v28  ;;  %5561 = vmatprep.mubr.msk.bf16.mxu1 %vm1675_vm8, %v6996_v19  ;;  %v1575_v41 = vrot.slane %v1570_v28, 4  ;;  %v1603_v0 = vshrl.u32 %v1226_v55, 16 }
 0x1a1   : > { %v1582_v31 = vor.u32 %v1580_v39, %v1579_v15  ;;  %v1552_v61 = vsel %vm6671_vm9, %v6692_v5, %v1551_v45  ;;  %v1597_v62 = vshll.u32 %v6982_v37, 16  ;;  %v1606_v22 = vshll.u32 %v1226_v55, 16 }
 0x1a2   : > { %v1561_v33 = vsel %vm6671_vm9, %v1553_v21, %v1560_v24  ;;  %v1574_v57 = vsel %vm6671_vm9, %v6682_v63, %v1573_v56  ;;  %v1605_v47 = vrot.slane %v1603_v0, 7  ;;  %v1238_v5 = vshrl.u32 %v7001_v60, 16 }
 0x1a3   : > { %v7014_v4 = vcombine.low %v1552_v61, %v1561_v33  ;;  %v1583_v13 = vsel %vm6671_vm9, %v1575_v41, %v1582_v31  ;;  %v1599_v46 = vor.u32 %v1597_v62, %v1596_v20  ;;  %v1247_v24 = vshrl.u32 %v7003_v59, 16  ;;  %v1229_v62 = vld [vmem:[#allocation2 + $0x1a4] sm:$0xf] }
 0x1a4   : > { %v7018_v28 = vcombine.low %v1574_v57, %v1583_v13  ;;  %5626 = vmatmul.mubr.msk.bf16.gmra.mxu0 %vm1675_vm8, %v6955_v38  ;;  %v1601_v63 = vrot.slane %v1596_v20, 4  ;;  %v1608_v56 = vor.u32 %v1606_v22, %v1605_v47  ;;  %v8591_v21 = vshrl.u32 %v6628_v32, 16  ;;  %v1228_v57 = vld [vmem:[#allocation2 + $0x1a0] sm:$0xf] }
 0x1a5   : > { %5562 = vmatmul.mubr.msk.bf16.gmra.mxu1 %vm1675_vm8, %v7014_v4  ;;  %5629 = vmatprep.mubr.msk.bf16.mxu0 %vm1675_vm8, %v6973_v58  ;;  %v1240_v15 = vrot.slane %v1238_v5, 7  ;;  %v1241_v39 = vshll.u32 %v7001_v60, 16  ;;  %v1249_v41 = vrot.slane %v1247_v24, 7  ;;  %v1250_v31 = vshll.u32 %v7003_v59, 16 }
 0x1a6   : > { %v4978_v45 = vrot.slane %v8591_v21, 11  ;;  %5565 = vmatprep.mubr.msk.bf16.mxu1 %vm1675_vm8, %v7018_v28  ;;  %v1609_v0 = vsel %vm6671_vm9, %v1601_v63, %v1608_v56  ;;  %v1600_v32 = vsel %vm6671_vm9, %v6694_v10, %v1599_v46  ;;  %v7045_v5 = vcombine.low %v6727_v11, %v6751_v50 }
 0x1a7   : > { %v1243_v20 = vor.u32 %v1241_v39, %v1240_v15  ;;  %v1245_v61 = vrot.slane %v1240_v15, 4  ;;  %v1252_v33 = vor.u32 %v1250_v31, %v1249_v41  ;;  %v5010_v13 = vcombine.low %v1600_v32, %v1609_v0  ;;  %v8598_v15 = vld [vmem:[#allocation30_spill] sm:$0xff]  ;;  %v8599_v39 = vld [vmem:[#allocation31_spill] sm:$0xff]  ;;  %v957_v41 = vld [vmem:[#allocation2 + $0x130] sm:$0x1] }
 0x1a8   : > { %v7049_v24 = vcombine.low %v6718_v52, %v6734_v26  ;;  %v2070_v46 = vshrl.u32 %v1228_v57, 16  ;;  %v2079_v63 = vshrl.u32 %v1229_v62, 16  ;;  %v7053_v56 = vcombine.low %v6766_v17, %v6782_v42  ;;  %v1227_v26 = vld [vmem:[#allocation2 + $0x19c] sm:$0x8]  ;;  %v8600_v31 = vld [vmem:[#allocation32_spill] sm:$0xff] }
 0x1a9   : > { %v1244_v47 = vsel %vm6671_vm9, %v4978_v45, %v1243_v20  ;;  %v1253_v22 = vsel %vm6671_vm9, %v1245_v61, %v1252_v33  ;;  %v7057_v21 = vcombine.low %v6771_v14, %v6797_v12  ;;  %v7061_v45 = vcombine.low %v6810_v34, %v6825_v6  ;;  %v963_v20 = vld [vmem:[#allocation2 + $0x160] sm:$0x1]  ;;  %v966_v33 = vld [vmem:[#allocation2 + $0x178] sm:$0x1] }
 0x1aa   : > { %v5029_v10 = vcombine.low %v1244_v47, %v1253_v22  ;;  %v7065_v11 = vcombine.low %v6828_v16, %v6845_v1  ;;  %v7069_v52 = vcombine.low %v6864_v30, %v6873_v43  ;;  %v7076_v50 = vcombine.low %v6879_v23, %v6904_v7  ;;  %v6003_v7 = vld [vmem:[#allocation9 + $0x10] sm:$0xff]  }
 0x1ab   : > { %v7080_v17 = vcombine.low %v6910_v3, %v6921_v27  ;;  %v5068_v14 = vcombine.low %v7001_v60, %v7003_v59  ;;  %v7089_v42 = vcombine.low %v6927_v2, %v6942_v29  ;;  %v7093_v12 = vcombine.low %v6952_v36, %v6957_v48 }
 0x1ac   : > { %5630 = vmatmul.mubr.msk.bf16.gmra.mxu0 %vm1675_vm8, %v6996_v19  ;;  %v7097_v34 = vcombine.low %v6959_v9, %v6967_v54  ;;  %v7100_v6 = vcombine.low %v6982_v37, %v1226_v55  ;;  %v2065_v16 = vshrl.u32 %v1227_v26, 16  ;;  %v2072_v1 = vrot.slane %v2070_v46, 7  ;;  %v7110_v55 = vld [vmem:[#allocation9 + $0x78] sm:$0xff]   ;;  %v6014_v54 = vld [vmem:[#allocation9 + $0x20] sm:$0xff]   ;;  %v8594_v37 = vld [vmem:[#allocation26_spill] sm:$0xff] }
 0x1ad   : > { %5566 = vmatmul.mubr.msk.bf16.gmra.mxu1 %vm1675_vm8, %v5010_v13  ;;  %5633 = vmatprep.mubr.msk.bf16.mxu0 %vm1675_vm8, %v7014_v4  ;;  %v2081_v30 = vrot.slane %v2079_v63, 7  ;;  %v2073_v43 = vshll.u32 %v1228_v57, 16  ;;  %v2082_v23 = vshll.u32 %v1229_v62, 16  ;;  %v958_v32 = vsel %vm6582_vm5, 0, %v957_v41  ;;  %v969_v62 = vld [vmem:[#allocation2 + $0x190] sm:$0x1] }
 0x1ae   : > { %5573 = vmatprep.mubr.msk.bf16.mxu1 %vm1675_vm8, %v5029_v10  ;;  %v5048_v3 = vrot.slane %v2065_v16, 11  ;;  %v2077_v2 = vrot.slane %v2072_v1, 4  ;;  %959 = vst [vmem:[#allocation2 + $0x130] sm:$0x1] %v958_v32  ;;  %v964_v61 = vsel %vm6582_vm5, 0, %v963_v20  ;;  %v967_v57 = vsel %vm6582_vm5, 0, %v966_v33 }
 0x1af   : > { %v2075_v27 = vor.u32 %v2073_v43, %v2072_v1  ;;  %v2084_v29 = vor.u32 %v2082_v23, %v2081_v30  ;;  %965 = vst [vmem:[#allocation2 + $0x160] sm:$0x1] %v964_v61  ;;  %968 = vst [vmem:[#allocation2 + $0x178] sm:$0x1] %v967_v57  ;;  %v3081_v10 = vld [vmem:[#allocation2 + $0x28] sm:$0x1] }
 0x1b0   : > { %v3087_v26 = vld [vmem:[#allocation2 + $0x58] sm:$0x1]  ;;  %v3177_v1 = vshll.u32 %v3081_v10, 16  ;;  %v972_v30 = vld [vmem:[#allocation2 + $0x1a8] sm:$0x1] }
 0x1b1   : > { %v2076_v36 = vsel %vm6671_vm9, %v5048_v3, %v2075_v27  ;;  %v2085_v48 = vsel %vm6671_vm9, %v2077_v2, %v2084_v29  ;;  %v3080_v23 = vld [vmem:[#allocation2 + $0x24] sm:$0xf]  ;;  %v3084_v2 = vld [vmem:[#allocation2 + $0x40] sm:$0x1]  ;;  %v3225_v29 = vshll.u32 %v3087_v26, 16 }
 0x1b2   : > { %v7200_v59 = vrot.slane %v3177_v1, 5  ;;  %v3201_v60 = vshll.u32 %v3084_v2, 16  ;;  %v3099_v61 = vld [vmem:[#allocation2 + $0xb8] sm:$0x1] }
 0x1b3   : > { %v3321_v1 = vshll.u32 %v3099_v61, 16  ;;  %v3092_v61 = vld [vmem:[#allocation2 + $0x84] sm:$0xf] }
 0x1b4   : > { %5634 = vmatmul.mubr.msk.bf16.gmra.mxu0 %vm1675_vm8, %v7018_v28 }
 0x1b5   : > { %5574 = vmatmul.mubr.msk.bf16.vlgmr.msra.gmra.mxu1 %vm1675_vm8, %v6700_v18  ;;  %5637 = vmatprep.mubr.msk.bf16.mxu0 %vm1675_vm8, %v5010_v13  ;;  %v5049_v18 = vcombine.low %v2076_v36, %v2085_v48  ;;  %v3078_v13 = vld [vmem:[#allocation2 + $0x10] sm:$0x1]  ;;  %v3079_v36 = vld [vmem:[#allocation2 + $0x20] sm:$0xf]  ;;  %v3093_v48 = vld [vmem:[#allocation2 + $0x88] sm:$0x1] }
 0x1b6   : > { %5642 = vmatpush3.bf16.msra.mxu1 %v6853_v53  ;;  %5577 = vmatprep.mubr.msk.bf16.mxu1 %vm1675_vm8, %v6749_v49  ;;  %v7126_v49 = vcombine.low %v6689_v8, %v6714_v40  ;;  %v8593_v53 = vld [vmem:[#allocation24_spill] sm:$0xff]  ;;  %v7141_v8 = vld [vmem:[#allocation9 + $0x88] sm:$0xff]   ;;  %v3153_v16 = vshll.u32 %v3078_v13, 16  ;;  %v3273_v41 = vshll.u32 %v3093_v48, 16  ;;  %v3161_v0 = vshll.u32 %v3079_v36, 16 }
 0x1b7   : > { %5643 = vmatprep.subr.bf16.mxu1 %v6003_v7  ;;  %v7130_v9 = vcombine.low %v8593_v53, %v8592_v51  ;;  %v8597_v40 = vld [vmem:[#allocation28_spill] sm:$0xff]  ;;  %v3171_v51 = vshrl.u32 %v3080_v23, 16  ;;  %v3082_v53 = vld [vmem:[#allocation2 + $0x38] sm:$0xf] }
 0x1b8   : > { %v3182_v32 = vshrl.u32 %v3082_v53, 16  ;;  %v3185_v20 = vshll.u32 %v3082_v53, 16 }
 0x1b9   : > { %v3173_v57 = vrot.slane %v3171_v51, 4 }
 0x1ba   : > { %5644 = vmatpush3.bf16.msra.mxu1 %v6003_v7  ;;  %v3083_v7 = vld [vmem:[#allocation2 + $0x3c] sm:$0xf] }
 0x1bb   : > { %5713 = vmatprep.subr.bf16.mxu1 %v7110_v55 }
 0x1bc   : > { %5638 = vmatmul.mubr.msk.bf16.gmra.mxu0 %vm1675_vm8, %v5049_v18  ;;  %v3167_v18 = vshll.u32 %v3080_v23, 16  ;;  %v3187_v23 = vrot.slane %v3185_v20, 5 }
 0x1bd   : > { %5578 = vmatmul.mubr.msk.bf16.gmra.mxu1 %vm1675_vm8, %v6744_v35  ;;  %5681 = vmatprep.mubr.msk.bf16.mxu0 %vm1675_vm8, %v6666_v44  ;;  %v8595_v35 = vld [vmem:[#allocation27_spill] sm:$0xff] }
 0x1be   : > { %5581 = vmatprep.mubr.msk.bf16.mxu1 %vm1675_vm8, %v6801_v25  ;;  %v8596_v25 = vld [vmem:[#allocation29_spill] sm:$0xff]  ;;  %v7205_v33 = vrot.slane %v3167_v18, 5 }
 0x1c4   : > { %5682 = vmatmul.mubr.msk.bf16.vlgmr.msra.gmra.mxu0 %vm1675_vm8, %v7126_v49 }
 0x1c5   : > { %5582 = vmatmul.mubr.msk.bf16.gmra.mxu1 %vm1675_vm8, %v8594_v37  ;;  %5685 = vmatprep.mubr.msk.bf16.mxu0 %vm1675_vm8, %v7130_v9  ;;  %v3195_v37 = vshrl.u32 %v3083_v7, 16 }
 0x1c6   : > { %5585 = vmatprep.mubr.msk.bf16.mxu1 %vm1675_vm8, %v8595_v35  ;;  %5750 = vmatpush3.bf16.msra.mxu0 %v8596_v25  ;;  %v7198_v25 = vrot.slane %v3153_v16, 5  ;;  %v7215_v16 = vrot.slane %v3273_v41, 5  ;;  %v3096_v41 = vld [vmem:[#allocation2 + $0xa0] sm:$0x1] }
 0x1c7   : > { %5751 = vmatprep.subr.bf16.mxu0 %v6014_v54 }
 0x1ca   : > { %5752 = vmatpush3.bf16.msra.mxu0 %v6014_v54  ;;  %v3191_v54 = vshll.u32 %v3083_v7, 16  ;;  %v3089_v7 = vld [vmem:[#allocation2 + $0x6c] sm:$0xf] }
 0x1cb   : > { %5821 = vmatprep.subr.bf16.mxu0 %v7141_v8 }
 0x1cc   : > { %5686 = vmatmul.mubr.msk.bf16.gmra.mxu0 %vm1675_vm8, %v7045_v5 }
 0x1cd   : > { %5586 = vmatmul.mubr.msk.bf16.gmra.mxu1 %vm1675_vm8, %v8597_v40  ;;  %5689 = vmatprep.mubr.msk.bf16.mxu0 %vm1675_vm8, %v7049_v24  ;;  %v3086_v40 = vld [vmem:[#allocation2 + $0x54] sm:$0xf] }
 0x1ce   : > { %5589 = vmatprep.mubr.msk.bf16.mxu1 %vm1675_vm8, %v8598_v15  ;;  %v7203_v15 = vrot.slane %v3225_v29, 5  ;;  %v3215_v10 = vshll.u32 %v3086_v40, 16 }
 0x1d4   : > { %5690 = vmatmul.mubr.msk.bf16.gmra.mxu0 %vm1675_vm8, %v7053_v56 }
 0x1d5   : > { %5590 = vmatmul.mubr.msk.bf16.gmra.mxu1 %vm1675_vm8, %v8599_v39  ;;  %5693 = vmatprep.mubr.msk.bf16.mxu0 %vm1675_vm8, %v7057_v21  ;;  %v3090_v39 = vld [vmem:[#allocation2 + $0x70] sm:$0x1] }
 0x1d6   : > { %5593 = vmatprep.mubr.msk.bf16.mxu1 %vm1675_vm8, %v8600_v31  ;;  %v3158_v31 = vshrl.u32 %v3079_v36, 16  ;;  %v3249_v26 = vshll.u32 %v3090_v39, 16  ;;  %v7230_v36 = vld [vmem:[#allocation9 + $0x58] sm:$0xff]  }
 0x1d8   : > { %v7240_v39 = vrot.slane %v3249_v26, 5  ;;  %v3263_v26 = vshll.u32 %v3092_v61, 16 }
 0x1dc   : > { %5694 = vmatmul.mubr.msk.bf16.gmra.mxu0 %vm1675_vm8, %v7061_v45 }
 0x1dd   : > { %5594 = vmatmul.mubr.msk.bf16.gmra.mxu1 %vm1675_vm8, %v6955_v38  ;;  %5697 = vmatprep.mubr.msk.bf16.mxu0 %vm1675_vm8, %v7065_v11  ;;  %v3076_v38 = vld [vmem:[#allocation2 + $0x8] sm:$0xf] }
 0x1de   : > { %5597 = vmatprep.mubr.msk.bf16.mxu1 %vm1675_vm8, %v6973_v58  ;;  %v3077_v58 = vld [vmem:[#allocation2 + $0xc] sm:$0xf]  ;;  %v3134_v47 = vshrl.u32 %v3076_v38, 16  ;;  %v3137_v22 = vshll.u32 %v3076_v38, 16  ;;  %v7207_v38 = vrot.slane %v3191_v54, 5 }
 0x1df   : > { %v3143_v46 = vshll.u32 %v3077_v58, 16  ;;  %v3147_v63 = vshrl.u32 %v3077_v58, 16  ;;  %v3197_v58 = vrot.slane %v3195_v37, 4  ;;  %v3239_v37 = vshll.u32 %v3089_v7, 16 }
 0x1e0   : > { %v3139_v43 = vrot.slane %v3137_v22, 5  ;;  %v3085_v22 = vld [vmem:[#allocation2 + $0x50] sm:$0xf] }
 0x1e1   : > { %v7188_v3 = vrot.slane %v3143_v46, 5  ;;  %v3149_v27 = vrot.slane %v3147_v63, 4  ;;  %v3219_v46 = vshrl.u32 %v3086_v40, 16  ;;  %v3206_v2 = vshrl.u32 %v3085_v22, 16 }
 0x1e2   : > { %v3209_v29 = vshll.u32 %v3085_v22, 16  ;;  %v7250_v22 = vrot.slane %v3239_v37, 5 }
 0x1e3   : > { %v3221_v18 = vrot.slane %v3219_v46, 4 }
 0x1e4   : > { %5698 = vmatmul.mubr.msk.bf16.gmra.mxu0 %vm1675_vm8, %v7069_v52  ;;  %v3211_v20 = vrot.slane %v3209_v29, 5 }
 0x1e5   : > { %5598 = vmatmul.mubr.msk.bf16.gmra.mxu1 %vm1675_vm8, %v6996_v19  ;;  %5701 = vmatprep.mubr.msk.bf16.mxu0 %vm1675_vm8, %v7076_v50  ;;  %v970_v19 = vsel %vm6582_vm5, 0, %v969_v62  ;;  %v6015_v62 = vld [vmem:[#allocation9 + $0x70] sm:$0xff]  }
 0x1e6   : > { %5601 = vmatprep.mubr.msk.bf16.mxu1 %vm1675_vm8, %v7014_v4  ;;  %971 = vst [vmem:[#allocation2 + $0x190] sm:$0x1] %v970_v19  ;;  %v3136_v4 = vrot.slane %v3134_v47, 4  ;;  %v7209_v47 = vrot.slane %v3201_v60, 5  ;;  %v3088_v19 = vld [vmem:[#allocation2 + $0x68] sm:$0xf] }
 0x1e7   : > { %v3230_v51 = vshrl.u32 %v3088_v19, 16  ;;  %v3233_v54 = vshll.u32 %v3088_v19, 16  ;;  %v3091_v60 = vld [vmem:[#allocation2 + $0x80] sm:$0xf] }
 0x1e8   : > { %v3140_v35 = vor.u32 %v3139_v43, %v3136_v4  ;;  %v3163_v4 = vrot.slane %v3161_v0, 5  ;;  %v3184_v43 = vrot.slane %v3182_v32, 4  ;;  %v3208_v32 = vrot.slane %v3206_v2, 4 }
 0x1e9   : > { %v3257_v46 = vshll.u32 %v3091_v60, 16 }
 0x1ea   : > { %v3141_v13 = vrot.slane %v3140_v35, 4  ;;  %v3243_v35 = vshrl.u32 %v3089_v7, 16  ;;  %v3188_v40 = vor.u32 %v3187_v23, %v3184_v43 }
 0x1ec   : > { %5702 = vmatmul.mubr.msk.bf16.gmra.mxu0 %vm1675_vm8, %v7080_v17  ;;  %v3146_v48 = vsel %vm7224_vm12, %v3141_v13, %v7188_v3  ;;  %v3254_v13 = vshrl.u32 %v3091_v60, 16  ;;  %v3189_v23 = vrot.slane %v3188_v40, 4 }
 0x1ed   : > { %5602 = vmatmul.mubr.msk.bf16.gmra.mxu1 %vm1675_vm8, %v7018_v28  ;;  %5705 = vmatprep.mubr.msk.bf16.mxu0 %vm1675_vm8, %v7089_v42  ;;  %v973_v28 = vsel %vm6582_vm5, 0, %v972_v30  ;;  %v3160_v30 = vrot.slane %v3158_v31, 4  ;;  %v7242_v31 = vrot.slane %v3321_v1, 5  ;;  %v3267_v1 = vshrl.u32 %v3092_v61, 16 }
 0x1ee   : > { %5645 = vmatprep.mubr.msk.bf16.mxu1 %vm1675_vm8, %v5068_v14  ;;  %974 = vst [vmem:[#allocation2 + $0x1a8] sm:$0x1] %v973_v28  ;;  %v3150_v14 = vor.u32 %v3149_v27, %v7188_v3  ;;  %v3174_v27 = vor.u32 %v3173_v57, %v7205_v33  ;;  %v7235_v28 = vrot.slane %v3215_v10, 5  ;;  %v3245_v10 = vrot.slane %v3243_v35, 4 }
 0x1ef   : > { %v3256_v2 = vrot.slane %v3254_v13, 4  ;;  %v3269_v35 = vrot.slane %v3267_v1, 4 }
 0x1f0   : > { %v3151_v63 = vrot.slane %v3150_v14, 4  ;;  %v3164_v14 = vor.u32 %v3163_v4, %v3160_v30  ;;  %v3175_v3 = vrot.slane %v3174_v27, 4  ;;  %v3222_v57 = vor.u32 %v3221_v18, %v7235_v28  ;;  %v3094_v30 = vld [vmem:[#allocation2 + $0x98] sm:$0xf] }
 0x1f1   : > { %v3297_v4 = vshll.u32 %v3096_v41, 16  ;;  %v3212_v27 = vor.u32 %v3211_v20, %v3208_v32  ;;  %v3281_v60 = vshll.u32 %v3094_v30, 16 }
 0x1f2   : > { %v3156_v53 = vsel %vm7224_vm12, %v3151_v63, %v7198_v25  ;;  %v3095_v63 = vld [vmem:[#allocation2 + $0x9c] sm:$0xf]  ;;  %v3165_v19 = vrot.slane %v3164_v14, 4  ;;  %v3180_v43 = vsel %vm7224_vm12, %v3175_v3, %v7200_v59  ;;  %v7265_v59 = vrot.slane %v3263_v26, 5  ;;  %v3097_v3 = vld [vmem:[#allocation2 + $0xb0] sm:$0xf] }
 0x1f3   : > { %v5140_v25 = vcombine.low %v3146_v48, %v3156_v53  ;;  %v3287_v29 = vshll.u32 %v3095_v63, 16  ;;  %v3291_v48 = vshrl.u32 %v3095_v63, 16  ;;  %v3259_v53 = vrot.slane %v3257_v46, 5 }
 0x1f4   : > { %5706 = vmatmul.mubr.msk.bf16.gmra.mxu0 %vm1675_vm8, %v7093_v12  ;;  %v3170_v37 = vsel %vm7224_vm12, %v3165_v19, %v7205_v33  ;;  %v3213_v40 = vrot.slane %v3212_v27, 4  ;;  %v7272_v41 = vrot.slane %v3297_v4, 5  ;;  %v3283_v46 = vrot.slane %v3281_v60, 5 }
 0x1f5   : > { %5646 = vmatmul.mubr.msk.bf16.vlgmr.msra.gmra.mxu1 %vm1675_vm8, %v6666_v44  ;;  %5709 = vmatprep.mubr.msk.bf16.mxu0 %vm1675_vm8, %v7097_v34  ;;  %v7267_v14 = vcombine.low %v3170_v37, %v3180_v43  ;;  %v7279_v20 = vrot.slane %v3287_v29, 5  ;;  %v3293_v61 = vrot.slane %v3291_v48, 4  ;;  %v3260_v13 = vor.u32 %v3259_v53, %v3256_v2  ;;  %v3103_v48 = vld [vmem:[#allocation2 + $0xe0] sm:$0xf]  ;;  %v3104_v37 = vld [vmem:[#allocation2 + $0xe4] sm:$0xf] }
 0x1f6   : > { %5714 = vmatpush3.bf16.msra.mxu1 %v7110_v55  ;;  %5649 = vmatprep.mubr.msk.bf16.mxu1 %vm1675_vm8, %v7126_v49  ;;  %v3198_v55 = vor.u32 %v3197_v58, %v7207_v38  ;;  %v3232_v58 = vrot.slane %v3230_v51, 4  ;;  %v3246_v51 = vor.u32 %v3245_v10, %v7250_v22  ;;  %v3100_v10 = vld [vmem:[#allocation2 + $0xc8] sm:$0xf]  ;;  %v3302_v63 = vshrl.u32 %v3097_v3, 16 }
 0x1f7   : > { %5715 = vmatprep.subr.bf16.mxu1 %v6015_v62  ;;  %v3305_v19 = vshll.u32 %v3097_v3, 16  ;;  %v3218_v43 = vsel %vm7224_vm12, %v3213_v40, %v7235_v28  ;;  %v3329_v27 = vshll.u32 %v3100_v10, 16 }
 0x1f8   : > { %v3199_v0 = vrot.slane %v3198_v55, 4  ;;  %v3223_v55 = vrot.slane %v3222_v57, 4  ;;  %v6018_v57 = vld [vmem:[#allocation9 + $0x80] sm:$0xff]   ;;  %v3304_v53 = vrot.slane %v3302_v63, 4 }
 0x1fa   : > { %5716 = vmatpush3.bf16.msra.mxu1 %v6015_v62  ;;  %v3235_v62 = vrot.slane %v3233_v54, 5  ;;  %v3204_v7 = vsel %vm7224_vm12, %v3199_v0, %v7209_v47  ;;  %v3278_v54 = vshrl.u32 %v3094_v30, 16  ;;  %v3194_v47 = vsel %vm7224_vm12, %v3189_v23, %v7207_v38  ;;  %v3098_v0 = vld [vmem:[#allocation2 + $0xb4] sm:$0xf] }
 0x1fb   : > { %5785 = vmatprep.subr.bf16.mxu1 %v7230_v36  ;;  %v7274_v32 = vcombine.low %v3194_v47, %v3204_v7  ;;  %v3228_v33 = vsel %vm7224_vm12, %v3223_v55, %v7203_v15  ;;  %v3270_v15 = vor.u32 %v3269_v35, %v7265_v59  ;;  %v3311_v26 = vshll.u32 %v3098_v0, 16  ;;  %v3102_v47 = vld [vmem:[#allocation2 + $0xd0] sm:$0x1] }
 0x1fc   : > { %5710 = vmatmul.mubr.msk.bf16.gmra.mxu0 %vm1675_vm8, %v7100_v6  ;;  %v3236_v18 = vor.u32 %v3235_v62, %v3232_v58  ;;  %v3247_v58 = vrot.slane %v3246_v51, 4  ;;  %v3280_v62 = vrot.slane %v3278_v54, 4  ;;  %v3315_v1 = vshrl.u32 %v3098_v0, 16 }
 0x1fd   : > { %5650 = vmatmul.mubr.msk.bf16.gmra.mxu1 %vm1675_vm8, %v7130_v9  ;;  %5753 = vmatprep.mubr.msk.bf16.mxu0 %vm1675_vm8, %v5140_v25  ;;  %v3101_v25 = vld [vmem:[#allocation2 + $0xcc] sm:$0xf]  ;;  %v3294_v23 = vor.u32 %v3293_v61, %v7279_v20  ;;  %v3326_v7 = vshrl.u32 %v3100_v10, 16  ;;  %v7295_v55 = vcombine.low %v3218_v43, %v3228_v33  ;;  %v3271_v28 = vrot.slane %v3270_v15, 4 }
 0x1fe   : > { %5653 = vmatprep.mubr.msk.bf16.mxu1 %vm1675_vm8, %v7045_v5  ;;  %v3237_v38 = vrot.slane %v3236_v18, 4  ;;  %v3335_v30 = vshll.u32 %v3101_v25, 16  ;;  %v3339_v4 = vshrl.u32 %v3101_v25, 16  ;;  %v3252_v29 = vsel %vm7224_vm12, %v3247_v58, %v7240_v39  ;;  %v7303_v18 = vld [vmem:[#allocation2 + $0xe8] sm:$0x1] }
 0x1ff   : > { %v3284_v51 = vor.u32 %v3283_v46, %v3280_v62  ;;  %v3307_v54 = vrot.slane %v3305_v19, 5  ;;  %v7305_v35 = vrot.slane %v3311_v26, 5  ;;  %v3317_v60 = vrot.slane %v3315_v1, 4  ;;  %v3106_v1 = vld [vmem:[#allocation2 + $0xf8] sm:$0xf] }
 0x200   : > { %v3242_v2 = vsel %vm7224_vm12, %v3237_v38, %v7250_v22  ;;  %v7307_v40 = vrot.slane %v3335_v30, 5  ;;  %v3341_v22 = vrot.slane %v3339_v4, 4  ;;  %v3295_v39 = vrot.slane %v3294_v23, 4 }
 0x201   : > { %v7309_v3 = vcombine.low %v3242_v2, %v3252_v29  ;;  %v3328_v0 = vrot.slane %v3326_v7, 4  ;;  %v3331_v33 = vrot.slane %v3329_v27, 5  ;;  %v3350_v61 = vshrl.u32 %v3103_v48, 16 }
 0x202   : > { %v3353_v25 = vshll.u32 %v3103_v48, 16  ;;  %v3359_v38 = vshll.u32 %v3104_v37, 16  ;;  %v3363_v58 = vshrl.u32 %v3104_v37, 16  ;;  %v3285_v62 = vrot.slane %v3284_v51, 4 }
 0x203   : > { %v3345_v10 = vshll.u32 %v3102_v47, 16  ;;  %v3369_v15 = vshll.u32 %v7303_v18, 16  ;;  %v3276_v46 = vsel %vm7224_vm12, %v3271_v28, %v7215_v16  ;;  %v3308_v63 = vor.u32 %v3307_v54, %v3304_v53  ;;  %v3110_v53 = vld [vmem:[#allocation2 + $0x114] sm:$0xf] }
 0x204   : > { %5754 = vmatmul.mubr.msk.bf16.vlgmr.msra.gmra.mxu0 %vm1675_vm8, %v7267_v14  ;;  %v3318_v19 = vor.u32 %v3317_v60, %v7305_v35  ;;  %v3342_v26 = vor.u32 %v3341_v22, %v7307_v40  ;;  %v3300_v30 = vsel %vm7224_vm12, %v3295_v39, %v7272_v41  ;;  %v3332_v4 = vor.u32 %v3331_v33, %v3328_v0  ;;  %v3109_v0 = vld [vmem:[#allocation2 + $0x110] sm:$0xf] }
 0x205   : > { %5654 = vmatmul.mubr.msk.bf16.gmra.mxu1 %vm1675_vm8, %v7049_v24  ;;  %5757 = vmatprep.mubr.msk.bf16.mxu0 %vm1675_vm8, %v7274_v32  ;;  %v3352_v23 = vrot.slane %v3350_v61, 4  ;;  %v3355_v7 = vrot.slane %v3353_v25, 5  ;;  %v7331_v27 = vrot.slane %v3359_v38, 5  ;;  %v3365_v2 = vrot.slane %v3363_v58, 4  ;;  %v3113_v58 = vld [vmem:[#allocation2 + $0x12c] sm:$0xf] }
 0x206   : > { %5657 = vmatprep.mubr.msk.bf16.mxu1 %vm1675_vm8, %v7053_v56  ;;  %5822 = vmatpush3.bf16.msra.mxu0 %v7141_v8  ;;  %v3261_v8 = vrot.slane %v3260_v13, 4  ;;  %v3107_v13 = vld [vmem:[#allocation2 + $0xfc] sm:$0xf]  ;;  %v3347_v16 = vrot.slane %v3345_v10, 5  ;;  %v3377_v48 = vshll.u32 %v3106_v1, 16  ;;  %v3290_v18 = vsel %vm7224_vm12, %v3285_v62, %v7279_v20 }
 0x207   : > { %5823 = vmatprep.subr.bf16.mxu0 %v6018_v57  ;;  %v3387_v43 = vshrl.u32 %v3107_v13, 16  ;;  %v3309_v28 = vrot.slane %v3308_v63, 4  ;;  %v3319_v51 = vrot.slane %v3318_v19, 4  ;;  %v3343_v41 = vrot.slane %v3342_v26, 4  ;;  %v3108_v20 = vld [vmem:[#allocation2 + $0x100] sm:$0x1] }
 0x208   : > { %v7338_v54 = vcombine.low %v3290_v18, %v3300_v30  ;;  %v3333_v47 = vrot.slane %v3332_v4, 4  ;;  %v3356_v22 = vor.u32 %v3355_v7, %v3352_v23  ;;  %v3366_v39 = vor.u32 %v3365_v2, %v7331_v27 }
 0x209   : > { %v3389_v60 = vrot.slane %v3387_v43, 4  ;;  %v3379_v61 = vrot.slane %v3377_v48, 5  ;;  %v3407_v25 = vshll.u32 %v3110_v53, 16  ;;  %v3411_v38 = vshrl.u32 %v3110_v53, 16 }
 0x20a   : > { %5824 = vmatpush3.bf16.msra.mxu0 %v6018_v57  ;;  %v3266_v57 = vsel %vm7224_vm12, %v3261_v8, %v7265_v59  ;;  %v3383_v59 = vshll.u32 %v3107_v13, 16  ;;  %v3374_v8 = vshrl.u32 %v3106_v1, 16  ;;  %v3314_v13 = vsel %vm7224_vm12, %v3309_v28, %v7305_v35  ;;  %v3112_v1 = vld [vmem:[#allocation2 + $0x128] sm:$0xf] }
 0x20b   : > { %v7333_v29 = vcombine.low %v3266_v57, %v3276_v46  ;;  %v3324_v57 = vsel %vm7224_vm12, %v3319_v51, %v7242_v31  ;;  %v3348_v62 = vsel %vm7224_vm12, %v3343_v41, %v3347_v16  ;;  %v3371_v10 = vrot.slane %v3369_v15, 5  ;;  %v3111_v16 = vld [vmem:[#allocation2 + $0x118] sm:$0x1] }
 0x20c   : > { %5758 = vmatmul.mubr.msk.bf16.gmra.mxu0 %vm1675_vm8, %v7295_v55  ;;  %v7340_v37 = vrot.slane %v3383_v59, 5  ;;  %v3376_v33 = vrot.slane %v3374_v8, 4  ;;  %v3393_v63 = vshll.u32 %v3108_v20, 16  ;;  %v3398_v19 = vshrl.u32 %v3109_v0, 16 }
 0x20d   : > { %5658 = vmatmul.mubr.msk.bf16.gmra.mxu1 %vm1675_vm8, %v7057_v21  ;;  %5761 = vmatprep.mubr.msk.bf16.mxu0 %vm1675_vm8, %v7309_v3  ;;  %v3401_v26 = vshll.u32 %v3109_v0, 16  ;;  %v3338_v30 = vsel %vm7224_vm12, %v3333_v47, %v7307_v40  ;;  %v3367_v4 = vrot.slane %v3366_v39, 4  ;;  %v3431_v35 = vshll.u32 %v3113_v58, 16  ;;  %v3116_v40 = vld [vmem:[#allocation2 + $0x144] sm:$0xf] }
 0x20e   : > { %5661 = vmatprep.mubr.msk.bf16.mxu1 %vm1675_vm8, %v7061_v45  ;;  %v3390_v46 = vor.u32 %v3389_v60, %v7340_v37  ;;  %v3435_v59 = vshrl.u32 %v3113_v58, 16  ;;  %v3357_v43 = vrot.slane %v3356_v22, 4  ;;  %v3380_v23 = vor.u32 %v3379_v61, %v3376_v33  ;;  %v3114_v33 = vld [vmem:[#allocation2 + $0x130] sm:$0x1]  ;;  %v3115_v61 = vld [vmem:[#allocation2 + $0x140] sm:$0xf] }
 0x20f   : > { %v7363_v31 = vrot.slane %v3407_v25, 5  ;;  %v3413_v7 = vrot.slane %v3411_v38, 4  ;;  %v7365_v2 = vcombine.low %v3314_v13, %v3324_v57  ;;  %v7367_v15 = vcombine.low %v3338_v30, %v3348_v62  ;;  %v3119_v57 = vld [vmem:[#allocation2 + $0x15c] sm:$0xf] }
 0x210   : > { %v3422_v8 = vshrl.u32 %v3112_v1, 16  ;;  %v3425_v48 = vshll.u32 %v3112_v1, 16  ;;  %v3391_v18 = vrot.slane %v3390_v46, 4  ;;  %v3395_v28 = vrot.slane %v3393_v63, 5  ;;  %v3118_v1 = vld [vmem:[#allocation2 + $0x158] sm:$0xf] }
 0x211   : > { %v3400_v51 = vrot.slane %v3398_v19, 4  ;;  %v3403_v41 = vrot.slane %v3401_v26, 5  ;;  %v3372_v53 = vsel %vm7224_vm12, %v3367_v4, %v3371_v10  ;;  %v7375_v60 = vrot.slane %v3431_v35, 5 }
 0x212   : > { %v3437_v47 = vrot.slane %v3435_v59, 4  ;;  %v3362_v22 = vsel %vm7224_vm12, %v3357_v43, %v7331_v27  ;;  %v3381_v39 = vrot.slane %v3380_v23, 4  ;;  %v3414_v20 = vor.u32 %v3413_v7, %v7363_v31 }
 0x213   : > { %v3417_v0 = vshll.u32 %v3111_v16, 16  ;;  %v3424_v25 = vrot.slane %v3422_v8, 4  ;;  %v3427_v38 = vrot.slane %v3425_v48, 5  ;;  %v3455_v58 = vshll.u32 %v3116_v40, 16 }
 0x214   : > { %5762 = vmatmul.mubr.msk.bf16.gmra.mxu0 %vm1675_vm8, %v7333_v29  ;;  %v3459_v13 = vshrl.u32 %v3116_v40, 16  ;;  %v7385_v62 = vcombine.low %v3362_v22, %v3372_v53  ;;  %v3396_v10 = vsel %vm7224_vm12, %v3391_v18, %v3395_v28  ;;  %v3404_v46 = vor.u32 %v3403_v41, %v3400_v51  ;;  %v3117_v18 = vld [vmem:[#allocation2 + $0x148] sm:$0x1] }
 0x215   : > { %5662 = vmatmul.mubr.msk.bf16.gmra.mxu1 %vm1675_vm8, %v7065_v11  ;;  %5765 = vmatprep.mubr.msk.bf16.mxu0 %vm1675_vm8, %v7338_v54  ;;  %v3438_v63 = vor.u32 %v3437_v47, %v7375_v60  ;;  %v3441_v27 = vshll.u32 %v3114_v33, 16  ;;  %v3446_v19 = vshrl.u32 %v3115_v61, 16  ;;  %v3449_v26 = vshll.u32 %v3115_v61, 16  ;;  %v3122_v47 = vld [vmem:[#allocation2 + $0x174] sm:$0xf] }
 0x216   : > { %5665 = vmatprep.mubr.msk.bf16.mxu1 %vm1675_vm8, %v7069_v52  ;;  %v3386_v30 = vsel %vm7224_vm12, %v3381_v39, %v7340_v37  ;;  %v3419_v4 = vrot.slane %v3417_v0, 5  ;;  %v3479_v35 = vshll.u32 %v3119_v57, 16  ;;  %v3483_v59 = vshrl.u32 %v3119_v57, 16 }
 0x217   : > { %v3415_v43 = vrot.slane %v3414_v20, 4  ;;  %v3428_v23 = vor.u32 %v3427_v38, %v3424_v25  ;;  %v3457_v7 = vrot.slane %v3455_v58, 5  ;;  %v3461_v16 = vrot.slane %v3459_v13, 4  ;;  %v3120_v25 = vld [vmem:[#allocation2 + $0x160] sm:$0x1] }
 0x218   : > { %v7393_v8 = vcombine.low %v3386_v30, %v3396_v10  ;;  %v3405_v48 = vrot.slane %v3404_v46, 4  ;;  %v3470_v28 = vshrl.u32 %v3118_v1, 16  ;;  %v3473_v51 = vshll.u32 %v3118_v1, 16  ;;  %v3121_v38 = vld [vmem:[#allocation2 + $0x170] sm:$0xf] }
 0x219   : > { %v3439_v37 = vrot.slane %v3438_v63, 4  ;;  %v3443_v41 = vrot.slane %v3441_v27, 5  ;;  %v3448_v40 = vrot.slane %v3446_v19, 4  ;;  %v3451_v53 = vrot.slane %v3449_v26, 5 }
 0x21a   : > { %8604 = vst [vmem:[#allocation25_spill] sm:$0xff] %v7393_v8  ;;  %v3481_v22 = vrot.slane %v3479_v35, 5  ;;  %v3485_v39 = vrot.slane %v3483_v59, 4  ;;  %v3420_v20 = vsel %vm7224_vm12, %v3415_v43, %v3419_v4  ;;  %v3429_v0 = vrot.slane %v3428_v23, 4 }
 0x21b   : > { %v3462_v33 = vor.u32 %v3461_v16, %v3457_v7  ;;  %v3465_v61 = vshll.u32 %v3117_v18, 16  ;;  %v3472_v58 = vrot.slane %v3470_v28, 4  ;;  %v3475_v13 = vrot.slane %v3473_v51, 5  ;;  %v3123_v28 = vld [vmem:[#allocation2 + $0x178] sm:$0x1] }
 0x21c   : > { %5766 = vmatmul.mubr.msk.bf16.gmra.mxu0 %vm1675_vm8, %v7365_v2  ;;  %v3503_v57 = vshll.u32 %v3122_v47, 16  ;;  %v3507_v10 = vshrl.u32 %v3122_v47, 16  ;;  %v3410_v46 = vsel %vm7224_vm12, %v3405_v48, %v7363_v31  ;;  %v3444_v63 = vsel %vm7224_vm12, %v3439_v37, %v3443_v41 }
 0x21d   : > { %5666 = vmatmul.mubr.msk.bf16.gmra.mxu1 %vm1675_vm8, %v7076_v50  ;;  %5769 = vmatprep.mubr.msk.bf16.mxu0 %vm1675_vm8, %v7367_v15  ;;  %v3452_v27 = vor.u32 %v3451_v53, %v3448_v40  ;;  %v3486_v19 = vor.u32 %v3485_v39, %v3481_v22  ;;  %v3489_v26 = vshll.u32 %v3120_v25, 16  ;;  %v3494_v1 = vshrl.u32 %v3121_v38, 16  ;;  %v6019_v25 = vld [vmem:[#allocation9 + $0x50] sm:$0xff]  }
 0x21e   : > { %5669 = vmatprep.mubr.msk.bf16.mxu1 %vm1675_vm8, %v7080_v17  ;;  %v3497_v30 = vshll.u32 %v3121_v38, 16  ;;  %v7410_v4 = vcombine.low %v3410_v46, %v3420_v20  ;;  %v3434_v35 = vsel %vm7224_vm12, %v3429_v0, %v7375_v60  ;;  %v3463_v59 = vrot.slane %v3462_v33, 4 }
 0x21f   : > { %v3467_v43 = vrot.slane %v3465_v61, 5  ;;  %v7415_v23 = vcombine.low %v3434_v35, %v3444_v63  ;;  %v3476_v16 = vor.u32 %v3475_v13, %v3472_v58  ;;  %v3505_v31 = vrot.slane %v3503_v57, 5 }
 0x220   : > { %8605 = vst [vmem:[#allocation24_spill] sm:$0xff] %v7410_v4  ;;  %v3509_v48 = vrot.slane %v3507_v10, 4  ;;  %v3453_v18 = vrot.slane %v3452_v27, 4  ;;  %v3487_v60 = vrot.slane %v3486_v19, 4  ;;  %v3491_v51 = vrot.slane %v3489_v26, 5 }
 0x221   : > { %8606 = vst [vmem:[#allocation26_spill] sm:$0xff] %v7415_v23  ;;  %v3496_v37 = vrot.slane %v3494_v1, 4  ;;  %v3499_v41 = vrot.slane %v3497_v30, 5  ;;  %v3468_v40 = vsel %vm7224_vm12, %v3463_v59, %v3467_v43  ;;  %v3477_v53 = vrot.slane %v3476_v16, 4 }
 0x222   : > { %v3510_v47 = vor.u32 %v3509_v48, %v3505_v31  ;;  %v3513_v39 = vshll.u32 %v3123_v28, 16  ;;  %v3458_v20 = vsel %vm7224_vm12, %v3453_v18, %v3457_v7  ;;  %v3492_v0 = vsel %vm7224_vm12, %v3487_v60, %v3491_v51 }
 0x223   : > { %v7433_v61 = vcombine.low %v3458_v20, %v3468_v40  ;;  %v3482_v38 = vsel %vm7224_vm12, %v3477_v53, %v3481_v22 }
 0x224   : > { %5770 = vmatmul.mubr.msk.bf16.gmra.mxu0 %vm1675_vm8, %v7385_v62  ;;  %v3511_v58 = vrot.slane %v3510_v47, 4  ;;  %v3515_v13 = vrot.slane %v3513_v39, 5  ;;  %v7441_v7 = vcombine.low %v3482_v38, %v3492_v0 }
 0x225   : > { %5670 = vmatmul.mubr.msk.bf16.gmra.mxu1 %vm1675_vm8, %v7089_v42  ;;  %5773 = vmatprep.mubr.msk.bf16.mxu0 %vm1675_vm8, %v7393_v8 }
 0x226   : > { %5673 = vmatprep.mubr.msk.bf16.mxu1 %vm1675_vm8, %v7093_v12 }
 0x22c   : > { %5774 = vmatmul.mubr.msk.bf16.gmra.mxu0 %vm1675_vm8, %v7410_v4 }
 0x22d   : > { %5674 = vmatmul.mubr.msk.bf16.gmra.mxu1 %vm1675_vm8, %v7097_v34  ;;  %5777 = vmatprep.mubr.msk.bf16.mxu0 %vm1675_vm8, %v7415_v23 }
 0x22e   : > { %5717 = vmatprep.mubr.msk.bf16.mxu1 %vm1675_vm8, %v7126_v49  ;;  %v3500_v49 = vor.u32 %v3499_v41, %v3496_v37 }
 0x230   : > { %v3501_v10 = vrot.slane %v3500_v49, 4 }
 0x232   : > { %v7431_v33 = vpop.f32.mrf.mxu0  ;;  %v3506_v63 = vsel %vm7224_vm12, %v3501_v10, %v3505_v31 }
 0x234   : > { %5778 = vmatmul.mubr.msk.bf16.gmra.mxu0 %vm1675_vm8, %v7433_v61  ;;  %v7443_v57 = vpop.f32.mrf.mxu0 }
 0x235   : > { %5718 = vmatmul.mubr.msk.bf16.vlgmr.msra.gmra.mxu1 %vm1675_vm8, %v7130_v9  ;;  %5781 = vmatprep.mubr.msk.bf16.mxu0 %vm1675_vm8, %v7441_v7  ;;  %v3516_v9 = vsel %vm7224_vm12, %v3511_v58, %v3515_v13 }
 0x236   : > { %5786 = vmatpush3.bf16.msra.mxu1 %v7230_v36  ;;  %5721 = vmatprep.mubr.msk.bf16.mxu1 %vm1675_vm8, %v7045_v5  ;;  %v7450_v22 = vpop.f32.mrf.mxu0  ;;  %v7458_v36 = vcombine.low %v3506_v63, %v3516_v9 }
 0x237   : > { %5787 = vmatprep.subr.bf16.mxu1 %v6019_v25 }
 0x238   : > { %v7454_v46 = vpop.f32.mrf.mxu0 }
 0x23a   : > { %5788 = vmatpush3.bf16.msra.mxu1 %v6019_v25  ;;  %v3124_v25 = vld [vmem:[#allocation2 + $0x188] sm:$0xf] }
 0x23b   : > { %v3827_v63 = vshll.u32 %v3124_v25, 16 }
 0x23c   : > { %v7460_v27 = vpop.f32.mrf.mxu0  ;;  %5782 = vmatmul.mubr.msk.bf16.gmra.mxu0 %vm1675_vm8, %v7458_v36 }
 0x23d   : > { %5722 = vmatmul.mubr.msk.bf16.gmra.mxu1 %vm1675_vm8, %v7049_v24  ;;  %5825 = vmatprep.mubr.msk.bf16.mxu0 %vm1675_vm8, %v7274_v32 }
 0x23e   : > { %5725 = vmatprep.mubr.msk.bf16.mxu1 %vm1675_vm8, %v7053_v56  ;;  %v7470_v5 = vpop.f32.mrf.mxu0 }
 0x240   : > { %v7472_v19 = vpop.f32.mrf.mxu0 }
 0x242   : > { %v7474_v26 = vpop.f32.mrf.mxu0  ;;  %v7476_v1 = vpop.f32.mrf.mxu1 }
 0x244   : > { %v7478_v30 = vpop.f32.mrf.mxu0  ;;  %5826 = vmatmul.mubr.msk.bf16.vlgmr.msra.gmra.mxu0 %vm1675_vm8, %v7295_v55  ;;  %v7484_v24 = vpop.f32.mrf.mxu1 }
 0x245   : > { %5726 = vmatmul.mubr.msk.bf16.gmra.mxu1 %vm1675_vm8, %v7057_v21  ;;  %5829 = vmatprep.mubr.msk.bf16.mxu0 %vm1675_vm8, %v7309_v3 }
 0x246   : > { %5729 = vmatprep.mubr.msk.bf16.mxu1 %vm1675_vm8, %v7061_v45  ;;  %v7490_v56 = vpop.f32.mrf.mxu0  ;;  %v7492_v35 = vpop.f32.mrf.mxu1 }
 0x248   : > { %v7494_v59 = vpop.f32.mrf.mxu0  ;;  %v7496_v43 = vpop.f32.mrf.mxu1 }
 0x24a   : > { %v7498_v21 = vpop.f32.mrf.mxu0  ;;  %v7500_v16 = vpop.f32.mrf.mxu1 }
 0x24c   : > { %v7502_v31 = vpop.f32.mrf.mxu0  ;;  %5830 = vmatmul.mubr.msk.bf16.gmra.mxu0 %vm1675_vm8, %v7333_v29  ;;  %v7508_v45 = vpop.f32.mrf.mxu1 }
 0x24d   : > { %5730 = vmatmul.mubr.msk.bf16.gmra.mxu1 %vm1675_vm8, %v7065_v11  ;;  %5833 = vmatprep.mubr.msk.bf16.mxu0 %vm1675_vm8, %v7338_v54 }
 0x24e   : > { %5733 = vmatprep.mubr.msk.bf16.mxu1 %vm1675_vm8, %v7069_v52  ;;  %v7514_v48 = vpop.f32.mrf.mxu0  ;;  %v7516_v18 = vpop.f32.mrf.mxu1 }
 0x24f   : > { %8607 = vst [vmem:[#allocation27_spill] sm:$0xff] %v7516_v18 }
 0x250   : > { %v7518_v28 = vpop.f32.mrf.mxu0  ;;  %v7520_v60 = vpop.f32.mrf.mxu1 }
 0x251   : > { %8608 = vst [vmem:[#allocation29_spill] sm:$0xff] %v7520_v60  ;;  %v6023_v60 = vld [vmem:[#allocation2 + $0x1a0] sm:$0xf] }
 0x252   : > { %v7522_v11 = vpop.f32.mrf.mxu0 }
 0x254   : > { %v7526_v37 = vpop.f32.mrf.mxu0  ;;  %5834 = vmatmul.mubr.msk.bf16.gmra.mxu0 %vm1675_vm8, %v7365_v2 }
 0x255   : > { %v7524_v51 = vpop.f32.mrf.mxu1  ;;  %5734 = vmatmul.mubr.msk.bf16.gmra.mxu1 %vm1675_vm8, %v7076_v50  ;;  %5837 = vmatprep.mubr.msk.bf16.mxu0 %vm1675_vm8, %v7367_v15 }
 0x256   : > { %8609 = vst [vmem:[#allocation28_spill] sm:$0xff] %v7524_v51  ;;  %5737 = vmatprep.mubr.msk.bf16.mxu1 %vm1675_vm8, %v7080_v17  ;;  %v7538_v41 = vpop.f32.mrf.mxu0  ;;  %v3125_v17 = vld [vmem:[#allocation2 + $0x18c] sm:$0xf] }
 0x257   : > { %v7536_v52 = vpop.f32.mrf.mxu1  ;;  %v3837_v13 = vshrl.u32 %v3125_v17, 16 }
 0x258   : > { %8610 = vst [vmem:[#allocation30_spill] sm:$0xff] %v7536_v52  ;;  %v7542_v53 = vpop.f32.mrf.mxu0 }
 0x259   : > { %v7540_v40 = vpop.f32.mrf.mxu1 }
 0x25a   : > { %8611 = vst [vmem:[#allocation31_spill] sm:$0xff] %v7540_v40  ;;  %v7546_v50 = vpop.f32.mrf.mxu0  ;;  %v3127_v40 = vld [vmem:[#allocation2 + $0x1a0] sm:$0xf] }
 0x25b   : > { %v7544_v47 = vpop.f32.mrf.mxu1  ;;  %v4064_v52 = vshrl.u32 %v3127_v40, 16 }
 0x25c   : > { %8612 = vst [vmem:[#allocation32_spill] sm:$0xff] %v7544_v47  ;;  %v7550_v20 = vpop.f32.mrf.mxu0  ;;  %5838 = vmatmul.mubr.msk.bf16.gmra.mxu0 %vm1675_vm8, %v7385_v62 }
 0x25d   : > { %v7548_v39 = vpop.f32.mrf.mxu1  ;;  %8614 = vst [vmem:[#allocation33_spill] sm:$0xff] %v7550_v20  ;;  %5738 = vmatmul.mubr.msk.bf16.gmra.mxu1 %vm1675_vm8, %v7089_v42  ;;  %5841 = vmatprep.mubr.msk.bf16.mxu0 %vm1675_vm8, %v7393_v8  ;;  %v3833_v42 = vshll.u32 %v3125_v17, 16  ;;  %v3128_v17 = vld [vmem:[#allocation2 + $0x1a4] sm:$0xf] }
 0x25e   : > { %8613 = vst [vmem:[#allocation23_spill] sm:$0xff] %v7548_v39  ;;  %5741 = vmatprep.mubr.msk.bf16.mxu1 %vm1675_vm8, %v7093_v12  ;;  %v7562_v49 = vpop.f32.mrf.mxu0  ;;  %v3824_v12 = vshrl.u32 %v3124_v25, 16  ;;  %v3126_v25 = vld [vmem:[#allocation2 + $0x190] sm:$0x1] }
 0x25f   : > { %v7560_v0 = vpop.f32.mrf.mxu1  ;;  %8616 = vst [vmem:[#allocation35_spill] sm:$0xff] %v7562_v49 }
 0x260   : > { %8615 = vst [vmem:[#allocation34_spill] sm:$0xff] %v7560_v0  ;;  %v7566_v58 = vpop.f32.mrf.mxu0  ;;  %v3839_v0 = vrot.slane %v3837_v13, 4 }
 0x261   : > { %v7564_v38 = vpop.f32.mrf.mxu1  ;;  %8618 = vst [vmem:[#allocation37_spill] sm:$0xff] %v7566_v58 }
 0x262   : > { %8617 = vst [vmem:[#allocation36_spill] sm:$0xff] %v7564_v38  ;;  %v7570_v9 = vpop.f32.mrf.mxu0  ;;  %v3835_v38 = vrot.slane %v3833_v42, 5  ;;  %v4077_v42 = vshrl.u32 %v3128_v17, 16 }
 0x263   : > { %v7568_v10 = vpop.f32.mrf.mxu1  ;;  %8620 = vst [vmem:[#allocation39_spill] sm:$0xff] %v7570_v9  ;;  %v4067_v9 = vshll.u32 %v3127_v40, 16 }
 0x264   : > { %8619 = vst [vmem:[#allocation38_spill] sm:$0xff] %v7568_v10  ;;  %v7574_v47 = vpop.f32.mrf.mxu0  ;;  %5842 = vmatmul.mubr.msk.bf16.gmra.mxu0 %vm1675_vm8, %v7410_v4  ;;  %v4073_v4 = vshll.u32 %v3128_v17, 16  ;;  %v3840_v8 = vor.u32 %v3839_v0, %v3835_v38  ;;  %v4079_v40 = vrot.slane %v4077_v42, 4 }
 0x265   : > { %v7572_v39 = vpop.f32.mrf.mxu1  ;;  %8622 = vst [vmem:[#allocation41_spill] sm:$0xff] %v7574_v47  ;;  %5742 = vmatmul.mubr.msk.bf16.gmra.mxu1 %vm1675_vm8, %v7097_v34  ;;  %5845 = vmatprep.mubr.msk.bf16.mxu0 %vm1675_vm8, %v7415_v23  ;;  %v3826_v47 = vrot.slane %v3824_v12, 4  ;;  %v3829_v34 = vrot.slane %v3827_v63, 5  ;;  %v4066_v12 = vrot.slane %v4064_v52, 4  ;;  %v4069_v63 = vrot.slane %v4067_v9, 5 }
 0x266   : > { %8621 = vst [vmem:[#allocation40_spill] sm:$0xff] %v7572_v39  ;;  %5745 = vmatprep.mubr.msk.bf16.mxu1 %vm1675_vm8, %v7100_v6  ;;  %v7586_v10 = vpop.f32.mrf.mxu0  ;;  %v3843_v6 = vshll.u32 %v3126_v25, 16  ;;  %v4075_v18 = vrot.slane %v4073_v4, 5  ;;  %v3841_v0 = vrot.slane %v3840_v8, 4 }
 0x267   : > { %v7584_v39 = vpop.f32.mrf.mxu1  ;;  %8624 = vst [vmem:[#allocation43_spill] sm:$0xff] %v7586_v10  ;;  %v3830_v10 = vor.u32 %v3829_v34, %v3826_v47  ;;  %v4070_v47 = vor.u32 %v4069_v63, %v4066_v12 }
 0x268   : > { %8623 = vst [vmem:[#allocation42_spill] sm:$0xff] %v7584_v39  ;;  %v7590_v51 = vpop.f32.mrf.mxu0  ;;  %v6024_v39 = vld [vmem:[#allocation2 + $0x1a4] sm:$0xf]  ;;  %v3845_v25 = vrot.slane %v3843_v6, 5 }
 0x269   : > { %v7588_v13 = vpop.f32.mrf.mxu1  ;;  %v5121_v49 = vcombine.low %v6023_v60, %v6024_v39  ;;  %v3831_v52 = vrot.slane %v3830_v10, 4  ;;  %v4080_v39 = vor.u32 %v4079_v40, %v4075_v18  ;;  %v4071_v10 = vrot.slane %v4070_v47, 4 }
 0x26a   : > { %v7594_v23 = vpop.f32.mrf.mxu0  ;;  %v3846_v8 = vsel %vm7224_vm12, %v3841_v0, %v3845_v25 }
 0x26b   : > { %v7592_v58 = vpop.f32.mrf.mxu1  ;;  %v3836_v6 = vsel %vm7224_vm12, %v3831_v52, %v3835_v38  ;;  %v4081_v12 = vrot.slane %v4080_v39, 4  ;;  %v4076_v47 = vsel %vm7224_vm12, %v4071_v10, %v4075_v18 }
 0x26c   : > { %8625 = vst [vmem:[#allocation44_spill] sm:$0xff] %v7592_v58  ;;  %v7598_v17 = vpop.f32.mrf.mxu0  ;;  %5846 = vmatmul.mubr.msk.bf16.gmra.mxu0 %vm1675_vm8, %v7433_v61  ;;  %v3129_v58 = vld [vmem:[#allocation2 + $0x1a8] sm:$0x1] }
 0x26d   : > { %v7596_v20 = vpop.f32.mrf.mxu1  ;;  %5746 = vmatmul.mubr.msk.bf16.gmra.mxu1 %vm1675_vm8, %v5121_v49  ;;  %5849 = vmatprep.mubr.msk.bf16.mxu0 %vm1675_vm8, %v7441_v7  ;;  %v4083_v49 = vshll.u32 %v3129_v58, 16 }
 0x26e   : > { %5789 = vmatprep.mubr.msk.bf16.mxu1 %vm1675_vm8, %v7267_v14  ;;  %v7609_v60 = vpop.f32.mrf.mxu0 }
 0x26f   : > { %v7607_v4 = vpop.f32.mrf.mxu1  ;;  %v4085_v63 = vrot.slane %v4083_v49, 5 }
 0x270   : > { %8626 = vst [vmem:[#allocation45_spill] sm:$0xff] %v7607_v4  ;;  %v7613_v34 = vpop.f32.mrf.mxu0  ;;  %v7623_v4 = vcombine.low %v3836_v6, %v3846_v8 }
 0x271   : > { %v7611_v9 = vpop.f32.mrf.mxu1 }
 0x272   : > { %v7619_v14 = vpop.f32.mrf.mxu0 }
 0x273   : > { %v7617_v42 = vpop.f32.mrf.mxu1 }
 0x274   : > { %v7625_v40 = vpop.f32.mrf.mxu0  ;;  %5850 = vmatmul.mubr.msk.bf16.gmra.mxu0 %vm1675_vm8, %v7458_v36 }
 0x275   : > { %v5575_v58 = vpop.f32.mrf.mxu1  ;;  %5790 = vmatmul.mubr.msk.bf16.vlgmr.msra.gmra.mxu1 %vm1675_vm8, %v7274_v32  ;;  %5853 = vmatprep.mubr.msk.bf16.mxu0 %vm1675_vm8, %v7623_v4  ;;  %v4086_v32 = vsel %vm7224_vm12, %v4081_v12, %v4085_v63 }
 0x276   : > { %v1946_v0 = vadd.f32 %v5575_v58, %v7431_v33  ;;  %5793 = vmatprep.mubr.msk.bf16.mxu1 %vm1675_vm8, %v7295_v55  ;;  %v7636_v25 = vpop.f32.mrf.mxu0 }
 0x277   : > { %v1937_v38 = vpop.f32.mrf.mxu1 }
 0x278   : > { %v1938_v52 = vadd.f32 %v1937_v38, %v7443_v57  ;;  %v7644_v39 = vadd.f32 %v7478_v30, %v1946_v0  ;;  %v7646_v49 = vpop.f32.mrf.mxu0  ;;  %v5193_v57 = vcombine.low %v4076_v47, %v4086_v32 }
 0x279   : > { %v5576_v33 = vpop.f32.mrf.mxu1 }
 0x27a   : > { %v1949_v55 = vadd.f32 %v5576_v33, %v7450_v22  ;;  %v7650_v8 = vadd.f32 %v7490_v56, %v1938_v52  ;;  %v7652_v58 = vpop.f32.mrf.mxu0 }
 0x27b   : > { %v1940_v6 = vpop.f32.mrf.mxu1 }
 0x27c   : > { %v1941_v18 = vadd.f32 %v1940_v6, %v7454_v46  ;;  %v7656_v44 = vadd.f32 %v7494_v59, %v1949_v55  ;;  %v7658_v30 = vpop.f32.mrf.mxu0  ;;  %5854 = vmatmul.mubr.msk.bf16.gmra.mxu0 %vm1675_vm8, %v5193_v57 }
 0x27d   : > { %v5579_v10 = vpop.f32.mrf.mxu1  ;;  %5794 = vmatmul.mubr.msk.bf16.gmra.mxu1 %vm1675_vm8, %v7309_v3 }
 0x27e   : > { %v1962_v22 = vadd.f32 %v5579_v10, %v7460_v27  ;;  %5797 = vmatprep.mubr.msk.bf16.mxu1 %vm1675_vm8, %v7333_v29  ;;  %v7667_v56 = vadd.f32 %v7498_v21, %v1941_v18  ;;  %v7669_v12 = vpop.f32.mrf.mxu0 }
 0x27f   : > { %v1953_v46 = vpop.f32.mrf.mxu1 }
 0x280   : > { %v1954_v59 = vadd.f32 %v1953_v46, %v7470_v5  ;;  %v7673_v63 = vadd.f32 %v7502_v31, %v1962_v22  ;;  %v7675_v3 = vpop.f32.mrf.mxu0 }
 0x281   : > { %v5580_v0 = vpop.f32.mrf.mxu1 }
 0x282   : > { %v1965_v38 = vadd.f32 %v5580_v0, %v7472_v19  ;;  %v7679_v27 = vadd.f32 %v7514_v48, %v1954_v59  ;;  %v7681_v52 = vpop.f32.mrf.mxu0 }
 0x283   : > { %v1956_v29 = vpop.f32.mrf.mxu1 }
 0x284   : > { %v1957_v21 = vadd.f32 %v1956_v29, %v7474_v26  ;;  %v7685_v47 = vadd.f32 %v7518_v28, %v1965_v38  ;;  %v7687_v32 = vpop.f32.mrf.mxu0  ;;  %v6021_v26 = vld [vmem:[%s8522_s7 + $0x8] sm:$0xff]  }
 0x285   : > { %v5583_v5 = vpop.f32.mrf.mxu1  ;;  %5798 = vmatmul.mubr.msk.bf16.gmra.mxu1 %vm1675_vm8, %v7338_v54  ;;  %5857 = vmatprep.subr.bf16.mxu1 %v6021_v26 }
 0x286   : > { %v1978_v31 = vadd.f32 %v5583_v5, %v7476_v1  ;;  %5801 = vmatprep.mubr.msk.bf16.mxu1 %vm1675_vm8, %v7365_v2  ;;  %v7695_v19 = vadd.f32 %v7522_v11, %v1957_v21  ;;  %v7700_v28 = vpop.f32.mrf.mxu0  ;;  %5858 = vmatpush3.bf16.msra.mxu1 %v6021_v26  ;;  %v8631_v26 = vld [vmem:[#allocation37_spill] sm:$0xff] }
 0x287   : > { %v1969_v48 = vpop.f32.mrf.mxu1 }
 0x288   : > { %v1970_v33 = vadd.f32 %v1969_v48, %v7484_v24  ;;  %v7704_v55 = vadd.f32 %v7526_v37, %v1978_v31  ;;  %v7706_v1 = vpop.f32.mrf.mxu0 }
 0x289   : > { %v5584_v54 = vpop.f32.mrf.mxu1 }
 0x28a   : > { %v1981_v2 = vadd.f32 %v5584_v54, %v7492_v35  ;;  %v7710_v11 = vadd.f32 %v7538_v41, %v1970_v33  ;;  %v7712_v57 = vpop.f32.mrf.mxu0  ;;  %v8632_v54 = vld [vmem:[#allocation25_spill] sm:$0xff] }
 0x28b   : > { %v1972_v6 = vpop.f32.mrf.mxu1 }
 0x28c   : > { %v1973_v18 = vadd.f32 %v1972_v6, %v7496_v43  ;;  %v7716_v24 = vadd.f32 %v7542_v53, %v1981_v2  ;;  %v7718_v10 = vpop.f32.mrf.mxu0  ;;  %v8627_v53 = vld [vmem:[#allocation33_spill] sm:$0xff]  ;;  %v8633_v2 = vld [vmem:[#allocation28_spill] sm:$0xff] }
 0x28d   : > { %v5587_v37 = vpop.f32.mrf.mxu1  ;;  %5802 = vmatmul.mubr.msk.bf16.gmra.mxu1 %vm1675_vm8, %v7367_v15  ;;  %v8628_v15 = vld [vmem:[#allocation27_spill] sm:$0xff] }
 0x28e   : > { %v1994_v22 = vadd.f32 %v5587_v37, %v7500_v16  ;;  %5805 = vmatprep.mubr.msk.bf16.mxu1 %vm1675_vm8, %v7385_v62  ;;  %v7726_v35 = vadd.f32 %v7546_v50, %v1973_v18  ;;  %v7728_v46 = vpop.f32.mrf.mxu0  ;;  %v8629_v16 = vld [vmem:[#allocation35_spill] sm:$0xff]  ;;  %v8630_v50 = vld [vmem:[#allocation29_spill] sm:$0xff]  ;;  %v8634_v18 = vld [vmem:[#allocation24_spill] sm:$0xff] }
 0x28f   : > { %v1985_v41 = vpop.f32.mrf.mxu1  ;;  %v8635_v37 = vld [vmem:[#allocation39_spill] sm:$0xff] }
 0x290   : > { %v1986_v43 = vadd.f32 %v1985_v41, %v7508_v45  ;;  %v7732_v59 = vadd.f32 %v8627_v53, %v1994_v22  ;;  %v7734_v38 = vpop.f32.mrf.mxu0  ;;  %v8637_v53 = vld [vmem:[#allocation30_spill] sm:$0xff] }
 0x291   : > { %v5588_v0 = vpop.f32.mrf.mxu1 }
 0x292   : > { %v1997_v29 = vadd.f32 %v5588_v0, %v8628_v15  ;;  %v7738_v21 = vadd.f32 %v8629_v16, %v1986_v43  ;;  %v7740_v5 = vpop.f32.mrf.mxu0  ;;  %v8638_v15 = vld [vmem:[#allocation41_spill] sm:$0xff] }
 0x293   : > { %v1988_v62 = vpop.f32.mrf.mxu1 }
 0x294   : > { %v1989_v31 = vadd.f32 %v1988_v62, %v8630_v50  ;;  %v7744_v48 = vadd.f32 %v8631_v26, %v1997_v29  ;;  %v7746_v33 = vpop.f32.mrf.mxu0  ;;  %v8640_v50 = vld [vmem:[#allocation31_spill] sm:$0xff] }
 0x295   : > { %v5591_v45 = vpop.f32.mrf.mxu1  ;;  %5806 = vmatmul.mubr.msk.bf16.gmra.mxu1 %vm1675_vm8, %v8632_v54 }
 0x296   : > { %v2010_v6 = vadd.f32 %v5591_v45, %v8633_v2  ;;  %5809 = vmatprep.mubr.msk.bf16.mxu1 %vm1675_vm8, %v8634_v18  ;;  %v7754_v22 = vadd.f32 %v8635_v37, %v1989_v31  ;;  %v7756_v43 = vpop.f32.mrf.mxu0  ;;  %v8641_v45 = vld [vmem:[#allocation43_spill] sm:$0xff]  ;;  %v8642_v31 = vld [vmem:[#allocation32_spill] sm:$0xff] }
 0x297   : > { %v2001_v41 = vpop.f32.mrf.mxu1 }
 0x298   : > { %8636 = vst [vmem:[#allocation33_spill] sm:$0xff] %v7754_v22  ;;  %v2002_v0 = vadd.f32 %v2001_v41, %v8637_v53  ;;  %v7760_v29 = vadd.f32 %v8638_v15, %v2010_v6  ;;  %v7762_v62 = vpop.f32.mrf.mxu0  ;;  %v8644_v6 = vld [vmem:[#allocation26_spill] sm:$0xff]  ;;  %v8645_v15 = vld [vmem:[#allocation23_spill] sm:$0xff] }
 0x299   : > { %v5592_v16 = vpop.f32.mrf.mxu1 }
 0x29a   : > { %8639 = vst [vmem:[#allocation27_spill] sm:$0xff] %v7760_v29  ;;  %v2013_v26 = vadd.f32 %v5592_v16, %v8640_v50  ;;  %v7766_v54 = vadd.f32 %v8641_v45, %v2002_v0  ;;  %v7768_v18 = vpop.f32.mrf.mxu0  ;;  %v8647_v45 = vld [vmem:[#allocation34_spill] sm:$0xff] }
 0x29b   : > { %v2004_v2 = vpop.f32.mrf.mxu1 }
 0x29c   : > { %v2005_v37 = vadd.f32 %v2004_v2, %v8642_v31  ;;  %v7772_v22 = vadd.f32 %v7590_v51, %v2013_v26  ;;  %v7774_v53 = vpop.f32.mrf.mxu0 }
 0x29d   : > { %v5595_v41 = vpop.f32.mrf.mxu1  ;;  %5810 = vmatmul.mubr.msk.bf16.gmra.mxu1 %vm1675_vm8, %v8644_v6  ;;  %v8648_v6 = vld [vmem:[#allocation36_spill] sm:$0xff] }
 0x29e   : > { %8643 = vst [vmem:[#allocation35_spill] sm:$0xff] %v7772_v22  ;;  %v2026_v29 = vadd.f32 %v5595_v41, %v8645_v15  ;;  %5813 = vmatprep.mubr.msk.bf16.mxu1 %vm1675_vm8, %v7433_v61  ;;  %v7782_v0 = vadd.f32 %v7594_v23, %v2005_v37  ;;  %v7784_v50 = vpop.f32.mrf.mxu0  ;;  %v8649_v23 = vld [vmem:[#allocation38_spill] sm:$0xff] }
 0x29f   : > { %v2017_v16 = vpop.f32.mrf.mxu1 }
 0x2a0   : > { %8646 = vst [vmem:[#allocation29_spill] sm:$0xff] %v7782_v0  ;;  %v2018_v51 = vadd.f32 %v2017_v16, %v8647_v45  ;;  %v7788_v26 = vadd.f32 %v7598_v17, %v2026_v29  ;;  %v7790_v31 = vpop.f32.mrf.mxu0  ;;  %v8650_v17 = vld [vmem:[#allocation40_spill] sm:$0xff] }
 0x2a1   : > { %v5596_v2 = vpop.f32.mrf.mxu1 }
 0x2a2   : > { %v2029_v22 = vadd.f32 %v5596_v2, %v8648_v6  ;;  %v7794_v41 = vadd.f32 %v7609_v60, %v2018_v51  ;;  %v7796_v15 = vpop.f32.mrf.mxu0  ;;  %v6022_v51 = vld [vmem:[%s8522_s7] sm:$0xff]   ;;  %v8652_v2 = vld [vmem:[#allocation42_spill] sm:$0xff] }
 0x2a3   : > { %v2020_v61 = vpop.f32.mrf.mxu1  ;;  %5859 = vmatprep.subr.bf16.mxu1 %v6022_v51 }
 0x2a4   : > { %v2021_v37 = vadd.f32 %v2020_v61, %v8649_v23  ;;  %v7800_v0 = vadd.f32 %v7613_v34, %v2029_v22  ;;  %v7802_v45 = vpop.f32.mrf.mxu0  ;;  %5860 = vmatpush3.bf16.msra.mxu1 %v6022_v51 }
 0x2a5   : > { %v5599_v16 = vpop.f32.mrf.mxu1  ;;  %5814 = vmatmul.mubr.msk.bf16.gmra.mxu1 %vm1675_vm8, %v7441_v7 }
 0x2a6   : > { %v2042_v29 = vadd.f32 %v5599_v16, %v8650_v17  ;;  %5817 = vmatprep.mubr.msk.bf16.mxu1 %vm1675_vm8, %v7458_v36  ;;  %v7810_v60 = vadd.f32 %v7619_v14, %v2021_v37  ;;  %v7815_v22 = vpop.f32.mrf.mxu0  ;;  %v8653_v17 = vld [vmem:[#allocation44_spill] sm:$0xff] }
 0x2a7   : > { %v2033_v34 = vpop.f32.mrf.mxu1 }
 0x2a8   : > { %8651 = vst [vmem:[#allocation37_spill] sm:$0xff] %v7810_v60  ;;  %v2034_v6 = vadd.f32 %v2033_v34, %v8652_v2  ;;  %v7819_v61 = vadd.f32 %v7625_v40, %v2042_v29  ;;  %v7821_v23 = vpop.f32.mrf.mxu0 }
 0x2a9   : > { %v5600_v7 = vpop.f32.mrf.mxu1 }
 0x2aa   : > { %v2045_v36 = vadd.f32 %v5600_v7, %v7588_v13  ;;  %v7825_v14 = vadd.f32 %v7636_v25, %v2034_v6  ;;  %v7827_v16 = vpop.f32.mrf.mxu0  ;;  %v8654_v6 = vld [vmem:[#allocation45_spill] sm:$0xff] }
 0x2ab   : > { %v2036_v37 = vpop.f32.mrf.mxu1 }
 0x2ac   : > { %v2037_v60 = vadd.f32 %v2036_v37, %v8653_v17  ;;  %v7831_v34 = vadd.f32 %v7646_v49, %v2045_v36  ;;  %v7833_v29 = vpop.f32.mrf.mxu0 }
 0x2ad   : > { %v5603_v40 = vpop.f32.mrf.mxu1  ;;  %5818 = vmatmul.mubr.msk.bf16.gmra.mxu1 %vm1675_vm8, %v7623_v4 }
 0x2ae   : > { %v2058_v51 = vadd.f32 %v5603_v40, %v7596_v20  ;;  %v7839_v13 = vadd.f32 %v7652_v58, %v2037_v60  ;;  %v7841_v2 = vpop.f32.mrf.mxu0 }
 0x2af   : > { %v2049_v25 = vpop.f32.mrf.mxu1 }
 0x2b0   : > { %v2050_v7 = vadd.f32 %v2049_v25, %v8654_v6  ;;  %v7845_v37 = vadd.f32 %v7658_v30, %v2058_v51  ;;  %v7847_v36 = vpop.f32.mrf.mxu0 }
 0x2b1   : > { %v5604_v49 = vpop.f32.mrf.mxu1 }
 0x2b2   : > { %v2061_v17 = vadd.f32 %v5604_v49, %v7611_v9  ;;  %v7851_v4 = vadd.f32 %v7669_v12, %v2050_v7  ;;  %v7853_v40 = vpop.f32.mrf.mxu0 }
 0x2b3   : > { %v2052_v20 = vpop.f32.mrf.mxu1 }
 0x2b4   : > { %v2053_v58 = vadd.f32 %v2052_v20, %v7617_v42  ;;  %v7857_v60 = vadd.f32 %v7675_v3, %v2061_v17  ;;  %v7859_v6 = vpop.f32.mrf.mxu0 }
 0x2b5   : > { %v5647_v25 = vpop.f32.mrf.mxu1 }
 0x2b6   : > { %v2610_v30 = vadd.f32 %v5647_v25, %v7644_v39  ;;  %v7863_v51 = vadd.f32 %v7681_v52, %v2053_v58  ;;  %v7865_v49 = vpop.f32.mrf.mxu0 }
 0x2b7   : > { %v2481_v9 = vpop.f32.mrf.mxu1 }
 0x2b8   : > { %v2608_v12 = vadd.f32 %v2481_v9, %v7650_v8  ;;  %v7869_v7 = vadd.f32 %v7687_v32, %v2610_v30  ;;  %v7871_v20 = vpop.f32.mrf.mxu0 }
 0x2b9   : > { %v5648_v42 = vpop.f32.mrf.mxu1 }
 0x2ba   : > { %v2611_v3 = vadd.f32 %v5648_v42, %v7656_v44  ;;  %v7875_v17 = vadd.f32 %v7700_v28, %v2608_v12  ;;  %v7877_v25 = vpop.f32.mrf.mxu0 }
 0x2bb   : > { %v2484_v39 = vpop.f32.mrf.mxu1 }
 0x2bc   : > { %v2609_v52 = vadd.f32 %v2484_v39, %v7667_v56  ;;  %v7881_v58 = vadd.f32 %v7706_v1, %v2611_v3  ;;  %v7883_v9 = vpop.f32.mrf.mxu0 }
 0x2bd   : > { %v5651_v8 = vpop.f32.mrf.mxu1 }
 0x2be   : > { %v2614_v32 = vadd.f32 %v5651_v8, %v7673_v63  ;;  %v7887_v30 = vadd.f32 %v7712_v57, %v2609_v52  ;;  %v7889_v42 = vpop.f32.mrf.mxu0 }
 0x2bf   : > { %v2497_v44 = vpop.f32.mrf.mxu1 }
 0x2c0   : > { %v2612_v28 = vadd.f32 %v2497_v44, %v7679_v27  ;;  %v7893_v12 = vadd.f32 %v7718_v10, %v2614_v32  ;;  %v7895_v39 = vpop.f32.mrf.mxu0 }
 0x2c1   : > { %v5652_v56 = vpop.f32.mrf.mxu1 }
 0x2c2   : > { %v2615_v1 = vadd.f32 %v5652_v56, %v7685_v47  ;;  %v7899_v3 = vadd.f32 %v7728_v46, %v2612_v28  ;;  %v7901_v8 = vpop.f32.mrf.mxu0 }
 0x2c3   : > { %v2500_v63 = vpop.f32.mrf.mxu1 }
 0x2c4   : > { %v2613_v57 = vadd.f32 %v2500_v63, %v7695_v19  ;;  %v7905_v52 = vadd.f32 %v7734_v38, %v2615_v1  ;;  %v7907_v44 = vpop.f32.mrf.mxu0 }
 0x2c5   : > { %v5655_v27 = vpop.f32.mrf.mxu1 }
 0x2c6   : > { %v2618_v10 = vadd.f32 %v5655_v27, %v7704_v55  ;;  %v7911_v32 = vadd.f32 %v7740_v5, %v2613_v57  ;;  %v7913_v56 = vpop.f32.mrf.mxu0 }
 0x2c7   : > { %v2513_v47 = vpop.f32.mrf.mxu1 }
 0x2c8   : > { %v2616_v46 = vadd.f32 %v2513_v47, %v7710_v11  ;;  %v7917_v28 = vadd.f32 %v7746_v33, %v2618_v10  ;;  %v7919_v63 = vpop.f32.mrf.mxu0 }
 0x2c9   : > { %v5656_v19 = vpop.f32.mrf.mxu1 }
 0x2ca   : > { %v2619_v38 = vadd.f32 %v5656_v19, %v7716_v24  ;;  %v7923_v1 = vadd.f32 %v7756_v43, %v2616_v46  ;;  %v7925_v27 = vpop.f32.mrf.mxu0 }
 0x2cb   : > { %v2516_v55 = vpop.f32.mrf.mxu1 }
 0x2cc   : > { %v2617_v5 = vadd.f32 %v2516_v55, %v7726_v35  ;;  %v7929_v57 = vadd.f32 %v7762_v62, %v2619_v38  ;;  %v7931_v47 = vpop.f32.mrf.mxu0 }
 0x2cd   : > { %v5659_v11 = vpop.f32.mrf.mxu1 }
 0x2ce   : > { %v2622_v33 = vadd.f32 %v5659_v11, %v7732_v59  ;;  %v7935_v10 = vadd.f32 %v7768_v18, %v2617_v5  ;;  %v7937_v19 = vpop.f32.mrf.mxu0  ;;  %v8658_v18 = vld [vmem:[#allocation33_spill] sm:$0xff] }
 0x2cf   : > { %v2529_v24 = vpop.f32.mrf.mxu1 }
 0x2d0   : > { %8655 = vst [vmem:[#allocation25_spill] sm:$0xff] %v7935_v10  ;;  %v2620_v43 = vadd.f32 %v2529_v24, %v7738_v21  ;;  %v7941_v46 = vadd.f32 %v7774_v53, %v2622_v33  ;;  %v7943_v55 = vpop.f32.mrf.mxu0  ;;  %v8659_v53 = vld [vmem:[#allocation27_spill] sm:$0xff] }
 0x2d1   : > { %v5660_v35 = vpop.f32.mrf.mxu1  ;;  %8656 = vst [vmem:[#allocation28_spill] sm:$0xff] %v7943_v55 }
 0x2d2   : > { %v2623_v62 = vadd.f32 %v5660_v35, %v7744_v48  ;;  %v7947_v38 = vadd.f32 %v7784_v50, %v2620_v43  ;;  %v7949_v11 = vpop.f32.mrf.mxu0 }
 0x2d3   : > { %v2532_v59 = vpop.f32.mrf.mxu1  ;;  %8657 = vst [vmem:[#allocation24_spill] sm:$0xff] %v7949_v11 }
 0x2d4   : > { %v2621_v5 = vadd.f32 %v2532_v59, %v8658_v18  ;;  %v7953_v10 = vadd.f32 %v7790_v31, %v2623_v62  ;;  %v7955_v24 = vpop.f32.mrf.mxu0  ;;  %v8661_v31 = vld [vmem:[#allocation35_spill] sm:$0xff] }
 0x2d5   : > { %v5663_v21 = vpop.f32.mrf.mxu1 }
 0x2d6   : > { %v2626_v33 = vadd.f32 %v5663_v21, %v8659_v53  ;;  %v7959_v55 = vadd.f32 %v7796_v15, %v2621_v5  ;;  %v7961_v35 = vpop.f32.mrf.mxu0  ;;  %v8663_v15 = vld [vmem:[#allocation29_spill] sm:$0xff] }
 0x2d7   : > { %v2545_v48 = vpop.f32.mrf.mxu1 }
 0x2d8   : > { %8660 = vst [vmem:[#allocation39_spill] sm:$0xff] %v7959_v55  ;;  %v2624_v50 = vadd.f32 %v2545_v48, %v7766_v54  ;;  %v7965_v43 = vadd.f32 %v7802_v45, %v2626_v33  ;;  %v7967_v18 = vpop.f32.mrf.mxu0 }
 0x2d9   : > { %v5664_v59 = vpop.f32.mrf.mxu1 }
 0x2da   : > { %v2627_v62 = vadd.f32 %v5664_v59, %v8661_v31  ;;  %v7971_v11 = vadd.f32 %v7815_v22, %v2624_v50  ;;  %v7973_v53 = vpop.f32.mrf.mxu0 }
 0x2db   : > { %v2548_v21 = vpop.f32.mrf.mxu1  ;;  %8662 = vst [vmem:[#allocation30_spill] sm:$0xff] %v7973_v53 }
 0x2dc   : > { %v2625_v5 = vadd.f32 %v2548_v21, %v8663_v15  ;;  %v7977_v55 = vadd.f32 %v7821_v23, %v2627_v62  ;;  %v7979_v48 = vpop.f32.mrf.mxu0 }
 0x2dd   : > { %v5667_v54 = vpop.f32.mrf.mxu1 }
 0x2de   : > { %v2630_v45 = vadd.f32 %v5667_v54, %v7788_v26  ;;  %v7983_v33 = vadd.f32 %v7827_v16, %v2625_v5  ;;  %v7985_v31 = vpop.f32.mrf.mxu0  ;;  %v8666_v16 = vld [vmem:[#allocation37_spill] sm:$0xff] }
 0x2df   : > { %v2561_v59 = vpop.f32.mrf.mxu1 }
 0x2e0   : > { %8664 = vst [vmem:[#allocation41_spill] sm:$0xff] %v7983_v33  ;;  %v2628_v22 = vadd.f32 %v2561_v59, %v7794_v41  ;;  %v7989_v50 = vadd.f32 %v7833_v29, %v2630_v45  ;;  %v7991_v15 = vpop.f32.mrf.mxu0 }
 0x2e1   : > { %v5668_v21 = vpop.f32.mrf.mxu1 }
 0x2e2   : > { %v2631_v23 = vadd.f32 %v5668_v21, %v7800_v0  ;;  %v7995_v62 = vadd.f32 %v7841_v2, %v2628_v22  ;;  %v7997_v54 = vpop.f32.mrf.mxu0 }
 0x2e3   : > { %v2564_v26 = vpop.f32.mrf.mxu1  ;;  %8665 = vst [vmem:[#allocation31_spill] sm:$0xff] %v7997_v54 }
 0x2e4   : > { %v2629_v5 = vadd.f32 %v2564_v26, %v8666_v16  ;;  %v8001_v33 = vadd.f32 %v7847_v36, %v2631_v23  ;;  %v8003_v59 = vpop.f32.mrf.mxu0 }
 0x2e5   : > { %v5671_v41 = vpop.f32.mrf.mxu1 }
 0x2e6   : > { %v2634_v29 = vadd.f32 %v5671_v41, %v7819_v61  ;;  %v8007_v45 = vadd.f32 %v7853_v40, %v2629_v5  ;;  %v8009_v21 = vpop.f32.mrf.mxu0 }
 0x2e7   : > { %v2577_v0 = vpop.f32.mrf.mxu1 }
 0x2e8   : > { %8667 = vst [vmem:[#allocation43_spill] sm:$0xff] %v8007_v45  ;;  %v2632_v2 = vadd.f32 %v2577_v0, %v7825_v14  ;;  %v8013_v22 = vadd.f32 %v7859_v6, %v2634_v29  ;;  %v8015_v16 = vpop.f32.mrf.mxu0 }
 0x2e9   : > { %v5672_v26 = vpop.f32.mrf.mxu1 }
 0x2ea   : > { %v2635_v36 = vadd.f32 %v5672_v26, %v7831_v34  ;;  %v8019_v23 = vadd.f32 %v7865_v49, %v2632_v2  ;;  %v8021_v41 = vpop.f32.mrf.mxu0 }
 0x2eb   : > { %v2580_v61 = vpop.f32.mrf.mxu1  ;;  %8668 = vst [vmem:[#allocation32_spill] sm:$0xff] %v8021_v41 }
 0x2ec   : > { %v2633_v40 = vadd.f32 %v2580_v61, %v7839_v13  ;;  %v8025_v5 = vadd.f32 %v7871_v20, %v2635_v36  ;;  %v8027_v0 = vpop.f32.mrf.mxu0 }
 0x2ed   : > { %v5675_v14 = vpop.f32.mrf.mxu1 }
 0x2ee   : > { %v2638_v6 = vadd.f32 %v5675_v14, %v7845_v37  ;;  %v8031_v29 = vadd.f32 %v7877_v25, %v2633_v40  ;;  %v8033_v26 = vpop.f32.mrf.mxu0 }
 0x2ef   : > { %v2593_v34 = vpop.f32.mrf.mxu1 }
 0x2f0   : > { %8669 = vst [vmem:[#allocation26_spill] sm:$0xff] %v8031_v29  ;;  %v2636_v49 = vadd.f32 %v2593_v34, %v7851_v4  ;;  %v8037_v2 = vadd.f32 %v7883_v9, %v2638_v6  ;;  %v8039_v61 = vpop.f32.mrf.mxu0 }
 0x2f1   : > { %v5676_v13 = vpop.f32.mrf.mxu1 }
 0x2f2   : > { %v2639_v20 = vadd.f32 %v5676_v13, %v7857_v60  ;;  %v8043_v36 = vadd.f32 %v7889_v42, %v2636_v49  ;;  %v8045_v14 = vpop.f32.mrf.mxu0 }
 0x2f3   : > { %v2596_v37 = vpop.f32.mrf.mxu1  ;;  %8670 = vst [vmem:[#allocation23_spill] sm:$0xff] %v8045_v14 }
 0x2f4   : > { %v2637_v25 = vadd.f32 %v2596_v37, %v7863_v51  ;;  %v8049_v40 = vadd.f32 %v7895_v39, %v2639_v20  ;;  %v8051_v34 = vpop.f32.mrf.mxu0 }
 0x2f5   : > { %v5719_v4 = vpop.f32.mrf.mxu1 }
 0x2f6   : > { %v3046_v9 = vadd.f32 %v5719_v4, %v7869_v7  ;;  %v8055_v6 = vadd.f32 %v7901_v8, %v2637_v25  ;;  %v8057_v13 = vpop.f32.mrf.mxu0 }
 0x2f7   : > { %v2917_v60 = vpop.f32.mrf.mxu1 }
 0x2f8   : > { %8671 = vst [vmem:[#allocation34_spill] sm:$0xff] %v8055_v6  ;;  %v3044_v42 = vadd.f32 %v2917_v60, %v7875_v17  ;;  %v8061_v49 = vadd.f32 %v7907_v44, %v3046_v9  ;;  %v8065_v39 = vpop.f32.mrf.mxu0 }
 0x2f9   : > { %v8063_v51 = vpop.f32.mrf.mxu1 }
 0x2fa   : > { %v8068_v20 = vadd.f32 %v7913_v56, %v3044_v42  ;;  %v8072_v7 = vpop.f32.mrf.mxu0 }
 0x2fb   : > { %v8070_v37 = vpop.f32.mrf.mxu1  ;;  %8672 = vst [vmem:[#allocation36_spill] sm:$0xff] %v8072_v7 }
 0x2fc   : > { %v8074_v25 = vpop.f32.mrf.mxu0 }
 0x2fd   : > { %v5723_v8 = vpop.f32.mrf.mxu1 }
 0x2fe   : > { %v3050_v4 = vadd.f32 %v5723_v8, %v7893_v12  ;;  %v8077_v60 = vpop.f32.mrf.mxu0 }
 0x2ff   : > { %v2933_v17 = vpop.f32.mrf.mxu1 }
 0x300   : > { %v3048_v44 = vadd.f32 %v2933_v17, %v7899_v3  ;;  %v8081_v9 = vadd.f32 %v7931_v47, %v3050_v4  ;;  %v8085_v56 = vpop.f32.mrf.mxu0 }
 0x301   : > { %v8083_v6 = vpop.f32.mrf.mxu1 }
 0x302   : > { %v8088_v42 = vadd.f32 %v7937_v19, %v3048_v44  ;;  %v8092_v29 = vpop.f32.mrf.mxu0 }
 0x303   : > { %v8090_v7 = vpop.f32.mrf.mxu1  ;;  %8673 = vst [vmem:[#allocation38_spill] sm:$0xff] %v8092_v29 }
 0x304   : > { %v8094_v8 = vpop.f32.mrf.mxu0 }
 0x305   : > { %v5727_v12 = vpop.f32.mrf.mxu1 }
 0x306   : > { %v3054_v14 = vadd.f32 %v5727_v12, %v7917_v28  ;;  %v8097_v17 = vpop.f32.mrf.mxu0 }
 0x307   : > { %v2949_v3 = vpop.f32.mrf.mxu1 }
 0x308   : > { %v3052_v47 = vadd.f32 %v2949_v3, %v7923_v1  ;;  %v8101_v4 = vadd.f32 %v7955_v24, %v3054_v14  ;;  %v8103_v19 = vpop.f32.mrf.mxu0 }
 0x309   : > { %v5728_v45 = vpop.f32.mrf.mxu1 }
 0x30a   : > { %v3055_v44 = vadd.f32 %v5728_v45, %v7929_v57  ;;  %v8107_v29 = vadd.f32 %v7961_v35, %v3052_v47  ;;  %v8111_v54 = vpop.f32.mrf.mxu0 }
 0x30b   : > { %v8109_v41 = vpop.f32.mrf.mxu1 }
 0x30c   : > { %v8114_v28 = vadd.f32 %v7967_v18, %v3055_v44  ;;  %v8116_v1 = vpop.f32.mrf.mxu0 }
 0x30d   : > { %v5731_v12 = vpop.f32.mrf.mxu1 }
 0x30e   : > { %8674 = vst [vmem:[#allocation40_spill] sm:$0xff] %v8114_v28  ;;  %v3058_v24 = vadd.f32 %v5731_v12, %v7941_v46  ;;  %v8119_v3 = vpop.f32.mrf.mxu0 }
 0x30f   : > { %v2965_v14 = vpop.f32.mrf.mxu1 }
 0x310   : > { %v3056_v57 = vadd.f32 %v2965_v14, %v7947_v38  ;;  %v8123_v35 = vadd.f32 %v7979_v48, %v3058_v24  ;;  %v8125_v47 = vpop.f32.mrf.mxu0 }
 0x311   : > { %v5732_v45 = vpop.f32.mrf.mxu1 }
 0x312   : > { %v3059_v53 = vadd.f32 %v5732_v45, %v7953_v10  ;;  %v8129_v18 = vadd.f32 %v7985_v31, %v3056_v57  ;;  %v8136_v12 = vpop.f32.mrf.mxu0 }
 0x313   : > { %v8131_v44 = vpop.f32.mrf.mxu1 }
 0x314   : > { %v8134_v46 = vadd.f32 %v7991_v15, %v3059_v53  ;;  %v8143_v10 = vpop.f32.mrf.mxu0 }
 0x315   : > { %v5735_v28 = vpop.f32.mrf.mxu1 }
 0x316   : > { %v3062_v38 = vadd.f32 %v5735_v28, %v7965_v43  ;;  %v8154_v43 = vpop.f32.mrf.mxu0 }
 0x317   : > { %v2981_v48 = vpop.f32.mrf.mxu1 }
 0x318   : > { %v3060_v24 = vadd.f32 %v2981_v48, %v7971_v11  ;;  %v8141_v14 = vadd.f32 %v8003_v59, %v3062_v38 }
 0x319   : > { %v5736_v31 = vpop.f32.mrf.mxu1 }
 0x31a   : > { %v3063_v57 = vadd.f32 %v5736_v31, %v7977_v55  ;;  %v8147_v45 = vadd.f32 %v8009_v21, %v3060_v24  ;;  %v8161_v55 = vpop.f32.mrf.mxu0 }
 0x31b   : > { %v8149_v53 = vpop.f32.mrf.mxu1 }
 0x31c   : > { %v8152_v15 = vadd.f32 %v8015_v16, %v3063_v57 }
 0x31d   : > { %v5739_v28 = vpop.f32.mrf.mxu1 }
 0x31e   : > { %v3066_v11 = vadd.f32 %v5739_v28, %v7989_v50  ;;  %v8172_v50 = vpop.f32.mrf.mxu0 }
 0x31f   : > { %v2997_v59 = vpop.f32.mrf.mxu1 }
 0x320   : > { %v3064_v38 = vadd.f32 %v2997_v59, %v7995_v62  ;;  %v8159_v48 = vadd.f32 %v8027_v0, %v3066_v11 }
 0x321   : > { %v5740_v21 = vpop.f32.mrf.mxu1 }
 0x322   : > { %v3067_v24 = vadd.f32 %v5740_v21, %v8001_v33  ;;  %v8165_v31 = vadd.f32 %v8033_v26, %v3064_v38  ;;  %v8179_v33 = vpop.f32.mrf.mxu0 }
 0x323   : > { %v8167_v16 = vpop.f32.mrf.mxu1 }
 0x324   : > { %v8170_v57 = vadd.f32 %v8039_v61, %v3067_v24 }
 0x325   : > { %v5743_v28 = vpop.f32.mrf.mxu1 }
 0x326   : > { %v3070_v62 = vadd.f32 %v5743_v28, %v8013_v22  ;;  %v8190_v22 = vpop.f32.mrf.mxu0 }
 0x327   : > { %v3013_v0 = vpop.f32.mrf.mxu1 }
 0x328   : > { %v3068_v11 = vadd.f32 %v3013_v0, %v8019_v23  ;;  %v8177_v59 = vadd.f32 %v8051_v34, %v3070_v62 }
 0x329   : > { %v5744_v26 = vpop.f32.mrf.mxu1 }
 0x32a   : > { %v3071_v38 = vadd.f32 %v5744_v26, %v8025_v5  ;;  %v8183_v21 = vadd.f32 %v8057_v13, %v3068_v11  ;;  %v8197_v5 = vpop.f32.mrf.mxu0 }
 0x32b   : > { %v8185_v61 = vpop.f32.mrf.mxu1 }
 0x32c   : > { %v8188_v24 = vadd.f32 %v8065_v39, %v3071_v38  ;;  %v3047_v38 = vadd.f32 %v8063_v51, %v7881_v58  ;;  %v8223_v58 = vld [vmem:[%s8521_s6] ss:$0 sm:$0xff] }
 0x32d   : > { %v5747_v28 = vpop.f32.mrf.mxu1 }
 0x32e   : > { %v3074_v23 = vadd.f32 %v5747_v28, %v8037_v2  ;;  %v3045_v28 = vadd.f32 %v8070_v37, %v7887_v30 }
 0x32f   : > { %v3029_v34 = vpop.f32.mrf.mxu1 }
 0x330   : > { %v3072_v62 = vadd.f32 %v3029_v34, %v8043_v36  ;;  %v8195_v0 = vadd.f32 %v8074_v25, %v3074_v23  ;;  %v8210_v36 = vpop.f32.mrf.mxu0 }
 0x331   : > { %v5748_v13 = vpop.f32.mrf.mxu1 }
 0x332   : > { %v3075_v11 = vadd.f32 %v5748_v13, %v8049_v40  ;;  %v8201_v26 = vadd.f32 %v8077_v60, %v3072_v62  ;;  %v3794_v62 = vadd.f32 %v7919_v63, %v3047_v38  ;;  %v8218_v13 = vpop.f32.mrf.mxu0  ;;  %v3051_v63 = vadd.f32 %v8083_v6, %v7905_v52 }
 0x333   : > { %v8203_v39 = vpop.f32.mrf.mxu1  ;;  %v3049_v38 = vadd.f32 %v8090_v7, %v7911_v32  ;;  %v8675_v7 = vld [vmem:[#allocation28_spill] sm:$0xff] }
 0x334   : > { %v8208_v2 = vadd.f32 %v8085_v56, %v3075_v11 }
 0x335   : > { %v5791_v25 = vpop.f32.mrf.mxu1 }
 0x336   : > { %v4033_v23 = vadd.f32 %v5791_v25, %v8061_v49  ;;  %v3792_v49 = vadd.f32 %v7925_v27, %v3045_v28  ;;  %v8233_v25 = vpop.f32.mrf.mxu0 }
 0x337   : > { %v3904_v40 = vpop.f32.mrf.mxu1 }
 0x338   : > { %v4273_v60 = vadd.f32 %v8094_v8, %v4033_v23  ;;  %v4031_v34 = vadd.f32 %v3904_v40, %v8068_v20  ;;  %v8241_v6 = vpop.f32.mrf.mxu0 }
 0x339   : > { %v5792_v51 = vpop.f32.mrf.mxu1 }
 0x33a   : > { %v4271_v56 = vadd.f32 %v8097_v17, %v4031_v34  ;;  %v4034_v30 = vadd.f32 %v5792_v51, %v3794_v62  ;;  %v4312_v8 = vadd.f32 %v8223_v58, %v4273_v60  ;;  %v3798_v51 = vadd.f32 %v8675_v7, %v3051_v63 }
 0x33b   : > { %v3907_v37 = vpop.f32.mrf.mxu1 }
 0x33c   : > { %v4274_v20 = vadd.f32 %v8103_v19, %v4034_v30  ;;  %v4032_v11 = vadd.f32 %v3907_v37, %v3792_v49  ;;  %v4310_v17 = vadd.f32 %v8223_v58, %v4271_v56  ;;  %v4344_v19 = vmax.f32 %v4312_v8, 0.0  ;;  %v8676_v30 = vld [vmem:[#allocation24_spill] sm:$0xff] }
 0x33d   : > { %v5795_v23 = vpop.f32.mrf.mxu1  ;;  %v3796_v49 = vadd.f32 %v8676_v30, %v3049_v38  ;;  %v8678_v30 = vld [vmem:[#allocation40_spill] sm:$0xff] }
 0x33e   : > { %v4313_v40 = vadd.f32 %v8223_v58, %v4274_v20  ;;  %v4272_v27 = vadd.f32 %v8111_v54, %v4032_v11  ;;  %v4037_v28 = vadd.f32 %v5795_v23, %v8081_v9  ;;  %v4342_v37 = vmax.f32 %v4310_v17, 0.0 }
 0x33f   : > { %v3920_v60 = vpop.f32.mrf.mxu1 }
 0x340   : > { %v4345_v34 = vmax.f32 %v4313_v40, 0.0  ;;  %v4311_v62 = vadd.f32 %v8223_v58, %v4272_v27  ;;  %v4035_v52 = vadd.f32 %v3920_v60, %v8088_v42  ;;  %v4277_v32 = vadd.f32 %v8116_v1, %v4037_v28  ;;  %v8247_v27 = vpop.f32.mrf.mxu0 }
 0x341   : > { %v5796_v56 = vpop.f32.mrf.mxu1 }
 0x342   : > { %v4375_v54 = vpack.c.bf16 %v4345_v34, %v4344_v19  ;;  %v4343_v20 = vmax.f32 %v4311_v62, 0.0  ;;  %v4275_v9 = vadd.f32 %v8119_v3, %v4035_v52  ;;  %v4038_v8 = vadd.f32 %v5796_v56, %v3798_v51  ;;  %v8677_v3 = vld [vmem:[#allocation25_spill] sm:$0xff] }
 0x343   : > { %v3923_v11 = vpop.f32.mrf.mxu1  ;;  %v4316_v42 = vadd.f32 %v8223_v58, %v4277_v32  ;;  %v3053_v60 = vadd.f32 %v8109_v41, %v8677_v3  ;;  %v8262_v32 = vpop.f32.mrf.mxu0 }
 0x344   : > { %v4374_v23 = vpack.c.bf16 %v4343_v20, %v4342_v37  ;;  %v4036_v40 = vadd.f32 %v3923_v11, %v3796_v49  ;;  %v4278_v1 = vadd.f32 %v8125_v47, %v4038_v8  ;;  %v4314_v63 = vadd.f32 %v8223_v58, %v4275_v9  ;;  %v8679_v20 = vld [vmem:[#allocation30_spill] sm:$0xff] }
 0x345   : > { %v5799_v28 = vpop.f32.mrf.mxu1  ;;  %v8269_v11 = vpop.f32.mrf.mxu0 }
 0x346   : > { %v4276_v38 = vadd.f32 %v8136_v12, %v4036_v40  ;;  %v4041_v17 = vadd.f32 %v5799_v28, %v8101_v4  ;;  %5861 = vmatprep.mubr.msk.bf16.mxu1 %vm1675_vm8, %v4374_v23  ;;  %v4317_v19 = vadd.f32 %v8223_v58, %v4278_v1  ;;  %v4348_v12 = vmax.f32 %v4316_v42, 0.0  ;;  %v8680_v42 = vld [vmem:[#allocation39_spill] sm:$0xff] }
 0x347   : > { %v3936_v34 = vpop.f32.mrf.mxu1  ;;  %5862 = vmatmul.mubr.msk.bf16.vlgmr.msra.gmra.mxu1 %vm1675_vm8, %v4375_v54  ;;  %v4346_v51 = vmax.f32 %v4314_v63, 0.0  ;;  %v3800_v54 = vadd.f32 %v8679_v20, %v3053_v60  ;;  %v3057_v1 = vadd.f32 %v8131_v44, %v8680_v42  ;;  %v8281_v44 = vpop.f32.mrf.mxu0 }
 0x348   : > { %v4315_v62 = vadd.f32 %v8223_v58, %v4276_v38  ;;  %v4281_v47 = vadd.f32 %v8143_v10, %v4041_v17  ;;  %v4039_v52 = vadd.f32 %v3936_v34, %v8107_v29  ;;  %v4349_v4 = vmax.f32 %v4317_v19, 0.0 }
 0x349   : > { %v5800_v7 = vpop.f32.mrf.mxu1 }
 0x34a   : > { %v4347_v56 = vmax.f32 %v4315_v62, 0.0  ;;  %v4042_v41 = vadd.f32 %v5800_v7, %v8678_v30  ;;  %v4377_v49 = vpack.c.bf16 %v4349_v4, %v4348_v12  ;;  %v4279_v37 = vadd.f32 %v8154_v43, %v4039_v52  ;;  %v8682_v30 = vld [vmem:[#allocation41_spill] sm:$0xff] }
 0x34b   : > { %v3939_v9 = vpop.f32.mrf.mxu1  ;;  %v4320_v10 = vadd.f32 %v8223_v58, %v4281_v47 }
 0x34c   : > { %v4376_v8 = vpack.c.bf16 %v4347_v56, %v4346_v51  ;;  %v4282_v29 = vadd.f32 %v8161_v55, %v4042_v41  ;;  %v4040_v23 = vadd.f32 %v3939_v9, %v3800_v54  ;;  %v4318_v43 = vadd.f32 %v8223_v58, %v4279_v37 }
 0x34d   : > { %v5803_v40 = vpop.f32.mrf.mxu1  ;;  %v4352_v55 = vmax.f32 %v4320_v10, 0.0  ;;  %v3061_v41 = vadd.f32 %v8149_v53, %v8682_v30  ;;  %v8685_v30 = vld [vmem:[#allocation23_spill] sm:$0xff] }
 0x34e   : > { %v4321_v28 = vadd.f32 %v8223_v58, %v4282_v29  ;;  %v4045_v63 = vadd.f32 %v5803_v40, %v8123_v35  ;;  %5865 = vmatprep.mubr.msk.bf16.mxu1 %vm1675_vm8, %v4376_v8  ;;  %v4280_v38 = vadd.f32 %v8172_v50, %v4040_v23  ;;  %v8681_v50 = vld [vmem:[#allocation31_spill] sm:$0xff]  ;;  %v4350_v4 = vmax.f32 %v4318_v43, 0.0 }
 0x34f   : > { %v3952_v17 = vpop.f32.mrf.mxu1  ;;  %5866 = vmatmul.mubr.msk.bf16.gmra.mxu1 %vm1675_vm8, %v4377_v49  ;;  %v3804_v12 = vadd.f32 %v8681_v50, %v3057_v1  ;;  %v8291_v49 = vpop.f32.mrf.mxu0  ;;  %v8683_v1 = vld [vmem:[#allocation32_spill] sm:$0xff] }
 0x350   : > { %v4353_v3 = vmax.f32 %v4321_v28, 0.0  ;;  %v4285_v60 = vadd.f32 %v8179_v33, %v4045_v63  ;;  %v4043_v19 = vadd.f32 %v3952_v17, %v8129_v18  ;;  %v4319_v34 = vadd.f32 %v8223_v58, %v4280_v38 }
 0x351   : > { %v5804_v35 = vpop.f32.mrf.mxu1  ;;  %v5851_v23 = vpop.f32.mrf.mxu0  ;;  %v3808_v28 = vadd.f32 %v8683_v1, %v3061_v41 }
 0x352   : > { %v4379_v62 = vpack.c.bf16 %v4353_v3, %v4352_v55  ;;  %v4283_v47 = vadd.f32 %v8190_v22, %v4043_v19  ;;  %v4046_v52 = vadd.f32 %v5804_v35, %v8134_v46  ;;  %v4351_v7 = vmax.f32 %v4319_v34, 0.0 }
 0x353   : > { %v3955_v51 = vpop.f32.mrf.mxu1  ;;  %v4324_v56 = vadd.f32 %v8223_v58, %v4285_v60  ;;  %v4240_v60 = vpop.f32.mrf.mxu0 }
 0x354   : > { %v4286_v33 = vadd.f32 %v8197_v5, %v4046_v52  ;;  %v4044_v18 = vadd.f32 %v3955_v51, %v3804_v12  ;;  %v4378_v37 = vpack.c.bf16 %v4351_v7, %v4350_v4  ;;  %v4322_v22 = vadd.f32 %v8223_v58, %v4283_v47 }
 0x355   : > { %v5807_v20 = vpop.f32.mrf.mxu1  ;;  %v4356_v5 = vmax.f32 %v4324_v56, 0.0  ;;  %v5852_v4 = vpop.f32.mrf.mxu0 }
 0x356   : > { %v4325_v46 = vadd.f32 %v8223_v58, %v4286_v33  ;;  %v4284_v54 = vadd.f32 %v8210_v36, %v4044_v18  ;;  %v4049_v9 = vadd.f32 %v5807_v20, %v8141_v14  ;;  %5869 = vmatprep.mubr.msk.bf16.mxu1 %vm1675_vm8, %v4378_v37  ;;  %v4354_v36 = vmax.f32 %v4322_v22, 0.0 }
 0x357   : > { %v3968_v8 = vpop.f32.mrf.mxu1  ;;  %5870 = vmatmul.mubr.msk.bf16.gmra.mxu1 %vm1675_vm8, %v4379_v62  ;;  %v4243_v22 = vpop.f32.mrf.mxu0 }
 0x358   : > { %v4357_v10 = vmax.f32 %v4325_v46, 0.0  ;;  %v4323_v29 = vadd.f32 %v8223_v58, %v4284_v54  ;;  %v4047_v53 = vadd.f32 %v3968_v8, %v8147_v45  ;;  %v4289_v40 = vadd.f32 %v8218_v13, %v4049_v9  ;;  %v8686_v9 = vld [vmem:[#allocation26_spill] sm:$0xff] }
 0x359   : > { %v5808_v42 = vpop.f32.mrf.mxu1  ;;  %v3069_v8 = vadd.f32 %v8185_v61, %v8686_v9  ;;  %v5855_v1 = vpop.f32.mrf.mxu0 }
 0x35a   : > { %v4381_v63 = vpack.c.bf16 %v4357_v10, %v4356_v5  ;;  %v4355_v14 = vmax.f32 %v4323_v29, 0.0  ;;  %v4287_v43 = vadd.f32 %v8233_v25, %v4047_v53  ;;  %v4050_v38 = vadd.f32 %v5808_v42, %v8152_v15  ;;  %v8684_v25 = vld [vmem:[#allocation43_spill] sm:$0xff] }
 0x35b   : > { %v3971_v17 = vpop.f32.mrf.mxu1  ;;  %v4328_v45 = vadd.f32 %v8223_v58, %v4289_v40  ;;  %v3065_v15 = vadd.f32 %v8167_v16, %v8684_v25 }
 0x35c   : > { %v4380_v55 = vpack.c.bf16 %v4355_v14, %v4354_v36  ;;  %v4048_v3 = vadd.f32 %v3971_v17, %v3808_v28  ;;  %v4290_v19 = vadd.f32 %v8241_v6, %v4050_v38  ;;  %v4326_v13 = vadd.f32 %v8223_v58, %v4287_v43  ;;  %v8687_v14 = vld [vmem:[#allocation36_spill] sm:$0xff] }
 0x35d   : > { %v5811_v34 = vpop.f32.mrf.mxu1  ;;  %v3812_v41 = vadd.f32 %v8685_v30, %v3065_v15  ;;  %v3816_v43 = vadd.f32 %v8687_v14, %v3069_v8 }
 0x35e   : > { %v4288_v35 = vadd.f32 %v8247_v27, %v4048_v3  ;;  %v4053_v62 = vadd.f32 %v5811_v34, %v8159_v48  ;;  %5873 = vmatprep.mubr.msk.bf16.mxu1 %vm1675_vm8, %v4380_v55  ;;  %v4329_v47 = vadd.f32 %v8223_v58, %v4290_v19  ;;  %v4360_v27 = vmax.f32 %v4328_v45, 0.0  ;;  %v4256_v19 = vpop.f32.mrf.mxu0 }
 0x35f   : > { %v3984_v52 = vpop.f32.mrf.mxu1  ;;  %5874 = vmatmul.mubr.msk.bf16.gmra.mxu1 %vm1675_vm8, %v4381_v63  ;;  %v4358_v51 = vmax.f32 %v4326_v13, 0.0 }
 0x360   : > { %v4327_v50 = vadd.f32 %v8223_v58, %v4288_v35  ;;  %v4293_v12 = vadd.f32 %v8262_v32, %v4053_v62  ;;  %v4051_v6 = vadd.f32 %v3984_v52, %v8165_v31  ;;  %v4361_v7 = vmax.f32 %v4329_v47, 0.0 }
 0x361   : > { %v5812_v48 = vpop.f32.mrf.mxu1 }
 0x362   : > { %v4359_v56 = vmax.f32 %v4327_v50, 0.0  ;;  %v4054_v33 = vadd.f32 %v5812_v48, %v8170_v57  ;;  %v4383_v16 = vpack.c.bf16 %v4361_v7, %v4360_v27  ;;  %v4291_v18 = vadd.f32 %v8269_v11, %v4051_v6 }
 0x363   : > { %v3987_v37 = vpop.f32.mrf.mxu1  ;;  %v4332_v32 = vadd.f32 %v8223_v58, %v4293_v12 }
 0x364   : > { %v4382_v20 = vpack.c.bf16 %v4359_v56, %v4358_v51  ;;  %v4294_v31 = vadd.f32 %v8281_v44, %v4054_v33  ;;  %v4052_v46 = vadd.f32 %v3987_v37, %v3812_v41  ;;  %v4330_v11 = vadd.f32 %v8223_v58, %v4291_v18 }
 0x365   : > { %v5815_v54 = vpop.f32.mrf.mxu1  ;;  %v4364_v53 = vmax.f32 %v4332_v32, 0.0 }
 0x366   : > { %v4333_v5 = vadd.f32 %v8223_v58, %v4294_v31  ;;  %v4057_v57 = vadd.f32 %v5815_v54, %v8177_v59  ;;  %5877 = vmatprep.mubr.msk.bf16.mxu1 %vm1675_vm8, %v4382_v20  ;;  %v4292_v10 = vadd.f32 %v8291_v49, %v4052_v46  ;;  %v4362_v38 = vmax.f32 %v4330_v11, 0.0 }
 0x367   : > { %v4000_v29 = vpop.f32.mrf.mxu1  ;;  %5878 = vmatmul.mubr.msk.bf16.gmra.mxu1 %vm1675_vm8, %v4383_v16 }
 0x368   : > { %v4365_v40 = vmax.f32 %v4333_v5, 0.0  ;;  %v4297_v44 = vadd.f32 %v5851_v23, %v4057_v57  ;;  %v4055_v42 = vadd.f32 %v4000_v29, %v8183_v21  ;;  %v4331_v61 = vadd.f32 %v8223_v58, %v4292_v10  ;;  %v8688_v21 = vld [vmem:[#allocation34_spill] sm:$0xff]  ;;  %v8358_v5 = vld [vmem:[%s8523_s8] ss:$0 sm:$0xff]  ;;  %v4394_v10 = vld [vmem:[%s6463_s20] sm:$0xff] }
 0x369   : > { %v5816_v28 = vpop.f32.mrf.mxu1  ;;  %v3073_v45 = vadd.f32 %v8203_v39, %v8688_v21  ;;  %v5856_v39 = vpop.f32.mrf.mxu0 }
 0x36a   : > { %v4385_v36 = vpack.c.bf16 %v4365_v40, %v4364_v53  ;;  %v4295_v59 = vadd.f32 %v4240_v60, %v4055_v42  ;;  %v4058_v63 = vadd.f32 %v5816_v28, %v8188_v24  ;;  %v4363_v49 = vmax.f32 %v4331_v61, 0.0 }
 0x36b   : > { %v4003_v17 = vpop.f32.mrf.mxu1  ;;  %v4336_v55 = vadd.f32 %v8223_v58, %v4297_v44  ;;  %v4259_v30 = vpop.f32.mrf.mxu0  ;;  %v4397_v44 = vld [vmem:[%s6463_s20 + $0x18] sm:$0xff] }
 0x36c   : > { %v4298_v23 = vadd.f32 %v5852_v4, %v4058_v63  ;;  %v4056_v3 = vadd.f32 %v4003_v17, %v3816_v43  ;;  %v4384_v34 = vpack.c.bf16 %v4363_v49, %v4362_v38  ;;  %v4334_v35 = vadd.f32 %v8223_v58, %v4295_v59  ;;  %v8689_v4 = vld [vmem:[#allocation38_spill] sm:$0xff]  ;;  %v4400_v38 = vld [vmem:[%s6463_s20 + $0x30] sm:$0xff] }
 0x36d   : > { %v5819_v13 = vpop.f32.mrf.mxu1  ;;  %v4368_v15 = vmax.f32 %v4336_v55, 0.0  ;;  %v3820_v27 = vadd.f32 %v8689_v4, %v3073_v45 }
 0x36e   : > { %v4337_v60 = vadd.f32 %v8223_v58, %v4298_v23  ;;  %v4296_v24 = vadd.f32 %v4243_v22, %v4056_v3  ;;  %v4061_v62 = vadd.f32 %v5819_v13, %v8195_v0  ;;  %5881 = vmatprep.mubr.msk.bf16.mxu1 %vm1675_vm8, %v4384_v34  ;;  %v4366_v7 = vmax.f32 %v4334_v35, 0.0  ;;  %v4398_v3 = vld [vmem:[%s6463_s20 + $0x20] sm:$0xff]  ;;  %v4401_v13 = vld [vmem:[%s6463_s20 + $0x38] sm:$0xff] }
 0x36f   : > { %v4016_v25 = vpop.f32.mrf.mxu1  ;;  %5882 = vmatmul.mubr.msk.bf16.gmra.mxu1 %vm1675_vm8, %v4385_v36  ;;  %v4395_v36 = vld [vmem:[%s6463_s20 + $0x8] sm:$0xff] }
 0x370   : > { %v4369_v47 = vmax.f32 %v4337_v60, 0.0  ;;  %v4335_v52 = vadd.f32 %v8223_v58, %v4296_v24  ;;  %v4059_v50 = vadd.f32 %v4016_v25, %v8201_v26  ;;  %v4301_v12 = vadd.f32 %v5855_v1, %v4061_v62  ;;  %v4399_v25 = vld [vmem:[%s6463_s20 + $0x28] sm:$0xff] }
 0x371   : > { %v5820_v6 = vpop.f32.mrf.mxu1 }
 0x372   : > { %v4387_v48 = vpack.c.bf16 %v4369_v47, %v4368_v15  ;;  %v4367_v51 = vmax.f32 %v4335_v52, 0.0  ;;  %v4299_v0 = vadd.f32 %v4256_v19, %v4059_v50  ;;  %v4062_v56 = vadd.f32 %v5820_v6, %v8208_v2  ;;  %v4404_v6 = vld [vmem:[%s6463_s20 + $0x50] sm:$0xff] }
 0x373   : > { %v4019_v33 = vpop.f32.mrf.mxu1  ;;  %v4340_v41 = vadd.f32 %v8223_v58, %v4301_v12 }
 0x374   : > { %v4386_v16 = vpack.c.bf16 %v4367_v51, %v4366_v7  ;;  %v4060_v18 = vadd.f32 %v4019_v33, %v3820_v27  ;;  %v4302_v26 = vadd.f32 %v5856_v39, %v4062_v56  ;;  %v4338_v37 = vadd.f32 %v8223_v58, %v4299_v0  ;;  %v4405_v33 = vld [vmem:[%s6463_s20 + $0x58] sm:$0xff] }
 0x375   : > { %v4372_v2 = vmax.f32 %v4340_v41, 0.0 }
 0x376   : > { %v4300_v20 = vadd.f32 %v4259_v30, %v4060_v18  ;;  %5885 = vmatprep.mubr.msk.bf16.mxu1 %vm1675_vm8, %v4386_v16  ;;  %v4341_v32 = vadd.f32 %v8223_v58, %v4302_v26  ;;  %v4370_v46 = vmax.f32 %v4338_v37, 0.0  ;;  %v4403_v26 = vld [vmem:[%s6463_s20 + $0x48] sm:$0xff] }
 0x377   : > { %5886 = vmatmul.mubr.msk.bf16.gmra.mxu1 %vm1675_vm8, %v4387_v48  ;;  %v4402_v48 = vld [vmem:[%s6463_s20 + $0x40] sm:$0xff] }
 0x378   : > { %v4339_v31 = vadd.f32 %v8223_v58, %v4300_v20  ;;  %v4373_v22 = vmax.f32 %v4341_v32, 0.0  ;;  %v4396_v58 = vld [vmem:[%s6463_s20 + $0x10] sm:$0xff] }
 0x37a   : > { %v4371_v54 = vmax.f32 %v4339_v31, 0.0  ;;  %v4389_v9 = vpack.c.bf16 %v4373_v22, %v4372_v2  ;;  %v4408_v2 = vld [vmem:[%s6463_s20 + $0x70] sm:$0xff] }
 0x37c   : > { %v4388_v8 = vpack.c.bf16 %v4371_v54, %v4370_v46 }
 0x37e   : > { %5889 = vmatprep.mubr.msk.bf16.mxu1 %vm1675_vm8, %v4388_v8  ;;  %v4406_v8 = vld [vmem:[%s6463_s20 + $0x60] sm:$0xff] }
 0x37f   : > { %5890 = vmatmul.mubr.msk.bf16.gmra.mxu1 %vm1675_vm8, %v4389_v9 }
 0x407   : > { %v5863_v57 = vpop.f32.mrf.mxu1 }
 0x408   : > { %v4536_v11 = vadd.f32 %v5863_v57, %v8358_v5 }
 0x409   : > { %v4527_v29 = vpop.f32.mrf.mxu1 }
 0x40a   : > { %v4656_v53 = vadd.f32 %v4536_v11, %v4396_v58  ;;  %v4528_v40 = vadd.f32 %v8358_v5, %v4527_v29  ;;  %v4409_v29 = vld [vmem:[%s6463_s20 + $0x78] sm:$0xff] }
 0x40b   : > { %v5864_v42 = vpop.f32.mrf.mxu1 }
 0x40c   : > { %v4688_v1 = vmax.f32 %v4656_v53, 0.0  ;;  %v4654_v61 = vadd.f32 %v4528_v40, %v4394_v10  ;;  %v4539_v28 = vadd.f32 %v5864_v42, %v8358_v5 }
 0x40d   : > { %v4530_v59 = vpop.f32.mrf.mxu1 }
 0x40e   : > { %4720 = vst [vmem:[%s8369_s18 + $0x10] sm:$0xff] %v4688_v1  ;;  %v4686_v63 = vmax.f32 %v4654_v61, 0.0  ;;  %v4657_v14 = vadd.f32 %v4539_v28, %v4397_v44  ;;  %v4531_v43 = vadd.f32 %v8358_v5, %v4530_v59  ;;  %v4407_v1 = vld [vmem:[%s6463_s20 + $0x68] sm:$0xff] }
 0x40f   : > { %v5867_v49 = vpop.f32.mrf.mxu1 }
 0x410   : > { %4718 = vst [vmem:[%s8369_s18] sm:$0xff] %v4686_v63  ;;  %v4689_v17 = vmax.f32 %v4657_v14, 0.0  ;;  %v4655_v55 = vadd.f32 %v4531_v43, %v4395_v36  ;;  %v4552_v23 = vadd.f32 %v5867_v49, %v8358_v5  ;;  %v4412_v63 = vld [vmem:[%s6463_s20 + $0x90] sm:$0xff] }
 0x411   : > { %v4543_v21 = vpop.f32.mrf.mxu1 }
 0x412   : > { %4721 = vst [vmem:[%s8369_s18 + $0x18] sm:$0xff] %v4689_v17  ;;  %v4687_v45 = vmax.f32 %v4655_v55, 0.0  ;;  %v4660_v19 = vadd.f32 %v4552_v23, %v4400_v38  ;;  %v4544_v34 = vadd.f32 %v8358_v5, %v4543_v21  ;;  %v4410_v17 = vld [vmem:[%s6463_s20 + $0x80] sm:$0xff] }
 0x413   : > { %v5868_v35 = vpop.f32.mrf.mxu1 }
 0x414   : > { %4719 = vst [vmem:[%s8369_s18 + $0x8] sm:$0xff] %v4687_v45  ;;  %v4692_v60 = vmax.f32 %v4660_v19, 0.0  ;;  %v4658_v24 = vadd.f32 %v4544_v34, %v4398_v3  ;;  %v4555_v62 = vadd.f32 %v5868_v35, %v8358_v5  ;;  %v4413_v45 = vld [vmem:[%s6463_s20 + $0x98] sm:$0xff] }
 0x415   : > { %v4546_v15 = vpop.f32.mrf.mxu1 }
 0x416   : > { %4724 = vst [vmem:[%s8369_s18 + $0x30] sm:$0xff] %v4692_v60  ;;  %v4690_v47 = vmax.f32 %v4658_v24, 0.0  ;;  %v4661_v52 = vadd.f32 %v4555_v62, %v4401_v13  ;;  %v4547_v50 = vadd.f32 %v8358_v5, %v4546_v15  ;;  %v4411_v60 = vld [vmem:[%s6463_s20 + $0x88] sm:$0xff] }
 0x417   : > { %v5871_v4 = vpop.f32.mrf.mxu1 }
 0x418   : > { %4722 = vst [vmem:[%s8369_s18 + $0x20] sm:$0xff] %v4690_v47  ;;  %v4693_v39 = vmax.f32 %v4661_v52, 0.0  ;;  %v4659_v12 = vadd.f32 %v4547_v50, %v4399_v25  ;;  %v4568_v27 = vadd.f32 %v5871_v4, %v8358_v5  ;;  %v4416_v47 = vld [vmem:[%s6463_s20 + $0xb0] sm:$0xff] }
 0x419   : > { %v4559_v51 = vpop.f32.mrf.mxu1 }
 0x41a   : > { %4725 = vst [vmem:[%s8369_s18 + $0x38] sm:$0xff] %v4693_v39  ;;  %v4691_v7 = vmax.f32 %v4659_v12, 0.0  ;;  %v4664_v0 = vadd.f32 %v4568_v27, %v4404_v6  ;;  %v4560_v56 = vadd.f32 %v8358_v5, %v4559_v51  ;;  %v4414_v6 = vld [vmem:[%s6463_s20 + $0xa0] sm:$0xff]  ;;  %v4417_v51 = vld [vmem:[%s6463_s20 + $0xb8] sm:$0xff] }
 0x41b   : > { %v5872_v16 = vpop.f32.mrf.mxu1 }
 0x41c   : > { %4723 = vst [vmem:[%s8369_s18 + $0x28] sm:$0xff] %v4691_v7  ;;  %v4696_v18 = vmax.f32 %v4664_v0, 0.0  ;;  %v4662_v30 = vadd.f32 %v4560_v56, %v4402_v48  ;;  %v4571_v41 = vadd.f32 %v5872_v16, %v8358_v5 }
 0x41d   : > { %v4562_v37 = vpop.f32.mrf.mxu1 }
 0x41e   : > { %4728 = vst [vmem:[%s8369_s18 + $0x50] sm:$0xff] %v4696_v18  ;;  %v4694_v20 = vmax.f32 %v4662_v30, 0.0  ;;  %v4665_v32 = vadd.f32 %v4571_v41, %v4405_v33  ;;  %v4563_v31 = vadd.f32 %v8358_v5, %v4562_v37  ;;  %v4415_v18 = vld [vmem:[%s6463_s20 + $0xa8] sm:$0xff] }
 0x41f   : > { %v5875_v22 = vpop.f32.mrf.mxu1 }
 0x420   : > { %4726 = vst [vmem:[%s8369_s18 + $0x40] sm:$0xff] %v4694_v20  ;;  %v4697_v46 = vmax.f32 %v4665_v32, 0.0  ;;  %v4663_v54 = vadd.f32 %v4563_v31, %v4403_v26  ;;  %v4584_v9 = vadd.f32 %v5875_v22, %v8358_v5  ;;  %v4420_v20 = vld [vmem:[%s6463_s20 + $0xd0] sm:$0xff] }
 0x421   : > { %v4575_v58 = vpop.f32.mrf.mxu1 }
 0x422   : > { %4729 = vst [vmem:[%s8369_s18 + $0x58] sm:$0xff] %v4697_v46  ;;  %v4695_v57 = vmax.f32 %v4663_v54, 0.0  ;;  %v4668_v11 = vadd.f32 %v4584_v9, %v4408_v2  ;;  %v4576_v10 = vadd.f32 %v8358_v5, %v4575_v58  ;;  %v4418_v46 = vld [vmem:[%s6463_s20 + $0xc0] sm:$0xff] }
 0x423   : > { %v5876_v53 = vpop.f32.mrf.mxu1 }
 0x424   : > { %4727 = vst [vmem:[%s8369_s18 + $0x48] sm:$0xff] %v4695_v57  ;;  %v4700_v40 = vmax.f32 %v4668_v11, 0.0  ;;  %v4666_v44 = vadd.f32 %v4576_v10, %v4406_v8  ;;  %v4587_v42 = vadd.f32 %v5876_v53, %v8358_v5  ;;  %v4421_v57 = vld [vmem:[%s6463_s20 + $0xd8] sm:$0xff] }
 0x425   : > { %v4578_v61 = vpop.f32.mrf.mxu1 }
 0x426   : > { %4732 = vst [vmem:[%s8369_s18 + $0x70] sm:$0xff] %v4700_v40  ;;  %v4698_v28 = vmax.f32 %v4666_v44, 0.0  ;;  %v4669_v36 = vadd.f32 %v4587_v42, %v4409_v29  ;;  %v4579_v59 = vadd.f32 %v8358_v5, %v4578_v61  ;;  %v4419_v40 = vld [vmem:[%s6463_s20 + $0xc8] sm:$0xff] }
 0x427   : > { %v5879_v14 = vpop.f32.mrf.mxu1 }
 0x428   : > { %4730 = vst [vmem:[%s8369_s18 + $0x60] sm:$0xff] %v4698_v28  ;;  %v4701_v43 = vmax.f32 %v4669_v36, 0.0  ;;  %v4667_v38 = vadd.f32 %v4579_v59, %v4407_v1  ;;  %v4600_v49 = vadd.f32 %v5879_v14, %v8358_v5  ;;  %v4424_v28 = vld [vmem:[%s6463_s20 + $0xf0] sm:$0xff] }
 0x429   : > { %v4591_v55 = vpop.f32.mrf.mxu1 }
 0x42a   : > { %4733 = vst [vmem:[%s8369_s18 + $0x78] sm:$0xff] %v4701_v43  ;;  %v4699_v23 = vmax.f32 %v4667_v38, 0.0  ;;  %v4672_v3 = vadd.f32 %v4600_v49, %v4412_v63  ;;  %v4592_v21 = vadd.f32 %v8358_v5, %v4591_v55  ;;  %v4422_v43 = vld [vmem:[%s6463_s20 + $0xe0] sm:$0xff] }
 0x42b   : > { %v5880_v19 = vpop.f32.mrf.mxu1 }
 0x42c   : > { %4731 = vst [vmem:[%s8369_s18 + $0x68] sm:$0xff] %v4699_v23  ;;  %v4704_v34 = vmax.f32 %v4672_v3, 0.0  ;;  %v4670_v13 = vadd.f32 %v4592_v21, %v4410_v17  ;;  %v4603_v35 = vadd.f32 %v5880_v19, %v8358_v5  ;;  %v4425_v23 = vld [vmem:[%s6463_s20 + $0xf8] sm:$0xff] }
 0x42d   : > { %v4594_v24 = vpop.f32.mrf.mxu1 }
 0x42e   : > { %4736 = vst [vmem:[%s8369_s18 + $0x90] sm:$0xff] %v4704_v34  ;;  %v4702_v62 = vmax.f32 %v4670_v13, 0.0  ;;  %v4673_v25 = vadd.f32 %v4603_v35, %v4413_v45  ;;  %v4595_v15 = vadd.f32 %v8358_v5, %v4594_v24  ;;  %v4423_v34 = vld [vmem:[%s6463_s20 + $0xe8] sm:$0xff]  ;;  %s4751_s20 = scalar_lea.sflag [#allocation5], %s6457_s14 }
 0x42f   : > { %v5883_v52 = vpop.f32.mrf.mxu1 }
 0x430   : > { %4734 = vst [vmem:[%s8369_s18 + $0x80] sm:$0xff] %v4702_v62  ;;  %v4705_v50 = vmax.f32 %v4673_v25, 0.0  ;;  %v4671_v39 = vadd.f32 %v4595_v15, %v4411_v60  ;;  %v4616_v12 = vadd.f32 %v5883_v52, %v8358_v5 }
 0x431   : > { %v4607_v4 = vpop.f32.mrf.mxu1 }
 0x432   : > { %4737 = vst [vmem:[%s8369_s18 + $0x98] sm:$0xff] %v4705_v50  ;;  %v4703_v27 = vmax.f32 %v4671_v39, 0.0  ;;  %v4676_v7 = vadd.f32 %v4616_v12, %v4416_v47  ;;  %v4608_v48 = vadd.f32 %v8358_v5, %v4607_v4 }
 0x433   : > { %v5884_v0 = vpop.f32.mrf.mxu1 }
 0x434   : > { %4735 = vst [vmem:[%s8369_s18 + $0x88] sm:$0xff] %v4703_v27  ;;  %v4708_v56 = vmax.f32 %v4676_v7, 0.0  ;;  %v4674_v33 = vadd.f32 %v4608_v48, %v4414_v6  ;;  %v4619_v16 = vadd.f32 %v5884_v0, %v8358_v5 }
 0x435   : > { %v4610_v30 = vpop.f32.mrf.mxu1 }
 0x436   : > { %4740 = vst [vmem:[%s8369_s18 + $0xb0] sm:$0xff] %v4708_v56  ;;  %v4706_v41 = vmax.f32 %v4674_v33, 0.0  ;;  %v4677_v26 = vadd.f32 %v4619_v16, %v4417_v51  ;;  %v4611_v37 = vadd.f32 %v8358_v5, %v4610_v30 }
 0x437   : > { %v5887_v32 = vpop.f32.mrf.mxu1 }
 0x438   : > { %4738 = vst [vmem:[%s8369_s18 + $0xa0] sm:$0xff] %v4706_v41  ;;  %v4709_v31 = vmax.f32 %v4677_v26, 0.0  ;;  %v4675_v2 = vadd.f32 %v4611_v37, %v4415_v18  ;;  %v4632_v22 = vadd.f32 %v5887_v32, %v8358_v5 }
 0x439   : > { %v4623_v54 = vpop.f32.mrf.mxu1 }
 0x43a   : > { %4741 = vst [vmem:[%s8369_s18 + $0xb8] sm:$0xff] %v4709_v31  ;;  %v4707_v9 = vmax.f32 %v4675_v2, 0.0  ;;  %v4680_v8 = vadd.f32 %v4632_v22, %v4420_v20  ;;  %v4624_v58 = vadd.f32 %v8358_v5, %v4623_v54 }
 0x43b   : > { %v5888_v11 = vpop.f32.mrf.mxu1 }
 0x43c   : > { %4739 = vst [vmem:[%s8369_s18 + $0xa8] sm:$0xff] %v4707_v9  ;;  %v4712_v10 = vmax.f32 %v4680_v8, 0.0  ;;  %v4678_v29 = vadd.f32 %v4624_v58, %v4418_v46  ;;  %v4635_v53 = vadd.f32 %v5888_v11, %v8358_v5 }
 0x43d   : > { %v4626_v44 = vpop.f32.mrf.mxu1 }
 0x43e   : > { %4744 = vst [vmem:[%s8369_s18 + $0xd0] sm:$0xff] %v4712_v10  ;;  %v4710_v42 = vmax.f32 %v4678_v29, 0.0  ;;  %v4681_v1 = vadd.f32 %v4635_v53, %v4421_v57  ;;  %v4627_v61 = vadd.f32 %v8358_v5, %v4626_v44 }
 0x43f   : > { %v5891_v36 = vpop.f32.mrf.mxu1 }
 0x440   : > { %4742 = vst [vmem:[%s8369_s18 + $0xc0] sm:$0xff] %v4710_v42  ;;  %v4713_v59 = vmax.f32 %v4681_v1, 0.0  ;;  %v4679_v63 = vadd.f32 %v4627_v61, %v4419_v40  ;;  %v4648_v14 = vadd.f32 %v5891_v36, %v8358_v5 }
 0x441   : > { %v4639_v38 = vpop.f32.mrf.mxu1 }
 0x442   : > { %4745 = vst [vmem:[%s8369_s18 + $0xd8] sm:$0xff] %v4713_v59  ;;  %v4711_v49 = vmax.f32 %v4679_v63, 0.0  ;;  %v4684_v17 = vadd.f32 %v4648_v14, %v4424_v28  ;;  %v4640_v55 = vadd.f32 %v8358_v5, %v4639_v38 }
 0x443   : > { %v5892_v3 = vpop.f32.mrf.mxu1 }
 0x444   : > { %4743 = vst [vmem:[%s8369_s18 + $0xc8] sm:$0xff] %v4711_v49  ;;  %v4716_v21 = vmax.f32 %v4684_v17, 0.0  ;;  %v4682_v45 = vadd.f32 %v4640_v55, %v4422_v43  ;;  %v4651_v19 = vadd.f32 %v5892_v3, %v8358_v5 }
 0x445   : > { %v4642_v13 = vpop.f32.mrf.mxu1 }
 0x446   : > { %4748 = vst [vmem:[%s8369_s18 + $0xf0] sm:$0xff] %v4716_v21  ;;  %v4714_v35 = vmax.f32 %v4682_v45, 0.0  ;;  %v4685_v60 = vadd.f32 %v4651_v19, %v4425_v23  ;;  %v4643_v24 = vadd.f32 %v8358_v5, %v4642_v13 }
 0x448   : > { %4746 = vst [vmem:[%s8369_s18 + $0xe0] sm:$0xff] %v4714_v35  ;;  %v4717_v62 = vmax.f32 %v4685_v60, 0.0  ;;  %v4683_v25 = vadd.f32 %v4643_v24, %v4423_v34 }
 0x44a   : > { %4749 = vst [vmem:[%s8369_s18 + $0xf8] sm:$0xff] %v4717_v62  ;;  %v4715_v15 = vmax.f32 %v4683_v25, 0.0 }
 0x44c   : > { %4747 = vst [vmem:[%s8369_s18 + $0xe8] sm:$0xff] %v4715_v15 }
 0x44d   : > { %6148 = shalt.err (!%p6145_p0)
}
 0x44e   : > { %s6149_s1 = scalar_lea.hbm %s8463_s17, 4096  ;;  %s6153_s23 = scalar_lea.hbm %s8690_s15, 8192 }
 0x44f   : > { %p6150_p3 = scmp.ne.s32.totalorder %s8463_s17, %s6149_s1  ;;  %p6154_p12 = scmp.lt.s32.totalorder %s8463_s17, %s8690_s15 }
 0x450   : > { %p6155_p4 = scmp.lt.s32.totalorder %s6153_s23, %s6149_s1 }
 0x451   : > { %p6151_p8 = pnand %p6150_p3, %p8691_p5 }
 0x452   : > { %p6156_p6 = por %p6155_p4, %p6154_p12 }
 0x453   : > { %p6152_p13 = pneg %p6151_p8 }
 0x455   : > { %p6157_p7 = pnand %p6156_p6, %p6152_p13 }
 0x457   : > { %6160 = shalt.err (!%p6157_p7)
}
 0x458   : > { %s6234_s25 = smov 128   ;;  %s6235_s16 = smov 8  }
 0x459   : > { %5907 = dma.vmem_to_hbm [thread:$0]  (%p8691_p5), %s8465_s24, 4096, %s8463_s17, %s4751_s20, %s6234_s25, %s6234_s25, %s6235_s16  }
 0x45a PF: > { %s8692_s18 = sld [smem:[#allocation16_spill]] }
 0x45b   : > { %s8693_s19 = sld [smem:[#allocation22_spill]] }
 0x45c   : > { %s8694_s28 = sld [smem:[#allocation19_spill]] }
 0x460   : > { %s4782_s29 = sand.u32 1, %s8692_s18  }
 0x461   : > { %p8695_p10 = scmp.ne.s32.totalorder %s8693_s19, 0  ;;  %s4783_s21 = scalar_lea.sflag [#allocation5], %s4782_s29 }
 0x462   : > { %p8696_p2 = scmp.ge.s32.totalorder %s8694_s28, 2 }
 0x464   : > { %p5924_p9 = pnand %p8696_p2, %p8695_p10 }
 0x466   : > { %p5925_p11 = pneg %p5924_p9 }
 0x468   : > { %6198 = dma.done.wait (%p5925_p11), %s4783_s21, 4096  }
 0x469   : > { %6200 = vsyncadd (%p5925_p11), %s4783_s21, 4294963200  ;;  %s29_s14 = sadd.s32 1, %s8694_s28   ;;  %s8697_s12 = sld [smem:[#allocation17_spill]] }
 0x46a   : > { %p26_p1 = scmp.ge.s32.totalorder %s29_s14, 4   ;;  %s8698_s11 = sld [smem:[#allocation21_spill]] }
 0x46b   : > { %s8699_s26 = sld [smem:[#allocation18_spill]]  ;;  %s8701_s30 = smov %s6207_s10 }
 0x46c   : > { %s8700_s13 = sld [smem:[#allocation20_spill]] }
 0x46d   :  { %28 = sbr.rel (!%p26_p1) target bundleno = 12 (0xc), region = 139 }
 0x46f   : > { %s8702_s10 = smov %s8697_s12 }
 0x471   : > { %s8703_s12 = smov %s8699_s26 }
 0x472   :  { %4788 = vsyncpa [#allocation4], 1 }
 0x473   :  { %4790 = vsyncpa [#allocation4 + $0x1], 1 }
 0x474   :  { %4791 = vsyncpa [#allocation7], 1 }
 0x475   :  { %4793 = vsyncpa [#allocation7 + $0x1], 1 }
 0x476   :  { %4794 = vsyncpa [#allocation10], 1 }
 0x477   :  { %4795 = vsyncpa [#allocation5], 1 }
 0x478   :  { %4797 = vsyncpa [#allocation5 + $0x1], 1 }

</bundles_post_ra>
